<compile_context>
chip_gen: v6e
topology: v6e:2x2x1
jax: 0.10.0
libtpu: 0.0.40
codegen_flags: <defaults>
</compile_context>

<pallas_src>
import functools

import jax
import jax.numpy as jnp
from jax.experimental import pallas as pl
from jax.experimental.pallas import tpu as pltpu

K_TAPS = 15   # kernel_size of conv1 / conv2 in SENET15
LANE = 128


def _round_up(n, m):
    return ((n + m - 1) // m) * m


def _vmem_limit_bytes():
    # ~75% of physical VMEM (48 MiB on v7x, 96 MiB on v5e/v6e), capped at 100 MiB.
    try:
        cap = int(pltpu.get_tpu_info().vmem_capacity_bytes)
    except Exception:
        cap = 128 * 1024 * 1024
    return max(32 * 1024 * 1024, min(100 * 1024 * 1024, (cap * 3) // 4))


# ---------------------------------------------------------------------------
# Fused SENET15 block kernel (one grid step == one batch element)
# ---------------------------------------------------------------------------
def _senet15_kernel(x_ref, mask_ref, w1_ref, b1_ref, w2_ref, b2_ref,
                    f1w_ref, f1b_ref, f2w_ref, f2b_ref, *rest,
                    L, cin_p, p_p, dil1, dil2, has_proj, tile_l):
    if has_proj:
        ws_ref, bs_ref, o_ref, im1_ref, im2_ref = rest
    else:
        o_ref, im1_ref, im2_ref = rest

    mxu = jnp.bfloat16
    pad1 = (K_TAPS - 1) // 2 * dil1
    pad2 = (K_TAPS - 1) // 2 * dil2
    halo1 = min(pad1, L)
    halo2 = min(pad2, L)

    # ---- im2col for conv1: im1[i, k*C:(k+1)*C] = x[i - pad1 + k*dil1] ---------
    # Zero only the halo rows (cells never written below); cast x to bf16 once.
    im1_ref[0:halo1, :] = jnp.zeros((halo1, K_TAPS * cin_p), mxu)
    im1_ref[L - halo1:L, :] = jnp.zeros((halo1, K_TAPS * cin_p), mxu)
    xb = x_ref[0].astype(mxu)                          # (L, cin_p) bf16, single cast
    for k in range(K_TAPS):
        off = pad1 - k * dil1                          # dest row = src row + off
        d_lo, d_hi = max(0, off), min(L, L + off)
        if d_hi > d_lo:
            s_lo = d_lo - off
            im1_ref[d_lo:d_hi, k * cin_p:(k + 1) * cin_p] = \
                xb[s_lo:s_lo + (d_hi - d_lo)]

    # Halo rows of the conv2 im2col are zeroed up-front; conv1 tiles stream
    # their (masked, bf16) results straight into it below.
    im2_ref[0:halo2, :] = jnp.zeros((halo2, K_TAPS * p_p), mxu)
    im2_ref[L - halo2:L, :] = jnp.zeros((halo2, K_TAPS * p_p), mxu)

    # ---- conv1 (one matmul per L-tile) + BN bias + ReLU + mask ---------------
    w1 = w1_ref[...]                                   # bf16, BN scale pre-folded
    b1 = b1_ref[...]
    for r0 in range(0, L, tile_l):
        r1 = min(L, r0 + tile_l)
        a = jnp.dot(im1_ref[r0:r1, :], w1, preferred_element_type=jnp.float32)
        o1 = jnp.maximum(a + b1, 0.0) * mask_ref[0, r0:r1, :]
        # TODO(synk): F.dropout(p=0.4) -> identity (inference mode)
        o1b = o1.astype(mxu)                           # single bf16 cast per tile
        for k in range(K_TAPS):                        # stream into conv2 im2col
            off = pad2 - k * dil2
            d_lo, d_hi = max(0, r0 + off), min(L, r1 + off)
            if d_hi > d_lo:
                s_lo = d_lo - (r0 + off)
                im2_ref[d_lo:d_hi, k * p_p:(k + 1) * p_p] = \
                    o1b[s_lo:s_lo + (d_hi - d_lo)]

    # ---- conv2 (one matmul per L-tile) + BN bias + ReLU + mask ---------------
    # o_ref doubles as the out2 store (read back in the post-gate epilogue).
    w2 = w2_ref[...]
    b2 = b2_ref[...]
    psum = jnp.zeros((1, p_p), jnp.float32)
    for r0 in range(0, L, tile_l):
        r1 = min(L, r0 + tile_l)
        a = jnp.dot(im2_ref[r0:r1, :], w2, preferred_element_type=jnp.float32)
        o2 = jnp.maximum(a + b2, 0.0) * mask_ref[0, r0:r1, :]
        psum = psum + jnp.sum(o2, axis=0, keepdims=True)
        o_ref[0, r0:r1, :] = o2.astype(o_ref.dtype)

    # ---- squeeze-excite gate (avg pool over L, fc1-relu, fc2-sigmoid) --------
    pooled = psum * (1.0 / L)                          # divide by full L (as PyTorch)
    h = jnp.maximum(jnp.dot(pooled, f1w_ref[...],
                            preferred_element_type=jnp.float32) + f1b_ref[...], 0.0)
    gate = jax.nn.sigmoid(jnp.dot(h, f2w_ref[...],
                                  preferred_element_type=jnp.float32) + f2b_ref[...])

    # ---- out2 * gate + shortcut -> ReLU (per L-tile) -------------------------
    if has_proj:
        ws = ws_ref[...]                               # bf16, BN scale pre-folded
        bs = bs_ref[...]
    for r0 in range(0, L, tile_l):
        r1 = min(L, r0 + tile_l)
        if has_proj:
            sc = jnp.dot(x_ref[0, r0:r1, :].astype(mxu), ws,
                         preferred_element_type=jnp.float32) + bs
        else:
            sc = x_ref[0, r0:r1, :].astype(jnp.float32)
        o2 = o_ref[0, r0:r1, :].astype(jnp.float32)
        o_ref[0, r0:r1, :] = jnp.maximum(o2 * gate + sc, 0.0).astype(o_ref.dtype)


# ---------------------------------------------------------------------------
# NLC entry point (use this when stacking blocks: no per-block transposes)
# ---------------------------------------------------------------------------
def senet15_forward_nlc(x_nlc, mask_nl1, params, *, tile_l=256):
    """x_nlc: (N, L, Cin); mask_nl1: (N, L, 1) -> (N, L, planes)."""
    N, L, Cin = x_nlc.shape
    P = params["w1"].shape[-1]
    R = params["f1w"].shape[-1]
    dil1, dil2 = params["dilation"]
    has_proj = "ws" in params
    if not has_proj:
        assert Cin == P, "identity shortcut requires in_planes == planes"

    cin_p = _round_up(Cin, LANE)
    p_p = _round_up(P, LANE)
    r_p = _round_up(R, LANE)
    tile_l = min(tile_l, L)

    mxu = jnp.bfloat16
    f32 = jnp.float32

    # Channel-padded activations (lane-dense loads / MXU K fill).
    x_p = jnp.pad(x_nlc.astype(f32), ((0, 0), (0, 0), (0, cin_p - Cin)))
    mask = mask_nl1.astype(f32)

    # Fold BN scales into conv weights, reshape to im2col layout, pre-cast bf16.
    def _prep_conv(w, scale, c_in, c_in_p):
        w = w * scale[None, None, :]
        w = jnp.pad(w, ((0, 0), (0, c_in_p - c_in), (0, p_p - P)))
        return w.reshape(K_TAPS * c_in_p, p_p).astype(mxu)

    w1_f = _prep_conv(params["w1"], params["s1"], Cin, cin_p)
    b1 = jnp.pad(params["b1"], (0, p_p - P)).reshape(1, p_p).astype(f32)
    w2_f = _prep_conv(params["w2"], params["s2"], P, p_p)
    b2 = jnp.pad(params["b2"], (0, p_p - P)).reshape(1, p_p).astype(f32)
    f1w = jnp.pad(params["f1w"], ((0, p_p - P), (0, r_p - R))).astype(f32)
    f1b = jnp.pad(params["f1b"], (0, r_p - R)).reshape(1, r_p).astype(f32)
    f2w = jnp.pad(params["f2w"], ((0, r_p - R), (0, p_p - P))).astype(f32)
    f2b = jnp.pad(params["f2b"], (0, p_p - P)).reshape(1, p_p).astype(f32)

    inputs = [x_p, mask, w1_f, b1, w2_f, b2, f1w, f1b, f2w, f2b]
    if has_proj:
        ws_f = jnp.pad(params["ws"] * params["ss"][None, :],
                       ((0, cin_p - Cin), (0, p_p - P))).astype(mxu)
        bs = jnp.pad(params["bs"], (0, p_p - P)).reshape(1, p_p).astype(f32)
        inputs += [ws_f, bs]

    def _wspec(arr, buffer_count):
        if buffer_count is None:
            return pl.BlockSpec(arr.shape, lambda n: (0, 0))
        return pl.BlockSpec(arr.shape, lambda n: (0, 0),
                            pipeline_mode=pl.Buffered(buffer_count))

    def _build(buffer_count):
        in_specs = [pl.BlockSpec((1, L, cin_p), lambda n: (n, 0, 0)),
                    pl.BlockSpec((1, L, 1), lambda n: (n, 0, 0))]
        in_specs += [_wspec(a, buffer_count) for a in inputs[2:]]
        kernel = functools.partial(
            _senet15_kernel, L=L, cin_p=cin_p, p_p=p_p,
            dil1=dil1, dil2=dil2, has_proj=has_proj, tile_l=tile_l)
        return pl.pallas_call(
            kernel,
            out_shape=jax.ShapeDtypeStruct((N, L, p_p), x_nlc.dtype),
            grid=(N,),
            in_specs=in_specs,
            out_specs=pl.BlockSpec((1, L, p_p), lambda n: (n, 0, 0)),
            scratch_shapes=[
                pltpu.VMEM((L, K_TAPS * cin_p), mxu),   # conv1 im2col (bf16)
                pltpu.VMEM((L, K_TAPS * p_p), mxu),     # conv2 im2col (bf16)
            ],
            compiler_params=pltpu.CompilerParams(
                dimension_semantics=("parallel",),       # batch sharded on megacore
                vmem_limit_bytes=_vmem_limit_bytes()),
        )

    try:
        # Grid-invariant weights: single-buffered to save VMEM (matters on v7x).
        out_p = _build(buffer_count=1)(*inputs)
    except Exception:
        out_p = _build(buffer_count=None)(*inputs)

    return out_p[:, :, :P]                              # drop padded channels


# ---------------------------------------------------------------------------
# PyTorch-layout wrapper: NCL in / NCL out (only transpose at network boundary)
# ---------------------------------------------------------------------------
def senet15_forward(x_ncl, mask_ncl, params, *, tile_l=256):
    """x_ncl: (N, Cin, L); mask_ncl: (N, 1, L) -> (N, planes, L)."""
    x_nlc = jnp.transpose(x_ncl, (0, 2, 1))
    mask_nl1 = jnp.transpose(mask_ncl, (0, 2, 1))
    out_nlc = senet15_forward_nlc(x_nlc, mask_nl1, params, tile_l=tile_l)
    return jnp.transpose(out_nlc, (0, 2, 1))


# ---------------------------------------------------------------------------
# Deterministic parameter construction (shapes from the PyTorch __init__),
# BatchNorm folded to per-channel scale/bias (eval mode, running stats).
# ---------------------------------------------------------------------------
def _folded_bn(key, c, eps=1e-5):
    k1, k2, k3, k4 = jax.random.split(key, 4)
    gamma = 1.0 + 0.1 * jax.random.normal(k1, (c,), jnp.float32)
    beta = 0.1 * jax.random.normal(k2, (c,), jnp.float32)
    mean = 0.1 * jax.random.normal(k3, (c,), jnp.float32)
    var = 1.0 + 0.1 * jnp.abs(jax.random.normal(k4, (c,), jnp.float32))
    scale = gamma / jnp.sqrt(var + eps)
    bias = beta - scale * mean
    return scale, bias


def init_senet15_params(key, in_planes, planes, dilation=(1, 2)):
    ks = jax.random.split(key, 10)
    R = planes // 16
    p = {"dilation": tuple(dilation)}
    p["w1"] = 0.1 * jax.random.normal(ks[0], (K_TAPS, in_planes, planes), jnp.float32)
    p["s1"], p["b1"] = _folded_bn(ks[1], planes)
    p["w2"] = 0.1 * jax.random.normal(ks[2], (K_TAPS, planes, planes), jnp.float32)
    p["s2"], p["b2"] = _folded_bn(ks[3], planes)
    p["f1w"] = 0.1 * jax.random.normal(ks[4], (planes, R), jnp.float32)
    p["f1b"] = 0.1 * jax.random.normal(ks[5], (R,), jnp.float32)
    p["f2w"] = 0.1 * jax.random.normal(ks[6], (R, planes), jnp.float32)
    p["f2b"] = 0.1 * jax.random.normal(ks[7], (planes,), jnp.float32)
    if in_planes != planes:                              # projection shortcut (conv1x1+BN)
        p["ws"] = 0.1 * jax.random.normal(ks[8], (in_planes, planes), jnp.float32)
        p["ss"], p["bs"] = _folded_bn(ks[9], planes)
    return p


# ---------------------------------------------------------------------------
# Pure-JAX reference (f32) for a numerical sanity check
# ---------------------------------------------------------------------------
def senet15_reference(x_ncl, mask_ncl, params):
    x = jnp.transpose(x_ncl, (0, 2, 1)).astype(jnp.float32)      # (N, L, Cin)
    m = jnp.transpose(mask_ncl, (0, 2, 1)).astype(jnp.float32)   # (N, L, 1)
    d1, d2 = params["dilation"]

    def conv_same(a, w, dil):
        N, L, _ = a.shape
        pad = (K_TAPS - 1) // 2 * dil
        ap = jnp.pad(a, ((0, 0), (pad, pad), (0, 0)))
        out = jnp.zeros((N, L, w.shape[-1]), jnp.float32)
        for k in range(K_TAPS):
            out = out + jnp.einsum("nlc,cd->nld", ap[:, k * dil:k * dil + L, :], w[k])
        return out

    out1 = jnp.maximum(conv_same(x, params["w1"], d1) * params["s1"] + params["b1"], 0.0) * m
    out2 = jnp.maximum(conv_same(out1, params["w2"], d2) * params["s2"] + params["b2"], 0.0) * m
    pooled = jnp.mean(out2, axis=1, keepdims=True)
    h = jnp.maximum(pooled @ params["f1w"] + params["f1b"], 0.0)
    gate = jax.nn.sigmoid(h @ params["f2w"] + params["f2b"])
    if "ws" in params:
        sc = (x @ params["ws"]) * params["ss"] + params["bs"]
    else:
        sc = x
    y = jnp.maximum(out2 * gate + sc, 0.0)
    return jnp.transpose(y, (0, 2, 1))


def _check(y, y_ref, name):
    assert bool(jnp.all(jnp.isfinite(y))), f"{name}: non-finite output"
    max_err = float(jnp.max(jnp.abs(y - y_ref)))
    tol = 5e-2 * max(1.0, float(jnp.max(jnp.abs(y_ref))))   # bf16 MXU vs f32 reference
    assert max_err < tol, f"{name}: max abs err {max_err} (tol {tol})"


if __name__ == "__main__":
    key = jax.random.PRNGKey(0)
    k_param, k_param2, k_x, k_x2 = jax.random.split(key, 4)

    N, Cin, L = 2, 4, 16                               # small test shapes
    planes = 32                                        # planes // 16 == 2 for SE gate

    lengths = jnp.array([L, L - 4])                    # deterministic seq mask
    mask = (jnp.arange(L)[None, :] < lengths[:, None]).astype(jnp.float32)[:, None, :]

    # --- projection-shortcut case (in_planes != planes) -----------------------
    params = init_senet15_params(k_param, in_planes=Cin, planes=planes, dilation=(1, 2))
    x = jax.random.normal(k_x, (N, Cin, L), jnp.float32)          # PyTorch NCL layout
    y = jax.block_until_ready(senet15_forward(x, mask, params))
    assert y.shape == (N, planes, L), y.shape
    _check(y, senet15_reference(x, mask, params), "proj")

    # --- identity-shortcut case (in_planes == planes) --------------------------
    params_id = init_senet15_params(k_param2, in_planes=planes, planes=planes, dilation=(1, 2))
    x_id = jax.random.normal(k_x2, (N, planes, L), jnp.float32)
    y_id = jax.block_until_ready(senet15_forward(x_id, mask, params_id))
    assert y_id.shape == (N, planes, L), y_id.shape
    _check(y_id, senet15_reference(x_id, mask, params_id), "identity")

    print("KERNEL_OK")
</pallas_src>

<mosaic_0001>
module attributes {stable_mosaic.version = 11 : i64} {
  func.func @_senet15_kernel(%arg0: i32, %arg1: memref<1x16x128xf32, #tpu.memory_space<vmem>>, %arg2: memref<1x16x1xf32, #tpu.memory_space<vmem>>, %arg3: memref<1920x128xbf16, #tpu.memory_space<vmem>>, %arg4: memref<1x128xf32, #tpu.memory_space<vmem>>, %arg5: memref<1920x128xbf16, #tpu.memory_space<vmem>>, %arg6: memref<1x128xf32, #tpu.memory_space<vmem>>, %arg7: memref<128x128xf32, #tpu.memory_space<vmem>>, %arg8: memref<1x128xf32, #tpu.memory_space<vmem>>, %arg9: memref<128x128xf32, #tpu.memory_space<vmem>>, %arg10: memref<1x128xf32, #tpu.memory_space<vmem>>, %arg11: memref<128x128xbf16, #tpu.memory_space<vmem>>, %arg12: memref<1x128xf32, #tpu.memory_space<vmem>>, %arg13: memref<1x16x128xf32, #tpu.memory_space<vmem>>, %arg14: memref<16x1920xbf16, #tpu.memory_space<vmem>>, %arg15: memref<16x1920xbf16, #tpu.memory_space<vmem>>) attributes {dimension_semantics = [#tpu.dimension_semantics<parallel>], iteration_bounds = array<i64: 2>, scalar_prefetch = 0 : i64, scratch_operands = 2 : i64, tpu.core_type = #tpu.core_type<tc>, window_params = [{transform_indices = @transform_0, window_bounds = array<i64: 1, 16, 128>}, {transform_indices = @transform_1, window_bounds = array<i64: 1, 16, 1>}, {pipeline_mode = #tpu.pipeline_mode<synchronous>, transform_indices = @transform_2, window_bounds = array<i64: 1920, 128>}, {pipeline_mode = #tpu.pipeline_mode<synchronous>, transform_indices = @transform_3, window_bounds = array<i64: 1, 128>}, {pipeline_mode = #tpu.pipeline_mode<synchronous>, transform_indices = @transform_4, window_bounds = array<i64: 1920, 128>}, {pipeline_mode = #tpu.pipeline_mode<synchronous>, transform_indices = @transform_5, window_bounds = array<i64: 1, 128>}, {pipeline_mode = #tpu.pipeline_mode<synchronous>, transform_indices = @transform_6, window_bounds = array<i64: 128, 128>}, {pipeline_mode = #tpu.pipeline_mode<synchronous>, transform_indices = @transform_7, window_bounds = array<i64: 1, 128>}, {pipeline_mode = #tpu.pipeline_mode<synchronous>, transform_indices = @transform_8, window_bounds = array<i64: 128, 128>}, {pipeline_mode = #tpu.pipeline_mode<synchronous>, transform_indices = @transform_9, window_bounds = array<i64: 1, 128>}, {pipeline_mode = #tpu.pipeline_mode<synchronous>, transform_indices = @transform_10, window_bounds = array<i64: 128, 128>}, {pipeline_mode = #tpu.pipeline_mode<synchronous>, transform_indices = @transform_11, window_bounds = array<i64: 1, 128>}, {transform_indices = @transform_12, window_bounds = array<i64: 1, 16, 128>}]} {
    %cst = arith.constant 0.000000e+00 : bf16
    %0 = vector.broadcast %cst : bf16 to vector<7x1920xbf16>
    %c0 = arith.constant 0 : index
    %c0_0 = arith.constant 0 : index
    %1 = vector.load %arg14[%c0, %c0_0] : memref<16x1920xbf16, #tpu.memory_space<vmem>>, vector<7x1920xbf16>
    tpu.vector_store %arg14[%c0, %c0_0], %0 {strides = array<i32>} : memref<16x1920xbf16, #tpu.memory_space<vmem>>, vector<7x1920xbf16>,
    %cst_1 = arith.constant 0.000000e+00 : bf16
    %2 = vector.broadcast %cst_1 : bf16 to vector<7x1920xbf16>
    %c9 = arith.constant 9 : index
    %c0_2 = arith.constant 0 : index
    %3 = vector.load %arg14[%c9, %c0_2] : memref<16x1920xbf16, #tpu.memory_space<vmem>>, vector<7x1920xbf16>
    tpu.vector_store %arg14[%c9, %c0_2], %2 {strides = array<i32>} : memref<16x1920xbf16, #tpu.memory_space<vmem>>, vector<7x1920xbf16>,
    %c0_3 = arith.constant 0 : index
    %c0_4 = arith.constant 0 : index
    %c0_5 = arith.constant 0 : index
    %4 = vector.load %arg1[%c0_3, %c0_4, %c0_5] : memref<1x16x128xf32, #tpu.memory_space<vmem>>, vector<1x16x128xf32>
    %5 = vector.shape_cast %4 : vector<1x16x128xf32> to vector<16x128xf32>
    %6 = arith.truncf %5 : vector<16x128xf32> to vector<16x128xbf16>
    %7 = vector.extract_strided_slice %6 {offsets = [0, 0], sizes = [9, 128], strides = [1, 1]} : vector<16x128xbf16> to vector<9x128xbf16>
    %c7 = arith.constant 7 : index
    %c0_6 = arith.constant 0 : index
    %8 = vector.load %arg14[%c7, %c0_6] : memref<16x1920xbf16, #tpu.memory_space<vmem>>, vector<9x128xbf16>
    tpu.vector_store %arg14[%c7, %c0_6], %7 {strides = array<i32>} : memref<16x1920xbf16, #tpu.memory_space<vmem>>, vector<9x128xbf16>,
    %9 = vector.extract_strided_slice %6 {offsets = [0, 0], sizes = [10, 128], strides = [1, 1]} : vector<16x128xbf16> to vector<10x128xbf16>
    %c6 = arith.constant 6 : index
    %c128 = arith.constant 128 : index
    %10 = vector.load %arg14[%c6, %c128] : memref<16x1920xbf16, #tpu.memory_space<vmem>>, vector<10x128xbf16>
    tpu.vector_store %arg14[%c6, %c128], %9 {strides = array<i32>} : memref<16x1920xbf16, #tpu.memory_space<vmem>>, vector<10x128xbf16>,
    %11 = vector.extract_strided_slice %6 {offsets = [0, 0], sizes = [11, 128], strides = [1, 1]} : vector<16x128xbf16> to vector<11x128xbf16>
    %c5 = arith.constant 5 : index
    %c256 = arith.constant 256 : index
    %12 = vector.load %arg14[%c5, %c256] : memref<16x1920xbf16, #tpu.memory_space<vmem>>, vector<11x128xbf16>
    tpu.vector_store %arg14[%c5, %c256], %11 {strides = array<i32>} : memref<16x1920xbf16, #tpu.memory_space<vmem>>, vector<11x128xbf16>,
    %13 = vector.extract_strided_slice %6 {offsets = [0, 0], sizes = [12, 128], strides = [1, 1]} : vector<16x128xbf16> to vector<12x128xbf16>
    %c4 = arith.constant 4 : index
    %c384 = arith.constant 384 : index
    %14 = vector.load %arg14[%c4, %c384] : memref<16x1920xbf16, #tpu.memory_space<vmem>>, vector<12x128xbf16>
    tpu.vector_store %arg14[%c4, %c384], %13 {strides = array<i32>} : memref<16x1920xbf16, #tpu.memory_space<vmem>>, vector<12x128xbf16>,
    %15 = vector.extract_strided_slice %6 {offsets = [0, 0], sizes = [13, 128], strides = [1, 1]} : vector<16x128xbf16> to vector<13x128xbf16>
    %c3 = arith.constant 3 : index
    %c512 = arith.constant 512 : index
    %16 = vector.load %arg14[%c3, %c512] : memref<16x1920xbf16, #tpu.memory_space<vmem>>, vector<13x128xbf16>
    tpu.vector_store %arg14[%c3, %c512], %15 {strides = array<i32>} : memref<16x1920xbf16, #tpu.memory_space<vmem>>, vector<13x128xbf16>,
    %17 = vector.extract_strided_slice %6 {offsets = [0, 0], sizes = [14, 128], strides = [1, 1]} : vector<16x128xbf16> to vector<14x128xbf16>
    %c2 = arith.constant 2 : index
    %c640 = arith.constant 640 : index
    %18 = vector.load %arg14[%c2, %c640] : memref<16x1920xbf16, #tpu.memory_space<vmem>>, vector<14x128xbf16>
    tpu.vector_store %arg14[%c2, %c640], %17 {strides = array<i32>} : memref<16x1920xbf16, #tpu.memory_space<vmem>>, vector<14x128xbf16>,
    %19 = vector.extract_strided_slice %6 {offsets = [0, 0], sizes = [15, 128], strides = [1, 1]} : vector<16x128xbf16> to vector<15x128xbf16>
    %c1 = arith.constant 1 : index
    %c768 = arith.constant 768 : index
    %20 = vector.load %arg14[%c1, %c768] : memref<16x1920xbf16, #tpu.memory_space<vmem>>, vector<15x128xbf16>
    tpu.vector_store %arg14[%c1, %c768], %19 {strides = array<i32>} : memref<16x1920xbf16, #tpu.memory_space<vmem>>, vector<15x128xbf16>,
    %c0_7 = arith.constant 0 : index
    %c896 = arith.constant 896 : index
    %21 = vector.load %arg14[%c0_7, %c896] : memref<16x1920xbf16, #tpu.memory_space<vmem>>, vector<16x128xbf16>
    tpu.vector_store %arg14[%c0_7, %c896], %6 {strides = array<i32>} : memref<16x1920xbf16, #tpu.memory_space<vmem>>, vector<16x128xbf16>,
    %22 = vector.extract_strided_slice %6 {offsets = [1, 0], sizes = [15, 128], strides = [1, 1]} : vector<16x128xbf16> to vector<15x128xbf16>
    %c0_8 = arith.constant 0 : index
    %c1024 = arith.constant 1024 : index
    %23 = vector.load %arg14[%c0_8, %c1024] : memref<16x1920xbf16, #tpu.memory_space<vmem>>, vector<15x128xbf16>
    tpu.vector_store %arg14[%c0_8, %c1024], %22 {strides = array<i32>} : memref<16x1920xbf16, #tpu.memory_space<vmem>>, vector<15x128xbf16>,
    %24 = vector.extract_strided_slice %6 {offsets = [2, 0], sizes = [14, 128], strides = [1, 1]} : vector<16x128xbf16> to vector<14x128xbf16>
    %c0_9 = arith.constant 0 : index
    %c1152 = arith.constant 1152 : index
    %25 = vector.load %arg14[%c0_9, %c1152] : memref<16x1920xbf16, #tpu.memory_space<vmem>>, vector<14x128xbf16>
    tpu.vector_store %arg14[%c0_9, %c1152], %24 {strides = array<i32>} : memref<16x1920xbf16, #tpu.memory_space<vmem>>, vector<14x128xbf16>,
    %26 = vector.extract_strided_slice %6 {offsets = [3, 0], sizes = [13, 128], strides = [1, 1]} : vector<16x128xbf16> to vector<13x128xbf16>
    %c0_10 = arith.constant 0 : index
    %c1280 = arith.constant 1280 : index
    %27 = vector.load %arg14[%c0_10, %c1280] : memref<16x1920xbf16, #tpu.memory_space<vmem>>, vector<13x128xbf16>
    tpu.vector_store %arg14[%c0_10, %c1280], %26 {strides = array<i32>} : memref<16x1920xbf16, #tpu.memory_space<vmem>>, vector<13x128xbf16>,
    %28 = vector.extract_strided_slice %6 {offsets = [4, 0], sizes = [12, 128], strides = [1, 1]} : vector<16x128xbf16> to vector<12x128xbf16>
    %c0_11 = arith.constant 0 : index
    %c1408 = arith.constant 1408 : index
    %29 = vector.load %arg14[%c0_11, %c1408] : memref<16x1920xbf16, #tpu.memory_space<vmem>>, vector<12x128xbf16>
    tpu.vector_store %arg14[%c0_11, %c1408], %28 {strides = array<i32>} : memref<16x1920xbf16, #tpu.memory_space<vmem>>, vector<12x128xbf16>,
    %30 = vector.extract_strided_slice %6 {offsets = [5, 0], sizes = [11, 128], strides = [1, 1]} : vector<16x128xbf16> to vector<11x128xbf16>
    %c0_12 = arith.constant 0 : index
    %c1536 = arith.constant 1536 : index
    %31 = vector.load %arg14[%c0_12, %c1536] : memref<16x1920xbf16, #tpu.memory_space<vmem>>, vector<11x128xbf16>
    tpu.vector_store %arg14[%c0_12, %c1536], %30 {strides = array<i32>} : memref<16x1920xbf16, #tpu.memory_space<vmem>>, vector<11x128xbf16>,
    %32 = vector.extract_strided_slice %6 {offsets = [6, 0], sizes = [10, 128], strides = [1, 1]} : vector<16x128xbf16> to vector<10x128xbf16>
    %c0_13 = arith.constant 0 : index
    %c1664 = arith.constant 1664 : index
    %33 = vector.load %arg14[%c0_13, %c1664] : memref<16x1920xbf16, #tpu.memory_space<vmem>>, vector<10x128xbf16>
    tpu.vector_store %arg14[%c0_13, %c1664], %32 {strides = array<i32>} : memref<16x1920xbf16, #tpu.memory_space<vmem>>, vector<10x128xbf16>,
    %34 = vector.extract_strided_slice %6 {offsets = [7, 0], sizes = [9, 128], strides = [1, 1]} : vector<16x128xbf16> to vector<9x128xbf16>
    %c0_14 = arith.constant 0 : index
    %c1792 = arith.constant 1792 : index
    %35 = vector.load %arg14[%c0_14, %c1792] : memref<16x1920xbf16, #tpu.memory_space<vmem>>, vector<9x128xbf16>
    tpu.vector_store %arg14[%c0_14, %c1792], %34 {strides = array<i32>} : memref<16x1920xbf16, #tpu.memory_space<vmem>>, vector<9x128xbf16>,
    %cst_15 = arith.constant 0.000000e+00 : bf16
    %36 = vector.broadcast %cst_15 : bf16 to vector<14x1920xbf16>
    %c0_16 = arith.constant 0 : index
    %c0_17 = arith.constant 0 : index
    %37 = vector.load %arg15[%c0_16, %c0_17] : memref<16x1920xbf16, #tpu.memory_space<vmem>>, vector<14x1920xbf16>
    tpu.vector_store %arg15[%c0_16, %c0_17], %36 {strides = array<i32>} : memref<16x1920xbf16, #tpu.memory_space<vmem>>, vector<14x1920xbf16>,
    %cst_18 = arith.constant 0.000000e+00 : bf16
    %38 = vector.broadcast %cst_18 : bf16 to vector<14x1920xbf16>
    %c2_19 = arith.constant 2 : index
    %c0_20 = arith.constant 0 : index
    %39 = vector.load %arg15[%c2_19, %c0_20] : memref<16x1920xbf16, #tpu.memory_space<vmem>>, vector<14x1920xbf16>
    tpu.vector_store %arg15[%c2_19, %c0_20], %38 {strides = array<i32>} : memref<16x1920xbf16, #tpu.memory_space<vmem>>, vector<14x1920xbf16>,
    %c0_21 = arith.constant 0 : index
    %c0_22 = arith.constant 0 : index
    %40 = vector.load %arg3[%c0_21, %c0_22] : memref<1920x128xbf16, #tpu.memory_space<vmem>>, vector<1920x128xbf16>
    %c0_23 = arith.constant 0 : index
    %c0_24 = arith.constant 0 : index
    %41 = vector.load %arg4[%c0_23, %c0_24] : memref<1x128xf32, #tpu.memory_space<vmem>>, vector<1x128xf32>
    %c0_25 = arith.constant 0 : index
    %c0_26 = arith.constant 0 : index
    %42 = vector.load %arg14[%c0_25, %c0_26] : memref<16x1920xbf16, #tpu.memory_space<vmem>>, vector<16x1920xbf16>
    %cst_27 = arith.constant dense<0.000000e+00> : vector<16x128xf32>
    %43 = tpu.matmul %42, %40, %cst_27 {dimension_numbers = #tpu.dot_dimension_numbers<[1], [0], [0], [1], [0, 0, 1, 1], [], []>} : vector<16x1920xbf16>, vector<1920x128xbf16>, vector<16x128xf32> -> vector<16x128xf32>
    %44 = vector.broadcast %41 : vector<1x128xf32> to vector<16x128xf32>
    %45 = arith.addf %43, %44 : vector<16x128xf32>
    %cst_28 = arith.constant 0.000000e+00 : f32
    %46 = vector.broadcast %cst_28 : f32 to vector<16x128xf32>
    %47 = arith.maximumf %45, %46 : vector<16x128xf32>
    %c0_29 = arith.constant 0 : index
    %c0_30 = arith.constant 0 : index
    %c0_31 = arith.constant 0 : index
    %48 = vector.load %arg2[%c0_29, %c0_30, %c0_31] : memref<1x16x1xf32, #tpu.memory_space<vmem>>, vector<1x16x1xf32>
    %49 = vector.shape_cast %48 : vector<1x16x1xf32> to vector<16x1xf32>
    %50 = vector.broadcast %49 : vector<16x1xf32> to vector<16x128xf32>
    %51 = arith.mulf %47, %50 : vector<16x128xf32>
    %52 = arith.truncf %51 : vector<16x128xf32> to vector<16x128xbf16>
    %53 = vector.extract_strided_slice %52 {offsets = [0, 0], sizes = [2, 128], strides = [1, 1]} : vector<16x128xbf16> to vector<2x128xbf16>
    %c14 = arith.constant 14 : index
    %c0_32 = arith.constant 0 : index
    %54 = vector.load %arg15[%c14, %c0_32] : memref<16x1920xbf16, #tpu.memory_space<vmem>>, vector<2x128xbf16>
    tpu.vector_store %arg15[%c14, %c0_32], %53 {strides = array<i32>} : memref<16x1920xbf16, #tpu.memory_space<vmem>>, vector<2x128xbf16>,
    %55 = vector.extract_strided_slice %52 {offsets = [0, 0], sizes = [4, 128], strides = [1, 1]} : vector<16x128xbf16> to vector<4x128xbf16>
    %c12 = arith.constant 12 : index
    %c128_33 = arith.constant 128 : index
    %56 = vector.load %arg15[%c12, %c128_33] : memref<16x1920xbf16, #tpu.memory_space<vmem>>, vector<4x128xbf16>
    tpu.vector_store %arg15[%c12, %c128_33], %55 {strides = array<i32>} : memref<16x1920xbf16, #tpu.memory_space<vmem>>, vector<4x128xbf16>,
    %57 = vector.extract_strided_slice %52 {offsets = [0, 0], sizes = [6, 128], strides = [1, 1]} : vector<16x128xbf16> to vector<6x128xbf16>
    %c10 = arith.constant 10 : index
    %c256_34 = arith.constant 256 : index
    %58 = vector.load %arg15[%c10, %c256_34] : memref<16x1920xbf16, #tpu.memory_space<vmem>>, vector<6x128xbf16>
    tpu.vector_store %arg15[%c10, %c256_34], %57 {strides = array<i32>} : memref<16x1920xbf16, #tpu.memory_space<vmem>>, vector<6x128xbf16>,
    %59 = vector.extract_strided_slice %52 {offsets = [0, 0], sizes = [8, 128], strides = [1, 1]} : vector<16x128xbf16> to vector<8x128xbf16>
    %c8 = arith.constant 8 : index
    %c384_35 = arith.constant 384 : index
    %60 = vector.load %arg15[%c8, %c384_35] : memref<16x1920xbf16, #tpu.memory_space<vmem>>, vector<8x128xbf16>
    tpu.vector_store %arg15[%c8, %c384_35], %59 {strides = array<i32>} : memref<16x1920xbf16, #tpu.memory_space<vmem>>, vector<8x128xbf16>,
    %61 = vector.extract_strided_slice %52 {offsets = [0, 0], sizes = [10, 128], strides = [1, 1]} : vector<16x128xbf16> to vector<10x128xbf16>
    %c6_36 = arith.constant 6 : index
    %c512_37 = arith.constant 512 : index
    %62 = vector.load %arg15[%c6_36, %c512_37] : memref<16x1920xbf16, #tpu.memory_space<vmem>>, vector<10x128xbf16>
    tpu.vector_store %arg15[%c6_36, %c512_37], %61 {strides = array<i32>} : memref<16x1920xbf16, #tpu.memory_space<vmem>>, vector<10x128xbf16>,
    %63 = vector.extract_strided_slice %52 {offsets = [0, 0], sizes = [12, 128], strides = [1, 1]} : vector<16x128xbf16> to vector<12x128xbf16>
    %c4_38 = arith.constant 4 : index
    %c640_39 = arith.constant 640 : index
    %64 = vector.load %arg15[%c4_38, %c640_39] : memref<16x1920xbf16, #tpu.memory_space<vmem>>, vector<12x128xbf16>
    tpu.vector_store %arg15[%c4_38, %c640_39], %63 {strides = array<i32>} : memref<16x1920xbf16, #tpu.memory_space<vmem>>, vector<12x128xbf16>,
    %65 = vector.extract_strided_slice %52 {offsets = [0, 0], sizes = [14, 128], strides = [1, 1]} : vector<16x128xbf16> to vector<14x128xbf16>
    %c2_40 = arith.constant 2 : index
    %c768_41 = arith.constant 768 : index
    %66 = vector.load %arg15[%c2_40, %c768_41] : memref<16x1920xbf16, #tpu.memory_space<vmem>>, vector<14x128xbf16>
    tpu.vector_store %arg15[%c2_40, %c768_41], %65 {strides = array<i32>} : memref<16x1920xbf16, #tpu.memory_space<vmem>>, vector<14x128xbf16>,
    %c0_42 = arith.constant 0 : index
    %c896_43 = arith.constant 896 : index
    %67 = vector.load %arg15[%c0_42, %c896_43] : memref<16x1920xbf16, #tpu.memory_space<vmem>>, vector<16x128xbf16>
    tpu.vector_store %arg15[%c0_42, %c896_43], %52 {strides = array<i32>} : memref<16x1920xbf16, #tpu.memory_space<vmem>>, vector<16x128xbf16>,
    %68 = vector.extract_strided_slice %52 {offsets = [2, 0], sizes = [14, 128], strides = [1, 1]} : vector<16x128xbf16> to vector<14x128xbf16>
    %c0_44 = arith.constant 0 : index
    %c1024_45 = arith.constant 1024 : index
    %69 = vector.load %arg15[%c0_44, %c1024_45] : memref<16x1920xbf16, #tpu.memory_space<vmem>>, vector<14x128xbf16>
    tpu.vector_store %arg15[%c0_44, %c1024_45], %68 {strides = array<i32>} : memref<16x1920xbf16, #tpu.memory_space<vmem>>, vector<14x128xbf16>,
    %70 = vector.extract_strided_slice %52 {offsets = [4, 0], sizes = [12, 128], strides = [1, 1]} : vector<16x128xbf16> to vector<12x128xbf16>
    %c0_46 = arith.constant 0 : index
    %c1152_47 = arith.constant 1152 : index
    %71 = vector.load %arg15[%c0_46, %c1152_47] : memref<16x1920xbf16, #tpu.memory_space<vmem>>, vector<12x128xbf16>
    tpu.vector_store %arg15[%c0_46, %c1152_47], %70 {strides = array<i32>} : memref<16x1920xbf16, #tpu.memory_space<vmem>>, vector<12x128xbf16>,
    %72 = vector.extract_strided_slice %52 {offsets = [6, 0], sizes = [10, 128], strides = [1, 1]} : vector<16x128xbf16> to vector<10x128xbf16>
    %c0_48 = arith.constant 0 : index
    %c1280_49 = arith.constant 1280 : index
    %73 = vector.load %arg15[%c0_48, %c1280_49] : memref<16x1920xbf16, #tpu.memory_space<vmem>>, vector<10x128xbf16>
    tpu.vector_store %arg15[%c0_48, %c1280_49], %72 {strides = array<i32>} : memref<16x1920xbf16, #tpu.memory_space<vmem>>, vector<10x128xbf16>,
    %74 = vector.extract_strided_slice %52 {offsets = [8, 0], sizes = [8, 128], strides = [1, 1]} : vector<16x128xbf16> to vector<8x128xbf16>
    %c0_50 = arith.constant 0 : index
    %c1408_51 = arith.constant 1408 : index
    %75 = vector.load %arg15[%c0_50, %c1408_51] : memref<16x1920xbf16, #tpu.memory_space<vmem>>, vector<8x128xbf16>
    tpu.vector_store %arg15[%c0_50, %c1408_51], %74 {strides = array<i32>} : memref<16x1920xbf16, #tpu.memory_space<vmem>>, vector<8x128xbf16>,
    %76 = vector.extract_strided_slice %52 {offsets = [10, 0], sizes = [6, 128], strides = [1, 1]} : vector<16x128xbf16> to vector<6x128xbf16>
    %c0_52 = arith.constant 0 : index
    %c1536_53 = arith.constant 1536 : index
    %77 = vector.load %arg15[%c0_52, %c1536_53] : memref<16x1920xbf16, #tpu.memory_space<vmem>>, vector<6x128xbf16>
    tpu.vector_store %arg15[%c0_52, %c1536_53], %76 {strides = array<i32>} : memref<16x1920xbf16, #tpu.memory_space<vmem>>, vector<6x128xbf16>,
    %78 = vector.extract_strided_slice %52 {offsets = [12, 0], sizes = [4, 128], strides = [1, 1]} : vector<16x128xbf16> to vector<4x128xbf16>
    %c0_54 = arith.constant 0 : index
    %c1664_55 = arith.constant 1664 : index
    %79 = vector.load %arg15[%c0_54, %c1664_55] : memref<16x1920xbf16, #tpu.memory_space<vmem>>, vector<4x128xbf16>
    tpu.vector_store %arg15[%c0_54, %c1664_55], %78 {strides = array<i32>} : memref<16x1920xbf16, #tpu.memory_space<vmem>>, vector<4x128xbf16>,
    %80 = vector.extract_strided_slice %52 {offsets = [14, 0], sizes = [2, 128], strides = [1, 1]} : vector<16x128xbf16> to vector<2x128xbf16>
    %c0_56 = arith.constant 0 : index
    %c1792_57 = arith.constant 1792 : index
    %81 = vector.load %arg15[%c0_56, %c1792_57] : memref<16x1920xbf16, #tpu.memory_space<vmem>>, vector<2x128xbf16>
    tpu.vector_store %arg15[%c0_56, %c1792_57], %80 {strides = array<i32>} : memref<16x1920xbf16, #tpu.memory_space<vmem>>, vector<2x128xbf16>,
    %c0_58 = arith.constant 0 : index
    %c0_59 = arith.constant 0 : index
    %82 = vector.load %arg5[%c0_58, %c0_59] : memref<1920x128xbf16, #tpu.memory_space<vmem>>, vector<1920x128xbf16>
    %c0_60 = arith.constant 0 : index
    %c0_61 = arith.constant 0 : index
    %83 = vector.load %arg6[%c0_60, %c0_61] : memref<1x128xf32, #tpu.memory_space<vmem>>, vector<1x128xf32>
    %cst_62 = arith.constant 0.000000e+00 : f32
    %84 = vector.broadcast %cst_62 : f32 to vector<1x128xf32>
    %c0_63 = arith.constant 0 : index
    %c0_64 = arith.constant 0 : index
    %85 = vector.load %arg15[%c0_63, %c0_64] : memref<16x1920xbf16, #tpu.memory_space<vmem>>, vector<16x1920xbf16>
    %cst_65 = arith.constant dense<0.000000e+00> : vector<16x128xf32>
    %86 = tpu.matmul %85, %82, %cst_65 {dimension_numbers = #tpu.dot_dimension_numbers<[1], [0], [0], [1], [0, 0, 1, 1], [], []>} : vector<16x1920xbf16>, vector<1920x128xbf16>, vector<16x128xf32> -> vector<16x128xf32>
    %87 = vector.broadcast %83 : vector<1x128xf32> to vector<16x128xf32>
    %88 = arith.addf %86, %87 : vector<16x128xf32>
    %cst_66 = arith.constant 0.000000e+00 : f32
    %89 = vector.broadcast %cst_66 : f32 to vector<16x128xf32>
    %90 = arith.maximumf %88, %89 : vector<16x128xf32>
    %c0_67 = arith.constant 0 : index
    %c0_68 = arith.constant 0 : index
    %c0_69 = arith.constant 0 : index
    %91 = vector.load %arg2[%c0_67, %c0_68, %c0_69] : memref<1x16x1xf32, #tpu.memory_space<vmem>>, vector<1x16x1xf32>
    %92 = vector.shape_cast %91 : vector<1x16x1xf32> to vector<16x1xf32>
    %93 = vector.broadcast %92 : vector<16x1xf32> to vector<16x128xf32>
    %94 = arith.mulf %90, %93 : vector<16x128xf32>
    %cst_70 = arith.constant dense<0.000000e+00> : vector<128xf32>
    %95 = vector.multi_reduction <add>, %94, %cst_70 [0] : vector<16x128xf32> to vector<128xf32>
    %96 = vector.shape_cast %95 : vector<128xf32> to vector<1x128xf32>
    %97 = arith.addf %84, %96 : vector<1x128xf32>
    %c0_71 = arith.constant 0 : index
    %c0_72 = arith.constant 0 : index
    %c0_73 = arith.constant 0 : index
    %98 = vector.load %arg13[%c0_71, %c0_72, %c0_73] : memref<1x16x128xf32, #tpu.memory_space<vmem>>, vector<1x16x128xf32>
    %99 = vector.shape_cast %98 : vector<1x16x128xf32> to vector<16x128xf32>
    %100 = vector.shape_cast %94 : vector<16x128xf32> to vector<1x16x128xf32>
    tpu.vector_store %arg13[%c0_71, %c0_72, %c0_73], %100 {strides = array<i32>} : memref<1x16x128xf32, #tpu.memory_space<vmem>>, vector<1x16x128xf32>,
    %cst_74 = arith.constant 6.250000e-02 : f32
    %101 = vector.broadcast %cst_74 : f32 to vector<1x128xf32>
    %102 = arith.mulf %97, %101 : vector<1x128xf32>
    %c0_75 = arith.constant 0 : index
    %c0_76 = arith.constant 0 : index
    %103 = vector.load %arg7[%c0_75, %c0_76] : memref<128x128xf32, #tpu.memory_space<vmem>>, vector<128x128xf32>
    %cst_77 = arith.constant dense<0.000000e+00> : vector<1x128xf32>
    %104 = tpu.matmul %102, %103, %cst_77 {dimension_numbers = #tpu.dot_dimension_numbers<[1], [0], [0], [1], [0, 0, 1, 1], [], []>} : vector<1x128xf32>, vector<128x128xf32>, vector<1x128xf32> -> vector<1x128xf32>
    %c0_78 = arith.constant 0 : index
    %c0_79 = arith.constant 0 : index
    %105 = vector.load %arg8[%c0_78, %c0_79] : memref<1x128xf32, #tpu.memory_space<vmem>>, vector<1x128xf32>
    %106 = arith.addf %104, %105 : vector<1x128xf32>
    %cst_80 = arith.constant 0.000000e+00 : f32
    %107 = vector.broadcast %cst_80 : f32 to vector<1x128xf32>
    %108 = arith.maximumf %106, %107 : vector<1x128xf32>
    %c0_81 = arith.constant 0 : index
    %c0_82 = arith.constant 0 : index
    %109 = vector.load %arg9[%c0_81, %c0_82] : memref<128x128xf32, #tpu.memory_space<vmem>>, vector<128x128xf32>
    %cst_83 = arith.constant dense<0.000000e+00> : vector<1x128xf32>
    %110 = tpu.matmul %108, %109, %cst_83 {dimension_numbers = #tpu.dot_dimension_numbers<[1], [0], [0], [1], [0, 0, 1, 1], [], []>} : vector<1x128xf32>, vector<128x128xf32>, vector<1x128xf32> -> vector<1x128xf32>
    %c0_84 = arith.constant 0 : index
    %c0_85 = arith.constant 0 : index
    %111 = vector.load %arg10[%c0_84, %c0_85] : memref<1x128xf32, #tpu.memory_space<vmem>>, vector<1x128xf32>
    %112 = arith.addf %110, %111 : vector<1x128xf32>
    %113 = arith.negf %112 : vector<1x128xf32>
    %114 = math.exp %113 : vector<1x128xf32>
    %cst_86 = arith.constant 1.000000e+00 : f32
    %115 = vector.broadcast %cst_86 : f32 to vector<1x128xf32>
    %116 = arith.addf %115, %114 : vector<1x128xf32>
    %117 = arith.divf %115, %116 : vector<1x128xf32>
    %c0_87 = arith.constant 0 : index
    %c0_88 = arith.constant 0 : index
    %118 = vector.load %arg11[%c0_87, %c0_88] : memref<128x128xbf16, #tpu.memory_space<vmem>>, vector<128x128xbf16>
    %c0_89 = arith.constant 0 : index
    %c0_90 = arith.constant 0 : index
    %119 = vector.load %arg12[%c0_89, %c0_90] : memref<1x128xf32, #tpu.memory_space<vmem>>, vector<1x128xf32>
    %c0_91 = arith.constant 0 : index
    %c0_92 = arith.constant 0 : index
    %c0_93 = arith.constant 0 : index
    %120 = vector.load %arg1[%c0_91, %c0_92, %c0_93] : memref<1x16x128xf32, #tpu.memory_space<vmem>>, vector<1x16x128xf32>
    %121 = vector.shape_cast %120 : vector<1x16x128xf32> to vector<16x128xf32>
    %122 = arith.truncf %121 : vector<16x128xf32> to vector<16x128xbf16>
    %cst_94 = arith.constant dense<0.000000e+00> : vector<16x128xf32>
    %123 = tpu.matmul %122, %118, %cst_94 {dimension_numbers = #tpu.dot_dimension_numbers<[1], [0], [0], [1], [0, 0, 1, 1], [], []>} : vector<16x128xbf16>, vector<128x128xbf16>, vector<16x128xf32> -> vector<16x128xf32>
    %124 = vector.broadcast %119 : vector<1x128xf32> to vector<16x128xf32>
    %125 = arith.addf %123, %124 : vector<16x128xf32>
    %c0_95 = arith.constant 0 : index
    %c0_96 = arith.constant 0 : index
    %c0_97 = arith.constant 0 : index
    %126 = vector.load %arg13[%c0_95, %c0_96, %c0_97] : memref<1x16x128xf32, #tpu.memory_space<vmem>>, vector<1x16x128xf32>
    %127 = vector.shape_cast %126 : vector<1x16x128xf32> to vector<16x128xf32>
    %128 = vector.broadcast %117 : vector<1x128xf32> to vector<16x128xf32>
    %129 = arith.mulf %127, %128 : vector<16x128xf32>
    %130 = arith.addf %129, %125 : vector<16x128xf32>
    %cst_98 = arith.constant 0.000000e+00 : f32
    %131 = vector.broadcast %cst_98 : f32 to vector<16x128xf32>
    %132 = arith.maximumf %130, %131 : vector<16x128xf32>
    %c0_99 = arith.constant 0 : index
    %c0_100 = arith.constant 0 : index
    %c0_101 = arith.constant 0 : index
    %133 = vector.load %arg13[%c0_99, %c0_100, %c0_101] : memref<1x16x128xf32, #tpu.memory_space<vmem>>, vector<1x16x128xf32>
    %134 = vector.shape_cast %133 : vector<1x16x128xf32> to vector<16x128xf32>
    %135 = vector.shape_cast %132 : vector<16x128xf32> to vector<1x16x128xf32>
    tpu.vector_store %arg13[%c0_99, %c0_100, %c0_101], %135 {strides = array<i32>} : memref<1x16x128xf32, #tpu.memory_space<vmem>>, vector<1x16x128xf32>,
    return
  }
  func.func @transform_0(%arg0: i32) -> (i32, i32, i32) {
    %c0_i32 = arith.constant 0 : i32
    %c0_i32_0 = arith.constant 0 : i32
    %c0_i32_1 = arith.constant 0 : i32
    return %arg0, %c0_i32, %c0_i32_0 : i32, i32, i32
  }
  func.func @transform_1(%arg0: i32) -> (i32, i32, i32) {
    %c0_i32 = arith.constant 0 : i32
    %c0_i32_0 = arith.constant 0 : i32
    %c0_i32_1 = arith.constant 0 : i32
    return %arg0, %c0_i32, %c0_i32_0 : i32, i32, i32
  }
  func.func @transform_2(%arg0: i32) -> (i32, i32) {
    %c0_i32 = arith.constant 0 : i32
    %c0_i32_0 = arith.constant 0 : i32
    %c0_i32_1 = arith.constant 0 : i32
    return %c0_i32, %c0_i32_0 : i32, i32
  }
  func.func @transform_3(%arg0: i32) -> (i32, i32) {
    %c0_i32 = arith.constant 0 : i32
    %c0_i32_0 = arith.constant 0 : i32
    %c0_i32_1 = arith.constant 0 : i32
    return %c0_i32, %c0_i32_0 : i32, i32
  }
  func.func @transform_4(%arg0: i32) -> (i32, i32) {
    %c0_i32 = arith.constant 0 : i32
    %c0_i32_0 = arith.constant 0 : i32
    %c0_i32_1 = arith.constant 0 : i32
    return %c0_i32, %c0_i32_0 : i32, i32
  }
  func.func @transform_5(%arg0: i32) -> (i32, i32) {
    %c0_i32 = arith.constant 0 : i32
    %c0_i32_0 = arith.constant 0 : i32
    %c0_i32_1 = arith.constant 0 : i32
    return %c0_i32, %c0_i32_0 : i32, i32
  }
  func.func @transform_6(%arg0: i32) -> (i32, i32) {
    %c0_i32 = arith.constant 0 : i32
    %c0_i32_0 = arith.constant 0 : i32
    %c0_i32_1 = arith.constant 0 : i32
    return %c0_i32, %c0_i32_0 : i32, i32
  }
  func.func @transform_7(%arg0: i32) -> (i32, i32) {
    %c0_i32 = arith.constant 0 : i32
    %c0_i32_0 = arith.constant 0 : i32
    %c0_i32_1 = arith.constant 0 : i32
    return %c0_i32, %c0_i32_0 : i32, i32
  }
  func.func @transform_8(%arg0: i32) -> (i32, i32) {
    %c0_i32 = arith.constant 0 : i32
    %c0_i32_0 = arith.constant 0 : i32
    %c0_i32_1 = arith.constant 0 : i32
    return %c0_i32, %c0_i32_0 : i32, i32
  }
  func.func @transform_9(%arg0: i32) -> (i32, i32) {
    %c0_i32 = arith.constant 0 : i32
    %c0_i32_0 = arith.constant 0 : i32
    %c0_i32_1 = arith.constant 0 : i32
    return %c0_i32, %c0_i32_0 : i32, i32
  }
  func.func @transform_10(%arg0: i32) -> (i32, i32) {
    %c0_i32 = arith.constant 0 : i32
    %c0_i32_0 = arith.constant 0 : i32
    %c0_i32_1 = arith.constant 0 : i32
    return %c0_i32, %c0_i32_0 : i32, i32
  }
  func.func @transform_11(%arg0: i32) -> (i32, i32) {
    %c0_i32 = arith.constant 0 : i32
    %c0_i32_0 = arith.constant 0 : i32
    %c0_i32_1 = arith.constant 0 : i32
    return %c0_i32, %c0_i32_0 : i32, i32
  }
  func.func @transform_12(%arg0: i32) -> (i32, i32, i32) {
    %c0_i32 = arith.constant 0 : i32
    %c0_i32_0 = arith.constant 0 : i32
    %c0_i32_1 = arith.constant 0 : i32
    return %arg0, %c0_i32, %c0_i32_0 : i32, i32, i32
  }
}

module attributes {stable_mosaic.version = 11 : i64} {
  func.func @_senet15_kernel(%arg0: i32, %arg1: memref<1x16x128xf32, #tpu.memory_space<vmem>>, %arg2: memref<1x16x1xf32, #tpu.memory_space<vmem>>, %arg3: memref<1920x128xbf16, #tpu.memory_space<vmem>>, %arg4: memref<1x128xf32, #tpu.memory_space<vmem>>, %arg5: memref<1920x128xbf16, #tpu.memory_space<vmem>>, %arg6: memref<1x128xf32, #tpu.memory_space<vmem>>, %arg7: memref<128x128xf32, #tpu.memory_space<vmem>>, %arg8: memref<1x128xf32, #tpu.memory_space<vmem>>, %arg9: memref<128x128xf32, #tpu.memory_space<vmem>>, %arg10: memref<1x128xf32, #tpu.memory_space<vmem>>, %arg11: memref<128x128xbf16, #tpu.memory_space<vmem>>, %arg12: memref<1x128xf32, #tpu.memory_space<vmem>>, %arg13: memref<1x16x128xf32, #tpu.memory_space<vmem>>, %arg14: memref<16x1920xbf16, #tpu.memory_space<vmem>>, %arg15: memref<16x1920xbf16, #tpu.memory_space<vmem>>) attributes {dimension_semantics = [#tpu.dimension_semantics<parallel>], iteration_bounds = array<i64: 2>, scalar_prefetch = 0 : i64, scratch_operands = 2 : i64, tpu.core_type = #tpu.core_type<tc>, window_params = [{transform_indices = @transform_0, window_bounds = array<i64: 1, 16, 128>}, {transform_indices = @transform_1, window_bounds = array<i64: 1, 16, 1>}, {pipeline_mode = #tpu.pipeline_mode<synchronous>, transform_indices = @transform_2, window_bounds = array<i64: 1920, 128>}, {pipeline_mode = #tpu.pipeline_mode<synchronous>, transform_indices = @transform_3, window_bounds = array<i64: 1, 128>}, {pipeline_mode = #tpu.pipeline_mode<synchronous>, transform_indices = @transform_4, window_bounds = array<i64: 1920, 128>}, {pipeline_mode = #tpu.pipeline_mode<synchronous>, transform_indices = @transform_5, window_bounds = array<i64: 1, 128>}, {pipeline_mode = #tpu.pipeline_mode<synchronous>, transform_indices = @transform_6, window_bounds = array<i64: 128, 128>}, {pipeline_mode = #tpu.pipeline_mode<synchronous>, transform_indices = @transform_7, window_bounds = array<i64: 1, 128>}, {pipeline_mode = #tpu.pipeline_mode<synchronous>, transform_indices = @transform_8, window_bounds = array<i64: 128, 128>}, {pipeline_mode = #tpu.pipeline_mode<synchronous>, transform_indices = @transform_9, window_bounds = array<i64: 1, 128>}, {pipeline_mode = #tpu.pipeline_mode<synchronous>, transform_indices = @transform_10, window_bounds = array<i64: 128, 128>}, {pipeline_mode = #tpu.pipeline_mode<synchronous>, transform_indices = @transform_11, window_bounds = array<i64: 1, 128>}, {transform_indices = @transform_12, window_bounds = array<i64: 1, 16, 128>}]} {
    %cst = arith.constant 0.000000e+00 : bf16
    %0 = vector.broadcast %cst : bf16 to vector<7x1920xbf16>
    %c0 = arith.constant 0 : index
    %c0_0 = arith.constant 0 : index
    %1 = vector.load %arg14[%c0, %c0_0] : memref<16x1920xbf16, #tpu.memory_space<vmem>>, vector<7x1920xbf16>
    tpu.vector_store %arg14[%c0, %c0_0], %0 {strides = array<i32>} : memref<16x1920xbf16, #tpu.memory_space<vmem>>, vector<7x1920xbf16>,
    %cst_1 = arith.constant 0.000000e+00 : bf16
    %2 = vector.broadcast %cst_1 : bf16 to vector<7x1920xbf16>
    %c9 = arith.constant 9 : index
    %c0_2 = arith.constant 0 : index
    %3 = vector.load %arg14[%c9, %c0_2] : memref<16x1920xbf16, #tpu.memory_space<vmem>>, vector<7x1920xbf16>
    tpu.vector_store %arg14[%c9, %c0_2], %2 {strides = array<i32>} : memref<16x1920xbf16, #tpu.memory_space<vmem>>, vector<7x1920xbf16>,
    %c0_3 = arith.constant 0 : index
    %c0_4 = arith.constant 0 : index
    %c0_5 = arith.constant 0 : index
    %4 = vector.load %arg1[%c0_3, %c0_4, %c0_5] : memref<1x16x128xf32, #tpu.memory_space<vmem>>, vector<1x16x128xf32>
    %5 = vector.shape_cast %4 : vector<1x16x128xf32> to vector<16x128xf32>
    %6 = arith.truncf %5 : vector<16x128xf32> to vector<16x128xbf16>
    %7 = vector.extract_strided_slice %6 {offsets = [0, 0], sizes = [9, 128], strides = [1, 1]} : vector<16x128xbf16> to vector<9x128xbf16>
    %c7 = arith.constant 7 : index
    %c0_6 = arith.constant 0 : index
    %8 = vector.load %arg14[%c7, %c0_6] : memref<16x1920xbf16, #tpu.memory_space<vmem>>, vector<9x128xbf16>
    tpu.vector_store %arg14[%c7, %c0_6], %7 {strides = array<i32>} : memref<16x1920xbf16, #tpu.memory_space<vmem>>, vector<9x128xbf16>,
    %9 = vector.extract_strided_slice %6 {offsets = [0, 0], sizes = [10, 128], strides = [1, 1]} : vector<16x128xbf16> to vector<10x128xbf16>
    %c6 = arith.constant 6 : index
    %c128 = arith.constant 128 : index
    %10 = vector.load %arg14[%c6, %c128] : memref<16x1920xbf16, #tpu.memory_space<vmem>>, vector<10x128xbf16>
    tpu.vector_store %arg14[%c6, %c128], %9 {strides = array<i32>} : memref<16x1920xbf16, #tpu.memory_space<vmem>>, vector<10x128xbf16>,
    %11 = vector.extract_strided_slice %6 {offsets = [0, 0], sizes = [11, 128], strides = [1, 1]} : vector<16x128xbf16> to vector<11x128xbf16>
    %c5 = arith.constant 5 : index
    %c256 = arith.constant 256 : index
    %12 = vector.load %arg14[%c5, %c256] : memref<16x1920xbf16, #tpu.memory_space<vmem>>, vector<11x128xbf16>
    tpu.vector_store %arg14[%c5, %c256], %11 {strides = array<i32>} : memref<16x1920xbf16, #tpu.memory_space<vmem>>, vector<11x128xbf16>,
    %13 = vector.extract_strided_slice %6 {offsets = [0, 0], sizes = [12, 128], strides = [1, 1]} : vector<16x128xbf16> to vector<12x128xbf16>
    %c4 = arith.constant 4 : index
    %c384 = arith.constant 384 : index
    %14 = vector.load %arg14[%c4, %c384] : memref<16x1920xbf16, #tpu.memory_space<vmem>>, vector<12x128xbf16>
    tpu.vector_store %arg14[%c4, %c384], %13 {strides = array<i32>} : memref<16x1920xbf16, #tpu.memory_space<vmem>>, vector<12x128xbf16>,
    %15 = vector.extract_strided_slice %6 {offsets = [0, 0], sizes = [13, 128], strides = [1, 1]} : vector<16x128xbf16> to vector<13x128xbf16>
    %c3 = arith.constant 3 : index
    %c512 = arith.constant 512 : index
    %16 = vector.load %arg14[%c3, %c512] : memref<16x1920xbf16, #tpu.memory_space<vmem>>, vector<13x128xbf16>
    tpu.vector_store %arg14[%c3, %c512], %15 {strides = array<i32>} : memref<16x1920xbf16, #tpu.memory_space<vmem>>, vector<13x128xbf16>,
    %17 = vector.extract_strided_slice %6 {offsets = [0, 0], sizes = [14, 128], strides = [1, 1]} : vector<16x128xbf16> to vector<14x128xbf16>
    %c2 = arith.constant 2 : index
    %c640 = arith.constant 640 : index
    %18 = vector.load %arg14[%c2, %c640] : memref<16x1920xbf16, #tpu.memory_space<vmem>>, vector<14x128xbf16>
    tpu.vector_store %arg14[%c2, %c640], %17 {strides = array<i32>} : memref<16x1920xbf16, #tpu.memory_space<vmem>>, vector<14x128xbf16>,
    %19 = vector.extract_strided_slice %6 {offsets = [0, 0], sizes = [15, 128], strides = [1, 1]} : vector<16x128xbf16> to vector<15x128xbf16>
    %c1 = arith.constant 1 : index
    %c768 = arith.constant 768 : index
    %20 = vector.load %arg14[%c1, %c768] : memref<16x1920xbf16, #tpu.memory_space<vmem>>, vector<15x128xbf16>
    tpu.vector_store %arg14[%c1, %c768], %19 {strides = array<i32>} : memref<16x1920xbf16, #tpu.memory_space<vmem>>, vector<15x128xbf16>,
    %c0_7 = arith.constant 0 : index
    %c896 = arith.constant 896 : index
    %21 = vector.load %arg14[%c0_7, %c896] : memref<16x1920xbf16, #tpu.memory_space<vmem>>, vector<16x128xbf16>
    tpu.vector_store %arg14[%c0_7, %c896], %6 {strides = array<i32>} : memref<16x1920xbf16, #tpu.memory_space<vmem>>, vector<16x128xbf16>,
    %22 = vector.extract_strided_slice %6 {offsets = [1, 0], sizes = [15, 128], strides = [1, 1]} : vector<16x128xbf16> to vector<15x128xbf16>
    %c0_8 = arith.constant 0 : index
    %c1024 = arith.constant 1024 : index
    %23 = vector.load %arg14[%c0_8, %c1024] : memref<16x1920xbf16, #tpu.memory_space<vmem>>, vector<15x128xbf16>
    tpu.vector_store %arg14[%c0_8, %c1024], %22 {strides = array<i32>} : memref<16x1920xbf16, #tpu.memory_space<vmem>>, vector<15x128xbf16>,
    %24 = vector.extract_strided_slice %6 {offsets = [2, 0], sizes = [14, 128], strides = [1, 1]} : vector<16x128xbf16> to vector<14x128xbf16>
    %c0_9 = arith.constant 0 : index
    %c1152 = arith.constant 1152 : index
    %25 = vector.load %arg14[%c0_9, %c1152] : memref<16x1920xbf16, #tpu.memory_space<vmem>>, vector<14x128xbf16>
    tpu.vector_store %arg14[%c0_9, %c1152], %24 {strides = array<i32>} : memref<16x1920xbf16, #tpu.memory_space<vmem>>, vector<14x128xbf16>,
    %26 = vector.extract_strided_slice %6 {offsets = [3, 0], sizes = [13, 128], strides = [1, 1]} : vector<16x128xbf16> to vector<13x128xbf16>
    %c0_10 = arith.constant 0 : index
    %c1280 = arith.constant 1280 : index
    %27 = vector.load %arg14[%c0_10, %c1280] : memref<16x1920xbf16, #tpu.memory_space<vmem>>, vector<13x128xbf16>
    tpu.vector_store %arg14[%c0_10, %c1280], %26 {strides = array<i32>} : memref<16x1920xbf16, #tpu.memory_space<vmem>>, vector<13x128xbf16>,
    %28 = vector.extract_strided_slice %6 {offsets = [4, 0], sizes = [12, 128], strides = [1, 1]} : vector<16x128xbf16> to vector<12x128xbf16>
    %c0_11 = arith.constant 0 : index
    %c1408 = arith.constant 1408 : index
    %29 = vector.load %arg14[%c0_11, %c1408] : memref<16x1920xbf16, #tpu.memory_space<vmem>>, vector<12x128xbf16>
    tpu.vector_store %arg14[%c0_11, %c1408], %28 {strides = array<i32>} : memref<16x1920xbf16, #tpu.memory_space<vmem>>, vector<12x128xbf16>,
    %30 = vector.extract_strided_slice %6 {offsets = [5, 0], sizes = [11, 128], strides = [1, 1]} : vector<16x128xbf16> to vector<11x128xbf16>
    %c0_12 = arith.constant 0 : index
    %c1536 = arith.constant 1536 : index
    %31 = vector.load %arg14[%c0_12, %c1536] : memref<16x1920xbf16, #tpu.memory_space<vmem>>, vector<11x128xbf16>
    tpu.vector_store %arg14[%c0_12, %c1536], %30 {strides = array<i32>} : memref<16x1920xbf16, #tpu.memory_space<vmem>>, vector<11x128xbf16>,
    %32 = vector.extract_strided_slice %6 {offsets = [6, 0], sizes = [10, 128], strides = [1, 1]} : vector<16x128xbf16> to vector<10x128xbf16>
    %c0_13 = arith.constant 0 : index
    %c1664 = arith.constant 1664 : index
    %33 = vector.load %arg14[%c0_13, %c1664] : memref<16x1920xbf16, #tpu.memory_space<vmem>>, vector<10x128xbf16>
    tpu.vector_store %arg14[%c0_13, %c1664], %32 {strides = array<i32>} : memref<16x1920xbf16, #tpu.memory_space<vmem>>, vector<10x128xbf16>,
    %34 = vector.extract_strided_slice %6 {offsets = [7, 0], sizes = [9, 128], strides = [1, 1]} : vector<16x128xbf16> to vector<9x128xbf16>
    %c0_14 = arith.constant 0 : index
    %c1792 = arith.constant 1792 : index
    %35 = vector.load %arg14[%c0_14, %c1792] : memref<16x1920xbf16, #tpu.memory_space<vmem>>, vector<9x128xbf16>
    tpu.vector_store %arg14[%c0_14, %c1792], %34 {strides = array<i32>} : memref<16x1920xbf16, #tpu.memory_space<vmem>>, vector<9x128xbf16>,
    %cst_15 = arith.constant 0.000000e+00 : bf16
    %36 = vector.broadcast %cst_15 : bf16 to vector<14x1920xbf16>
    %c0_16 = arith.constant 0 : index
    %c0_17 = arith.constant 0 : index
    %37 = vector.load %arg15[%c0_16, %c0_17] : memref<16x1920xbf16, #tpu.memory_space<vmem>>, vector<14x1920xbf16>
    tpu.vector_store %arg15[%c0_16, %c0_17], %36 {strides = array<i32>} : memref<16x1920xbf16, #tpu.memory_space<vmem>>, vector<14x1920xbf16>,
    %cst_18 = arith.constant 0.000000e+00 : bf16
    %38 = vector.broadcast %cst_18 : bf16 to vector<14x1920xbf16>
    %c2_19 = arith.constant 2 : index
    %c0_20 = arith.constant 0 : index
    %39 = vector.load %arg15[%c2_19, %c0_20] : memref<16x1920xbf16, #tpu.memory_space<vmem>>, vector<14x1920xbf16>
    tpu.vector_store %arg15[%c2_19, %c0_20], %38 {strides = array<i32>} : memref<16x1920xbf16, #tpu.memory_space<vmem>>, vector<14x1920xbf16>,
    %c0_21 = arith.constant 0 : index
    %c0_22 = arith.constant 0 : index
    %40 = vector.load %arg3[%c0_21, %c0_22] : memref<1920x128xbf16, #tpu.memory_space<vmem>>, vector<1920x128xbf16>
    %c0_23 = arith.constant 0 : index
    %c0_24 = arith.constant 0 : index
    %41 = vector.load %arg4[%c0_23, %c0_24] : memref<1x128xf32, #tpu.memory_space<vmem>>, vector<1x128xf32>
    %c0_25 = arith.constant 0 : index
    %c0_26 = arith.constant 0 : index
    %42 = vector.load %arg14[%c0_25, %c0_26] : memref<16x1920xbf16, #tpu.memory_space<vmem>>, vector<16x1920xbf16>
    %cst_27 = arith.constant dense<0.000000e+00> : vector<16x128xf32>
    %43 = tpu.matmul %42, %40, %cst_27 {dimension_numbers = #tpu.dot_dimension_numbers<[1], [0], [0], [1], [0, 0, 1, 1], [], []>} : vector<16x1920xbf16>, vector<1920x128xbf16>, vector<16x128xf32> -> vector<16x128xf32>
    %44 = vector.broadcast %41 : vector<1x128xf32> to vector<16x128xf32>
    %45 = arith.addf %43, %44 : vector<16x128xf32>
    %cst_28 = arith.constant 0.000000e+00 : f32
    %46 = vector.broadcast %cst_28 : f32 to vector<16x128xf32>
    %47 = arith.maximumf %45, %46 : vector<16x128xf32>
    %c0_29 = arith.constant 0 : index
    %c0_30 = arith.constant 0 : index
    %c0_31 = arith.constant 0 : index
    %48 = vector.load %arg2[%c0_29, %c0_30, %c0_31] : memref<1x16x1xf32, #tpu.memory_space<vmem>>, vector<1x16x1xf32>
    %49 = vector.shape_cast %48 : vector<1x16x1xf32> to vector<16x1xf32>
    %50 = vector.broadcast %49 : vector<16x1xf32> to vector<16x128xf32>
    %51 = arith.mulf %47, %50 : vector<16x128xf32>
    %52 = arith.truncf %51 : vector<16x128xf32> to vector<16x128xbf16>
    %53 = vector.extract_strided_slice %52 {offsets = [0, 0], sizes = [2, 128], strides = [1, 1]} : vector<16x128xbf16> to vector<2x128xbf16>
    %c14 = arith.constant 14 : index
    %c0_32 = arith.constant 0 : index
    %54 = vector.load %arg15[%c14, %c0_32] : memref<16x1920xbf16, #tpu.memory_space<vmem>>, vector<2x128xbf16>
    tpu.vector_store %arg15[%c14, %c0_32], %53 {strides = array<i32>} : memref<16x1920xbf16, #tpu.memory_space<vmem>>, vector<2x128xbf16>,
    %55 = vector.extract_strided_slice %52 {offsets = [0, 0], sizes = [4, 128], strides = [1, 1]} : vector<16x128xbf16> to vector<4x128xbf16>
    %c12 = arith.constant 12 : index
    %c128_33 = arith.constant 128 : index
    %56 = vector.load %arg15[%c12, %c128_33] : memref<16x1920xbf16, #tpu.memory_space<vmem>>, vector<4x128xbf16>
    tpu.vector_store %arg15[%c12, %c128_33], %55 {strides = array<i32>} : memref<16x1920xbf16, #tpu.memory_space<vmem>>, vector<4x128xbf16>,
    %57 = vector.extract_strided_slice %52 {offsets = [0, 0], sizes = [6, 128], strides = [1, 1]} : vector<16x128xbf16> to vector<6x128xbf16>
    %c10 = arith.constant 10 : index
    %c256_34 = arith.constant 256 : index
    %58 = vector.load %arg15[%c10, %c256_34] : memref<16x1920xbf16, #tpu.memory_space<vmem>>, vector<6x128xbf16>
    tpu.vector_store %arg15[%c10, %c256_34], %57 {strides = array<i32>} : memref<16x1920xbf16, #tpu.memory_space<vmem>>, vector<6x128xbf16>,
    %59 = vector.extract_strided_slice %52 {offsets = [0, 0], sizes = [8, 128], strides = [1, 1]} : vector<16x128xbf16> to vector<8x128xbf16>
    %c8 = arith.constant 8 : index
    %c384_35 = arith.constant 384 : index
    %60 = vector.load %arg15[%c8, %c384_35] : memref<16x1920xbf16, #tpu.memory_space<vmem>>, vector<8x128xbf16>
    tpu.vector_store %arg15[%c8, %c384_35], %59 {strides = array<i32>} : memref<16x1920xbf16, #tpu.memory_space<vmem>>, vector<8x128xbf16>,
    %61 = vector.extract_strided_slice %52 {offsets = [0, 0], sizes = [10, 128], strides = [1, 1]} : vector<16x128xbf16> to vector<10x128xbf16>
    %c6_36 = arith.constant 6 : index
    %c512_37 = arith.constant 512 : index
    %62 = vector.load %arg15[%c6_36, %c512_37] : memref<16x1920xbf16, #tpu.memory_space<vmem>>, vector<10x128xbf16>
    tpu.vector_store %arg15[%c6_36, %c512_37], %61 {strides = array<i32>} : memref<16x1920xbf16, #tpu.memory_space<vmem>>, vector<10x128xbf16>,
    %63 = vector.extract_strided_slice %52 {offsets = [0, 0], sizes = [12, 128], strides = [1, 1]} : vector<16x128xbf16> to vector<12x128xbf16>
    %c4_38 = arith.constant 4 : index
    %c640_39 = arith.constant 640 : index
    %64 = vector.load %arg15[%c4_38, %c640_39] : memref<16x1920xbf16, #tpu.memory_space<vmem>>, vector<12x128xbf16>
    tpu.vector_store %arg15[%c4_38, %c640_39], %63 {strides = array<i32>} : memref<16x1920xbf16, #tpu.memory_space<vmem>>, vector<12x128xbf16>,
    %65 = vector.extract_strided_slice %52 {offsets = [0, 0], sizes = [14, 128], strides = [1, 1]} : vector<16x128xbf16> to vector<14x128xbf16>
    %c2_40 = arith.constant 2 : index
    %c768_41 = arith.constant 768 : index
    %66 = vector.load %arg15[%c2_40, %c768_41] : memref<16x1920xbf16, #tpu.memory_space<vmem>>, vector<14x128xbf16>
    tpu.vector_store %arg15[%c2_40, %c768_41], %65 {strides = array<i32>} : memref<16x1920xbf16, #tpu.memory_space<vmem>>, vector<14x128xbf16>,
    %c0_42 = arith.constant 0 : index
    %c896_43 = arith.constant 896 : index
    %67 = vector.load %arg15[%c0_42, %c896_43] : memref<16x1920xbf16, #tpu.memory_space<vmem>>, vector<16x128xbf16>
    tpu.vector_store %arg15[%c0_42, %c896_43], %52 {strides = array<i32>} : memref<16x1920xbf16, #tpu.memory_space<vmem>>, vector<16x128xbf16>,
    %68 = vector.extract_strided_slice %52 {offsets = [2, 0], sizes = [14, 128], strides = [1, 1]} : vector<16x128xbf16> to vector<14x128xbf16>
    %c0_44 = arith.constant 0 : index
    %c1024_45 = arith.constant 1024 : index
    %69 = vector.load %arg15[%c0_44, %c1024_45] : memref<16x1920xbf16, #tpu.memory_space<vmem>>, vector<14x128xbf16>
    tpu.vector_store %arg15[%c0_44, %c1024_45], %68 {strides = array<i32>} : memref<16x1920xbf16, #tpu.memory_space<vmem>>, vector<14x128xbf16>,
    %70 = vector.extract_strided_slice %52 {offsets = [4, 0], sizes = [12, 128], strides = [1, 1]} : vector<16x128xbf16> to vector<12x128xbf16>
    %c0_46 = arith.constant 0 : index
    %c1152_47 = arith.constant 1152 : index
    %71 = vector.load %arg15[%c0_46, %c1152_47] : memref<16x1920xbf16, #tpu.memory_space<vmem>>, vector<12x128xbf16>
    tpu.vector_store %arg15[%c0_46, %c1152_47], %70 {strides = array<i32>} : memref<16x1920xbf16, #tpu.memory_space<vmem>>, vector<12x128xbf16>,
    %72 = vector.extract_strided_slice %52 {offsets = [6, 0], sizes = [10, 128], strides = [1, 1]} : vector<16x128xbf16> to vector<10x128xbf16>
    %c0_48 = arith.constant 0 : index
    %c1280_49 = arith.constant 1280 : index
    %73 = vector.load %arg15[%c0_48, %c1280_49] : memref<16x1920xbf16, #tpu.memory_space<vmem>>, vector<10x128xbf16>
    tpu.vector_store %arg15[%c0_48, %c1280_49], %72 {strides = array<i32>} : memref<16x1920xbf16, #tpu.memory_space<vmem>>, vector<10x128xbf16>,
    %74 = vector.extract_strided_slice %52 {offsets = [8, 0], sizes = [8, 128], strides = [1, 1]} : vector<16x128xbf16> to vector<8x128xbf16>
    %c0_50 = arith.constant 0 : index
    %c1408_51 = arith.constant 1408 : index
    %75 = vector.load %arg15[%c0_50, %c1408_51] : memref<16x1920xbf16, #tpu.memory_space<vmem>>, vector<8x128xbf16>
    tpu.vector_store %arg15[%c0_50, %c1408_51], %74 {strides = array<i32>} : memref<16x1920xbf16, #tpu.memory_space<vmem>>, vector<8x128xbf16>,
    %76 = vector.extract_strided_slice %52 {offsets = [10, 0], sizes = [6, 128], strides = [1, 1]} : vector<16x128xbf16> to vector<6x128xbf16>
    %c0_52 = arith.constant 0 : index
    %c1536_53 = arith.constant 1536 : index
    %77 = vector.load %arg15[%c0_52, %c1536_53] : memref<16x1920xbf16, #tpu.memory_space<vmem>>, vector<6x128xbf16>
    tpu.vector_store %arg15[%c0_52, %c1536_53], %76 {strides = array<i32>} : memref<16x1920xbf16, #tpu.memory_space<vmem>>, vector<6x128xbf16>,
    %78 = vector.extract_strided_slice %52 {offsets = [12, 0], sizes = [4, 128], strides = [1, 1]} : vector<16x128xbf16> to vector<4x128xbf16>
    %c0_54 = arith.constant 0 : index
    %c1664_55 = arith.constant 1664 : index
    %79 = vector.load %arg15[%c0_54, %c1664_55] : memref<16x1920xbf16, #tpu.memory_space<vmem>>, vector<4x128xbf16>
    tpu.vector_store %arg15[%c0_54, %c1664_55], %78 {strides = array<i32>} : memref<16x1920xbf16, #tpu.memory_space<vmem>>, vector<4x128xbf16>,
    %80 = vector.extract_strided_slice %52 {offsets = [14, 0], sizes = [2, 128], strides = [1, 1]} : vector<16x128xbf16> to vector<2x128xbf16>
    %c0_56 = arith.constant 0 : index
    %c1792_57 = arith.constant 1792 : index
    %81 = vector.load %arg15[%c0_56, %c1792_57] : memref<16x1920xbf16, #tpu.memory_space<vmem>>, vector<2x128xbf16>
    tpu.vector_store %arg15[%c0_56, %c1792_57], %80 {strides = array<i32>} : memref<16x1920xbf16, #tpu.memory_space<vmem>>, vector<2x128xbf16>,
    %c0_58 = arith.constant 0 : index
    %c0_59 = arith.constant 0 : index
    %82 = vector.load %arg5[%c0_58, %c0_59] : memref<1920x128xbf16, #tpu.memory_space<vmem>>, vector<1920x128xbf16>
    %c0_60 = arith.constant 0 : index
    %c0_61 = arith.constant 0 : index
    %83 = vector.load %arg6[%c0_60, %c0_61] : memref<1x128xf32, #tpu.memory_space<vmem>>, vector<1x128xf32>
    %cst_62 = arith.constant 0.000000e+00 : f32
    %84 = vector.broadcast %cst_62 : f32 to vector<1x128xf32>
    %c0_63 = arith.constant 0 : index
    %c0_64 = arith.constant 0 : index
    %85 = vector.load %arg15[%c0_63, %c0_64] : memref<16x1920xbf16, #tpu.memory_space<vmem>>, vector<16x1920xbf16>
    %cst_65 = arith.constant dense<0.000000e+00> : vector<16x128xf32>
    %86 = tpu.matmul %85, %82, %cst_65 {dimension_numbers = #tpu.dot_dimension_numbers<[1], [0], [0], [1], [0, 0, 1, 1], [], []>} : vector<16x1920xbf16>, vector<1920x128xbf16>, vector<16x128xf32> -> vector<16x128xf32>
    %87 = vector.broadcast %83 : vector<1x128xf32> to vector<16x128xf32>
    %88 = arith.addf %86, %87 : vector<16x128xf32>
    %cst_66 = arith.constant 0.000000e+00 : f32
    %89 = vector.broadcast %cst_66 : f32 to vector<16x128xf32>
    %90 = arith.maximumf %88, %89 : vector<16x128xf32>
    %c0_67 = arith.constant 0 : index
    %c0_68 = arith.constant 0 : index
    %c0_69 = arith.constant 0 : index
    %91 = vector.load %arg2[%c0_67, %c0_68, %c0_69] : memref<1x16x1xf32, #tpu.memory_space<vmem>>, vector<1x16x1xf32>
    %92 = vector.shape_cast %91 : vector<1x16x1xf32> to vector<16x1xf32>
    %93 = vector.broadcast %92 : vector<16x1xf32> to vector<16x128xf32>
    %94 = arith.mulf %90, %93 : vector<16x128xf32>
    %cst_70 = arith.constant dense<0.000000e+00> : vector<128xf32>
    %95 = vector.multi_reduction <add>, %94, %cst_70 [0] : vector<16x128xf32> to vector<128xf32>
    %96 = vector.shape_cast %95 : vector<128xf32> to vector<1x128xf32>
    %97 = arith.addf %84, %96 : vector<1x128xf32>
    %c0_71 = arith.constant 0 : index
    %c0_72 = arith.constant 0 : index
    %c0_73 = arith.constant 0 : index
    %98 = vector.load %arg13[%c0_71, %c0_72, %c0_73] : memref<1x16x128xf32, #tpu.memory_space<vmem>>, vector<1x16x128xf32>
    %99 = vector.shape_cast %98 : vector<1x16x128xf32> to vector<16x128xf32>
    %100 = vector.shape_cast %94 : vector<16x128xf32> to vector<1x16x128xf32>
    tpu.vector_store %arg13[%c0_71, %c0_72, %c0_73], %100 {strides = array<i32>} : memref<1x16x128xf32, #tpu.memory_space<vmem>>, vector<1x16x128xf32>,
    %cst_74 = arith.constant 6.250000e-02 : f32
    %101 = vector.broadcast %cst_74 : f32 to vector<1x128xf32>
    %102 = arith.mulf %97, %101 : vector<1x128xf32>
    %c0_75 = arith.constant 0 : index
    %c0_76 = arith.constant 0 : index
    %103 = vector.load %arg7[%c0_75, %c0_76] : memref<128x128xf32, #tpu.memory_space<vmem>>, vector<128x128xf32>
    %cst_77 = arith.constant dense<0.000000e+00> : vector<1x128xf32>
    %104 = tpu.matmul %102, %103, %cst_77 {dimension_numbers = #tpu.dot_dimension_numbers<[1], [0], [0], [1], [0, 0, 1, 1], [], []>} : vector<1x128xf32>, vector<128x128xf32>, vector<1x128xf32> -> vector<1x128xf32>
    %c0_78 = arith.constant 0 : index
    %c0_79 = arith.constant 0 : index
    %105 = vector.load %arg8[%c0_78, %c0_79] : memref<1x128xf32, #tpu.memory_space<vmem>>, vector<1x128xf32>
    %106 = arith.addf %104, %105 : vector<1x128xf32>
    %cst_80 = arith.constant 0.000000e+00 : f32
    %107 = vector.broadcast %cst_80 : f32 to vector<1x128xf32>
    %108 = arith.maximumf %106, %107 : vector<1x128xf32>
    %c0_81 = arith.constant 0 : index
    %c0_82 = arith.constant 0 : index
    %109 = vector.load %arg9[%c0_81, %c0_82] : memref<128x128xf32, #tpu.memory_space<vmem>>, vector<128x128xf32>
    %cst_83 = arith.constant dense<0.000000e+00> : vector<1x128xf32>
    %110 = tpu.matmul %108, %109, %cst_83 {dimension_numbers = #tpu.dot_dimension_numbers<[1], [0], [0], [1], [0, 0, 1, 1], [], []>} : vector<1x128xf32>, vector<128x128xf32>, vector<1x128xf32> -> vector<1x128xf32>
    %c0_84 = arith.constant 0 : index
    %c0_85 = arith.constant 0 : index
    %111 = vector.load %arg10[%c0_84, %c0_85] : memref<1x128xf32, #tpu.memory_space<vmem>>, vector<1x128xf32>
    %112 = arith.addf %110, %111 : vector<1x128xf32>
    %113 = arith.negf %112 : vector<1x128xf32>
    %114 = math.exp %113 : vector<1x128xf32>
    %cst_86 = arith.constant 1.000000e+00 : f32
    %115 = vector.broadcast %cst_86 : f32 to vector<1x128xf32>
    %116 = arith.addf %115, %114 : vector<1x128xf32>
    %117 = arith.divf %115, %116 : vector<1x128xf32>
    %c0_87 = arith.constant 0 : index
    %c0_88 = arith.constant 0 : index
    %118 = vector.load %arg11[%c0_87, %c0_88] : memref<128x128xbf16, #tpu.memory_space<vmem>>, vector<128x128xbf16>
    %c0_89 = arith.constant 0 : index
    %c0_90 = arith.constant 0 : index
    %119 = vector.load %arg12[%c0_89, %c0_90] : memref<1x128xf32, #tpu.memory_space<vmem>>, vector<1x128xf32>
    %c0_91 = arith.constant 0 : index
    %c0_92 = arith.constant 0 : index
    %c0_93 = arith.constant 0 : index
    %120 = vector.load %arg1[%c0_91, %c0_92, %c0_93] : memref<1x16x128xf32, #tpu.memory_space<vmem>>, vector<1x16x128xf32>
    %121 = vector.shape_cast %120 : vector<1x16x128xf32> to vector<16x128xf32>
    %122 = arith.truncf %121 : vector<16x128xf32> to vector<16x128xbf16>
    %cst_94 = arith.constant dense<0.000000e+00> : vector<16x128xf32>
    %123 = tpu.matmul %122, %118, %cst_94 {dimension_numbers = #tpu.dot_dimension_numbers<[1], [0], [0], [1], [0, 0, 1, 1], [], []>} : vector<16x128xbf16>, vector<128x128xbf16>, vector<16x128xf32> -> vector<16x128xf32>
    %124 = vector.broadcast %119 : vector<1x128xf32> to vector<16x128xf32>
    %125 = arith.addf %123, %124 : vector<16x128xf32>
    %c0_95 = arith.constant 0 : index
    %c0_96 = arith.constant 0 : index
    %c0_97 = arith.constant 0 : index
    %126 = vector.load %arg13[%c0_95, %c0_96, %c0_97] : memref<1x16x128xf32, #tpu.memory_space<vmem>>, vector<1x16x128xf32>
    %127 = vector.shape_cast %126 : vector<1x16x128xf32> to vector<16x128xf32>
    %128 = vector.broadcast %117 : vector<1x128xf32> to vector<16x128xf32>
    %129 = arith.mulf %127, %128 : vector<16x128xf32>
    %130 = arith.addf %129, %125 : vector<16x128xf32>
    %cst_98 = arith.constant 0.000000e+00 : f32
    %131 = vector.broadcast %cst_98 : f32 to vector<16x128xf32>
    %132 = arith.maximumf %130, %131 : vector<16x128xf32>
    %c0_99 = arith.constant 0 : index
    %c0_100 = arith.constant 0 : index
    %c0_101 = arith.constant 0 : index
    %133 = vector.load %arg13[%c0_99, %c0_100, %c0_101] : memref<1x16x128xf32, #tpu.memory_space<vmem>>, vector<1x16x128xf32>
    %134 = vector.shape_cast %133 : vector<1x16x128xf32> to vector<16x128xf32>
    %135 = vector.shape_cast %132 : vector<16x128xf32> to vector<1x16x128xf32>
    tpu.vector_store %arg13[%c0_99, %c0_100, %c0_101], %135 {strides = array<i32>} : memref<1x16x128xf32, #tpu.memory_space<vmem>>, vector<1x16x128xf32>,
    return
  }
  func.func @transform_0(%arg0: i32) -> (i32, i32, i32) {
    %c0_i32 = arith.constant 0 : i32
    %c0_i32_0 = arith.constant 0 : i32
    %c0_i32_1 = arith.constant 0 : i32
    return %arg0, %c0_i32, %c0_i32_0 : i32, i32, i32
  }
  func.func @transform_1(%arg0: i32) -> (i32, i32, i32) {
    %c0_i32 = arith.constant 0 : i32
    %c0_i32_0 = arith.constant 0 : i32
    %c0_i32_1 = arith.constant 0 : i32
    return %arg0, %c0_i32, %c0_i32_0 : i32, i32, i32
  }
  func.func @transform_2(%arg0: i32) -> (i32, i32) {
    %c0_i32 = arith.constant 0 : i32
    %c0_i32_0 = arith.constant 0 : i32
    %c0_i32_1 = arith.constant 0 : i32
    return %c0_i32, %c0_i32_0 : i32, i32
  }
  func.func @transform_3(%arg0: i32) -> (i32, i32) {
    %c0_i32 = arith.constant 0 : i32
    %c0_i32_0 = arith.constant 0 : i32
    %c0_i32_1 = arith.constant 0 : i32
    return %c0_i32, %c0_i32_0 : i32, i32
  }
  func.func @transform_4(%arg0: i32) -> (i32, i32) {
    %c0_i32 = arith.constant 0 : i32
    %c0_i32_0 = arith.constant 0 : i32
    %c0_i32_1 = arith.constant 0 : i32
    return %c0_i32, %c0_i32_0 : i32, i32
  }
  func.func @transform_5(%arg0: i32) -> (i32, i32) {
    %c0_i32 = arith.constant 0 : i32
    %c0_i32_0 = arith.constant 0 : i32
    %c0_i32_1 = arith.constant 0 : i32
    return %c0_i32, %c0_i32_0 : i32, i32
  }
  func.func @transform_6(%arg0: i32) -> (i32, i32) {
    %c0_i32 = arith.constant 0 : i32
    %c0_i32_0 = arith.constant 0 : i32
    %c0_i32_1 = arith.constant 0 : i32
    return %c0_i32, %c0_i32_0 : i32, i32
  }
  func.func @transform_7(%arg0: i32) -> (i32, i32) {
    %c0_i32 = arith.constant 0 : i32
    %c0_i32_0 = arith.constant 0 : i32
    %c0_i32_1 = arith.constant 0 : i32
    return %c0_i32, %c0_i32_0 : i32, i32
  }
  func.func @transform_8(%arg0: i32) -> (i32, i32) {
    %c0_i32 = arith.constant 0 : i32
    %c0_i32_0 = arith.constant 0 : i32
    %c0_i32_1 = arith.constant 0 : i32
    return %c0_i32, %c0_i32_0 : i32, i32
  }
  func.func @transform_9(%arg0: i32) -> (i32, i32) {
    %c0_i32 = arith.constant 0 : i32
    %c0_i32_0 = arith.constant 0 : i32
    %c0_i32_1 = arith.constant 0 : i32
    return %c0_i32, %c0_i32_0 : i32, i32
  }
  func.func @transform_10(%arg0: i32) -> (i32, i32) {
    %c0_i32 = arith.constant 0 : i32
    %c0_i32_0 = arith.constant 0 : i32
    %c0_i32_1 = arith.constant 0 : i32
    return %c0_i32, %c0_i32_0 : i32, i32
  }
  func.func @transform_11(%arg0: i32) -> (i32, i32) {
    %c0_i32 = arith.constant 0 : i32
    %c0_i32_0 = arith.constant 0 : i32
    %c0_i32_1 = arith.constant 0 : i32
    return %c0_i32, %c0_i32_0 : i32, i32
  }
  func.func @transform_12(%arg0: i32) -> (i32, i32, i32) {
    %c0_i32 = arith.constant 0 : i32
    %c0_i32_0 = arith.constant 0 : i32
    %c0_i32_1 = arith.constant 0 : i32
    return %arg0, %c0_i32, %c0_i32_0 : i32, i32, i32
  }
}

</mosaic_0001>

<bundles_post_ra>
// kernel: tpu_custom_call.1
= control target key start
LH: loop header
LB: loop body
LE: loop exit
PB: predicated region body
PF: predicated region fallthrough
CT: control target
= control target key end

     0   :  { %17 = vsyncpa [#allocation5], 0  ;;  %s6123_s0 = inlined_call_operand.vmem [shape: f32[2,16,128], index: 0, kind: input, shape index: {}]   ;;  %s6124_s1 = inlined_call_operand.vmem [shape: f32[2,16,1], index: 1, kind: input, shape index: {}]   ;;  %s6125_s2 = inlined_call_operand.hbm [shape: bf16[1920,128], index: 2, kind: input, shape index: {}]   ;;  %s6126_s3 = inlined_call_operand.vmem [shape: f32[1,128], index: 3, kind: input, shape index: {}]   ;;  %s6127_s4 = inlined_call_operand.hbm [shape: bf16[1920,128], index: 4, kind: input, shape index: {}]   ;;  %s6128_s5 = inlined_call_operand.vmem [shape: f32[1,128], index: 5, kind: input, shape index: {}]   ;;  %s6129_s6 = inlined_call_operand.hbm [shape: f32[128,128], index: 6, kind: input, shape index: {}]   ;;  %s6130_s7 = inlined_call_operand.vmem [shape: f32[1,128], index: 7, kind: input, shape index: {}]   ;;  %s6131_s8 = inlined_call_operand.hbm [shape: f32[128,128], index: 8, kind: input, shape index: {}]   ;;  %s6132_s9 = inlined_call_operand.vmem [shape: f32[1,128], index: 9, kind: input, shape index: {}]   ;;  %s6133_s10 = inlined_call_operand.hbm [shape: bf16[128,128], index: 10, kind: input, shape index: {}]   ;;  %s6134_s11 = inlined_call_operand.vmem [shape: f32[1,128], index: 11, kind: input, shape index: {}]   ;;  %s6135_s12 = inlined_call_operand.hbm [shape: f32[2,16,128], index: 12, kind: output, shape index: {}]  }
   0x1   :  { %18 = vsyncpa [#allocation8], 0 }
   0x2   :  { %19 = vsyncpa [#allocation11], 0 }
   0x3   :  { %20 = vsyncpa [#allocation6], 0 }
   0x4   :  { %22 = vsyncpa [#allocation6 + $0x1], 0  ;;  %s5580_s21 = smov 0   ;;  %s5582_s22 = smov 0  }
   0x5   :  { %s5584_s23 = smov 0   ;;  %s5586_s24 = smov 0  }
   0x6 LB: > { %6144 = sst [smem:[#allocation18_spill]] %s5486_s21  ;;  %s5601_s25 = sadd.s32 4294967295, %s5498_s24   ;;  %s5498_s24 = sphi %s5586_s24, %s6188_s24   ;;  %s5494_s23 = sphi %s5584_s23, %s6190_s23   ;;  %s5490_s22 = sphi %s5582_s22, %s6192_s22   ;;  %s5486_s21 = sphi %s5580_s21, %s6191_s21  }
   0x7   : > { %6145 = sst [smem:[#allocation19_spill]] %s5494_s23  ;;  %s4085_s26 = sadd.s32 4294967294, %s5498_s24  }
   0x8   : > { %s5605_s27 = sadd.s32 1, %s5498_s24   ;;  %s297_s28 = sadd.s32 1, %s5494_s23 }
   0x9   : > { %6146 = sst [smem:[#allocation20_spill]] %s5605_s27  ;;  %s294_s29 = ssub.s32 %s5498_s24, %s5605_s27 }
   0xa   : > { %p307_p0 = scmp.ne.s32.totalorder %s5494_s23, %s5490_s22  ;;  %p295_p1 = scmp.eq.s32.totalorder %s294_s29, 0 }
   0xb   : > { %p308_p2 = scmp.eq.s32.totalorder %s5601_s25, 1  ;;  %p313_p3 = scmp.ne.s32.totalorder %s5490_s22, %s5486_s21 }
   0xc   : > { %p314_p4 = scmp.eq.s32.totalorder %s4085_s26, 1  ;;  %p4086_p7 = scmp.ge.s32.totalorder %s5498_s24, 1 }
   0xd   : > { %s5616_s30 = scalar_select %p295_p1, %s5494_s23, %s297_s28  }
   0xe   : > { %p5618_p5 = por %p308_p2, %p307_p0  ;;  %p5622_p6 = por %p314_p4, %p313_p3 }
   0xf   : > { %6147 = sst [smem:[#allocation21_spill]] %s5616_s30  ;;  %p321_p8 = scmp.lt.s32.totalorder %s5498_s24, 3 }
  0x10   : > { %s6149_s14 = scalar_select %p5622_p6, 1, 0 }
  0x11   : > { %p6143_p9 = scmp.eq.s32.totalorder %s5601_s25, 0  ;;  %p5629_p10 = pnand %p4086_p7, %p321_p8 }
  0x12   : > { %6150 = sst [smem:[#allocation22_spill]] %s6149_s14  ;;  %s5500_s16 = smov [#allocation7]  }
  0x13   : > { %p4923_p11 = pneg %p5629_p10  ;;  %s349_s17 = sshll.u32 %s5500_s16, 4  ;;  %s350_s17 = int_to_ptr.vmem [resolvable:$true] %s349_s17 }
  0x14   : > { %s5501_s19 = smov [#allocation10]   ;;  %s5307_s28 = scalar_lea.vmem %s350_s17, 15360 }
  0x15   : > { %p5637_p12 = pnand %p6143_p9, %p4923_p11  ;;  %s381_s20 = sshll.u32 %s5501_s19, 4  ;;  %s382_s20 = int_to_ptr.vmem [resolvable:$true] %s381_s20 }
  0x16   : > { %p5308_p0 = scmp.ne.s32.totalorder %s350_s17, %s5307_s28  ;;  %p5315_p3 = scmp.lt.s32.totalorder %s350_s17, %s350_s17 }
  0x17   : > { %p5643_p13 = pneg %p5637_p12  ;;  %p5316_p4 = scmp.lt.s32.totalorder %s5307_s28, %s5307_s28 }
  0x19   : > { %p5310_p1 = pnand %p5308_p0, %p5643_p13  ;;  %p5317_p7 = por %p5316_p4, %p5315_p3 }
  0x1b   : > { %p5311_p2 = pneg %p5310_p1 }
  0x1d   : > { %p5318_p8 = pnand %p5317_p7, %p5311_p2 }
  0x1f   : > { %5321 = shalt.err (!%p5318_p8)
}
  0x20   : > { %s5502_s29 = smov 64   ;;  %s5503_s16 = smov 4  }
  0x21   : > { %4929 = dma.hbm_to_vmem [thread:$0]  (!%p5637_p12), %s6127_s4, 15360, %s350_s17, [#allocation8], %s5502_s29, %s5502_s29, %s5503_s16  }
  0x22   : > { %s5504_s23 = smov [#allocation4]   ;;  %s5333_s14 = scalar_lea.vmem %s382_s20, 2048 }
  0x23   : > { %s333_s27 = sshll.u32 %s5504_s23, 4  ;;  %p5334_p11 = scmp.ne.s32.totalorder %s382_s20, %s5333_s14  ;;  %s334_s27 = int_to_ptr.vmem [resolvable:$true] %s333_s27 }
  0x24   : > { %p5341_p2 = scmp.lt.s32.totalorder %s382_s20, %s382_s20  ;;  %p5342_p3 = scmp.lt.s32.totalorder %s5333_s14, %s5333_s14 }
  0x25   : > { %p5336_p0 = pnand %p5334_p11, %p5643_p13 }
  0x26   : > { %p5343_p4 = por %p5342_p3, %p5341_p2 }
  0x27   : > { %p5337_p1 = pneg %p5336_p0 }
  0x29   : > { %p5344_p7 = pnand %p5343_p4, %p5337_p1 }
  0x2b   : > { %5347 = shalt.err (!%p5344_p7)
}
  0x2c   : > { %s6141_s28 = smov 128   ;;  %s6142_s21 = smov 8  }
  0x2d   : > { %4935 = dma.hbm_to_vmem [thread:$0]  (!%p5637_p12), %s6131_s8, 2048, %s382_s20, [#allocation11], %s6141_s28, %s6141_s28, %s6142_s21  }
  0x2e   : > { %s5359_s17 = scalar_lea.vmem %s334_s27, 15360  ;;  %p5367_p1 = scmp.lt.s32.totalorder %s334_s27, %s334_s27 }
  0x2f   : > { %p5360_p8 = scmp.ne.s32.totalorder %s334_s27, %s5359_s17  ;;  %p5368_p2 = scmp.lt.s32.totalorder %s5359_s17, %s5359_s17 }
  0x31   : > { %p5362_p11 = pnand %p5360_p8, %p5643_p13  ;;  %p5369_p3 = por %p5368_p2, %p5367_p1 }
  0x33   : > { %p5363_p0 = pneg %p5362_p11 }
  0x35   : > { %p5370_p4 = pnand %p5369_p3, %p5363_p0 }
  0x37   : > { %5373 = shalt.err (!%p5370_p4)
}
  0x38   : > { %4926 = dma.hbm_to_vmem [thread:$0]  (!%p5637_p12), %s6125_s2, 15360, %s334_s27, [#allocation5], %s5502_s29, %s5502_s29, %s5503_s16  }
  0x39   : > { %s5507_s20 = smov [#allocation9]   ;;  %s5508_s23 = smov [#allocation12]  }
  0x3a   : > { %s365_s30 = sshll.u32 %s5507_s20, 4  ;;  %s397_s28 = sshll.u32 %s5508_s23, 4  ;;  %s366_s30 = int_to_ptr.vmem [resolvable:$true] %s365_s30  ;;  %s398_s28 = int_to_ptr.vmem [resolvable:$true] %s397_s28 }
  0x3b   : > { %s5385_s21 = scalar_lea.vmem %s366_s30, 2048  ;;  %p5393_p0 = scmp.lt.s32.totalorder %s366_s30, %s366_s30 }
  0x3c   : > { %p5386_p7 = scmp.ne.s32.totalorder %s366_s30, %s5385_s21  ;;  %p5394_p1 = scmp.lt.s32.totalorder %s5385_s21, %s5385_s21 }
  0x3e   : > { %p5388_p8 = pnand %p5386_p7, %p5643_p13  ;;  %p5395_p2 = por %p5394_p1, %p5393_p0 }
  0x40   : > { %p5389_p11 = pneg %p5388_p8 }
  0x42   : > { %p5396_p3 = pnand %p5395_p2, %p5389_p11 }
  0x44   : > { %5399 = shalt.err (!%p5396_p3)
}
  0x45   : > { %s6154_s17 = smov 8   ;;  %s6155_s14 = smov 128  }
  0x46   : > { %4932 = dma.hbm_to_vmem [thread:$0]  (!%p5637_p12), %s6129_s6, 2048, %s366_s30, [#allocation8], %s6155_s14, %s6155_s14, %s6154_s17  }
  0x47   : > { %s5411_s20 = scalar_lea.vmem %s398_s28, 1024  ;;  %p5419_p9 = scmp.lt.s32.totalorder %s398_s28, %s398_s28 }
  0x48   : > { %p5412_p4 = scmp.ne.s32.totalorder %s398_s28, %s5411_s20  ;;  %p5420_p0 = scmp.lt.s32.totalorder %s5411_s20, %s5411_s20 }
  0x4a   : > { %p5414_p7 = pnand %p5412_p4, %p5643_p13  ;;  %p5421_p11 = por %p5420_p0, %p5419_p9 }
  0x4c   : > { %p5415_p8 = pneg %p5414_p7 }
  0x4e   : > { %p5422_p1 = pnand %p5421_p11, %p5415_p8 }
  0x50   : > { %5425 = shalt.err (!%p5422_p1)
}
  0x51   : > { %4938 = dma.hbm_to_vmem [thread:$0]  (!%p5637_p12), %s6133_s10, 1024, %s398_s28, [#allocation11], %s5502_s29, %s5502_s29, %s5503_s16  }
  0x52   : > { %432 = sbr.rel (%p5629_p10) target bundleno = 1237 (0x4d5), region = 68  ;;  %p6156_p13 = scmp.eq.s32.totalorder (!%p5629_p10), %s5601_s25, 0 }
  0x57   : > { %5469 = dma.done.wait (%p6156_p13), [#allocation5], 15360   ;;  %p6157_p2 = pmov %p6156_p13 }
  0x59   : > { %5471 = vsyncadd (%p6157_p2), [#allocation5], 4294951936  ;;  %p6158_p9 = pmov %p6157_p2 }
  0x5a   : > { %p6159_p3 = pmov %p6157_p2 }
  0x5b   : > { %5473 = dma.done.wait (%p6158_p9), [#allocation8], 17408  }
  0x5c   : > { %5475 = vsyncadd (%p6159_p3), [#allocation8], 4294949888  ;;  %p6160_p4 = pmov %p6157_p2 }
  0x5d   : > { %p6161_p12 = pmov %p6157_p2 }
  0x5e   : > { %5477 = dma.done.wait (%p6160_p4), [#allocation11], 3072  }
  0x5f   : > { %5479 = vsyncadd (%p6161_p12), [#allocation11], 4294964224  ;;  %vm506_vm0 = vcmask 1043456   ;;  %vm507_vm1 = vsmask.f32 3328  ;;  %vm509_vm2 = vcmask 1047556  }
  0x60   : > { %vm510_vm3 = vsmask.f32 7424  ;;  %vm5713_vm4 = vmand %vm506_vm0, %vm507_vm1  ;;  %v5002_v1 = vld [vmem:[#allocation4 + $0x78] sm:$0xff]   ;;  %v5004_v3 = vld [vmem:[#allocation4 + $0x70] sm:$0xff]   ;;  %p495_p10 = scmp.lt.s32.totalorder %s5601_s25, 1  ;;  %vm592_vm13 = vcmask 1043459  }
  0x61   : > { %vm511_vm5 = vmand %vm509_vm2, %vm510_vm3  ;;  %v5003_v2 = vld [vmem:[#allocation4 + $0x38] sm:$0xff]   ;;  %4402 = vmatprep.subr.bf16.mxu1 %v5002_v1  ;;  %v5005_v4 = vld [vmem:[#allocation4 + $0x30] sm:$0xff]   ;;  %vm537_vm6 = vsmask.f32 7938  ;;  %vm539_vm8 = vsmask.f32 7954 }
  0x62   : > { %4403 = vmatpush3.bf16.msra.mxu1 %v5003_v2  ;;  %v5006_v5 = vld [vmem:[#allocation4 + $0x68] sm:$0xff]   ;;  %vm5721_vm7 = vmor %vm511_vm5, %vm5713_vm4  ;;  %s5726_s15 = scalar_select %p495_p10, %s5601_s25, 1  ;;  %v5008_v8 = vld [vmem:[#allocation4 + $0x60] sm:$0xff]   ;;  %vm593_vm12 = vsmask.f32 7950  ;;  %vm599_vm14 = vcmask 1042432  }
  0x63   : > { %4404 = vmatprep.subr.bf16.mxu1 %v5004_v3  ;;  %v5007_v7 = vld [vmem:[#allocation4 + $0x28] sm:$0xff]   ;;  %vm5729_vm9 = vmand %vm506_vm0, %vm537_vm6  ;;  %v5009_v10 = vld [vmem:[#allocation4 + $0x20] sm:$0xff]   ;;  %vm600_vm15 = vcmask 1046532   ;;  %vm610_vm0 = vsmask.f32 2304  ;;  %s492_s26 = sand.u32 1, %s5490_s22  }
  0x64   : > { %vm540_vm10 = vmand %vm509_vm2, %vm539_vm8  ;;  %s4395_s18 = sshll.u32 %s5726_s15, 4  ;;  %v5010_v11 = vld [vmem:[#allocation4 + $0x58] sm:$0xff]   ;;  %v5012_v14 = vld [vmem:[#allocation4 + $0x50] sm:$0xff]   ;;  %vm574_vm3 = vsmask.f32 7440  ;;  %s4099_s29 = sshll.u32 %s492_s26, 4 }
  0x65   : > { %vm5737_vm11 = vmor %vm540_vm10, %vm5729_vm9  ;;  %v5011_v13 = vld [vmem:[#allocation4 + $0x18] sm:$0xff]   ;;  %s5746_s16 = scalar_lea.vmem %s6123_s0, %s4395_s18  ;;  %v513_v15 = vld [vmem:[#allocation2] sm:$0xff]  ;;  %vm632_vm10 = vcmask 1041408   ;;  %s5951_s17 = scalar_lea.vmem %s6124_s1, %s4395_s18 }
  0x66   : > { %4405 = vmatpush3.bf16.msra.mxu1 %v5005_v4  ;;  %v534_v16 = vld [vmem:[#allocation2 + $0x38] sm:$0xf]  ;;  %v542_v17 = vld [vmem:[#allocation2 + $0x3c] sm:$0xff]  ;;  %v514_v18 = vsel %vm5721_vm7, 0, %v513_v15  ;;  %v567_v22 = vld [vmem:[%s5746_s16 + $0x8] sm:$0xff]  ;;  %s4401_s30 = sshll.u32 %s5601_s25, 8 }
  0x67   : > { %4406 = vmatprep.subr.bf16.mxu1 %v5006_v5  ;;  %v535_v19 = vsel %vm5713_vm4, 0, %v534_v16  ;;  %v543_v20 = vsel %vm5737_vm11, 0, %v542_v17  ;;  %v566_v21 = vld [vmem:[%s5746_s16] sm:$0xff]  ;;  %515 = vst [vmem:[#allocation2] sm:$0xff] %v514_v18  ;;  %v5758_v24 = vpack.c.bf16 %v567_v22, %v567_v22  ;;  %v5014_v26 = vld [vmem:[#allocation4 + $0x48] sm:$0xff]   ;;  %vm5771_vm2 = vmand %vm599_vm14, %vm610_vm0  ;;  %s6079_s20 = scalar_lea.hbm %s6135_s12, %s4401_s30  ;;  %s6083_s21 = scalar_lea.sflag [#allocation6], %s492_s26 }
  0x68   : > { %536 = vst [vmem:[#allocation2 + $0x38] sm:$0xf] %v535_v19  ;;  %544 = vst [vmem:[#allocation2 + $0x3c] sm:$0xff] %v543_v20  ;;  %v5756_v23 = vpack.c.bf16 %v566_v21, %v566_v21  ;;  %v5013_v25 = vld [vmem:[#allocation4 + $0x10] sm:$0xff]   ;;  %v5015_v32 = vld [vmem:[#allocation4 + $0x8] sm:$0xff]   ;;  %s5512_s23 = smov [#allocation13]  }
  0x69   : > { %v5767_v29 = vshll.u32 %v5758_v24, 16  ;;  %vm5775_vm5 = vmor %vm599_vm14, %vm600_vm15  ;;  %v604_v34 = vrot.slane %v5758_v24, 5  ;;  %v5023_v35 = vld [vmem:[#allocation4 + $0x178] sm:$0xff]   ;;  %v5016_v36 = vld [vmem:[#allocation4 + $0x40] sm:$0xff]   ;;  %v5805_v60 = vshrl.u32 %v5758_v24, 16  ;;  %v637_v39 = vrot.slane %v5758_v24, 6 }
  0x6a   : > { %4407 = vmatpush3.bf16.msra.mxu1 %v5007_v7  ;;  %v5761_v27 = vshll.u32 %v5756_v23, 16  ;;  %v5764_v28 = vshrl.u32 %v5756_v23, 16  ;;  %v602_v30 = vrot.slane %v5756_v23, 5  ;;  %vm5784_vm6 = vmand %vm592_vm13, %vm593_vm12  ;;  %4446 = vmatprep.subr.bf16.mxu0 %v5023_v35  ;;  %v5024_v41 = vld [vmem:[#allocation4 + $0x138] sm:$0xff]   ;;  %v5017_v45 = vld [vmem:[#allocation4] sm:$0xff]   ;;  %vm633_vm12 = vcmask 1045508  }
  0x6b   : > { %4408 = vmatprep.subr.bf16.mxu1 %v5008_v8  ;;  %vm575_vm8 = vmor %vm507_vm1, %vm574_vm3  ;;  %v588_v43 = vrot.slane %v5767_v29, 5  ;;  %4447 = vmatpush3.bf16.msra.mxu0 %v5024_v41  ;;  %v5021_v49 = vld [vmem:[#allocation4 + $0xf8] sm:$0xff]   ;;  %v5027_v50 = vld [vmem:[#allocation4 + $0x170] sm:$0xff]   ;;  %vm611_vm1 = vsmask.f32 6416  ;;  %v619_v5 = vrot.slane %v5805_v60, 5 }
  0x6c   : > { %v579_v37 = vrot.slane %v5761_v27, 5  ;;  %v582_v38 = vrot.slane %v5764_v28, 4  ;;  %v603_v40 = vrot.slane %v602_v30, 4  ;;  %608 = vst [vmem:[#allocation2 + $0x4] sm:$0x8] %v602_v30  ;;  %v5028_v52 = vld [vmem:[#allocation4 + $0x130] sm:$0xff]   ;;  %4448 = vmatprep.subr.bf16.mxu0 %v5027_v50  ;;  %vm612_vm3 = vmor %vm610_vm0, %vm611_vm1 }
  0x6d   : > { %v5031_v53 = vld [vmem:[#allocation4 + $0x168] sm:$0xff]   ;;  %v5022_v55 = vld [vmem:[#allocation4 + $0xb8] sm:$0xff]   ;;  %v5025_v56 = vld [vmem:[#allocation4 + $0xf0] sm:$0xff]   ;;  %v613_v63 = vrot.slane %v5764_v28, 5  ;;  %v614_v2 = vrot.slane %v5761_v27, 6  ;;  %v620_v8 = vrot.slane %v5767_v29, 6 }
  0x6e   : > { %4409 = vmatpush3.bf16.msra.mxu1 %v5009_v10  ;;  %v583_v42 = vor.u32 %v582_v38, %v579_v37  ;;  %v5794_v44 = vsel %vm5775_vm5, %v603_v40, %v604_v34  ;;  %v595_v46 = vld [vmem:[#allocation2] sm:$0x8]  ;;  %v5032_v54 = vld [vmem:[#allocation4 + $0x128] sm:$0xff]   ;;  %v5035_v57 = vld [vmem:[#allocation4 + $0x160] sm:$0xff]   ;;  %v646_v15 = vrot.slane %v5764_v28, 6  ;;  %v647_v17 = vrot.slane %v5761_v27, 7 }
  0x6f   : > { %4410 = vmatprep.subr.bf16.mxu1 %v5010_v11  ;;  %609 = vst [vmem:[#allocation2 + $0x40] sm:$0xf] %v5794_v44  ;;  %v596_v48 = vsel %vm5784_vm6, %v579_v37, %v595_v46  ;;  %4449 = vmatpush3.bf16.msra.mxu0 %v5028_v52  ;;  %v5036_v61 = vld [vmem:[#allocation4 + $0x120] sm:$0xff]   ;;  %v5026_v62 = vld [vmem:[#allocation4 + $0xb0] sm:$0xff]   ;;  %v5029_v1 = vld [vmem:[#allocation4 + $0xe8] sm:$0xff]   ;;  %v5811_v11 = vor.u32 %v614_v2, %v613_v63  ;;  %v635_v20 = vrot.slane %v5756_v23, 6 }
  0x70   : > { %v584_v47 = vrot.slane %v583_v42, 4  ;;  %597 = vst [vmem:[#allocation2] sm:$0x8] %v596_v48  ;;  %4450 = vmatprep.subr.bf16.mxu0 %v5031_v53  ;;  %v5039_v3 = vld [vmem:[#allocation4 + $0x158] sm:$0xff]   ;;  %v5030_v7 = vld [vmem:[#allocation4 + $0xa8] sm:$0xff]   ;;  %v5033_v10 = vld [vmem:[#allocation4 + $0xe0] sm:$0xff]   ;;  %v5826_v35 = vor.u32 %v647_v17, %v646_v15 }
  0x71   : > { %v5040_v4 = vld [vmem:[#allocation4 + $0x118] sm:$0xff]   ;;  %v5044_v16 = vld [vmem:[#allocation4 + $0x110] sm:$0xff]   ;;  %vm643_vm13 = vsmask.f32 1280  ;;  %vm644_vm14 = vsmask.f32 5392  ;;  %vm5845_vm0 = vmor %vm632_vm10, %vm633_vm12 }
  0x72   : > { %4411 = vmatpush3.bf16.msra.mxu1 %v5011_v13  ;;  %v5801_v51 = vsel %vm575_vm8, %v584_v47, %v588_v43  ;;  %v677_v13 = vrot.slane %v5764_v28, 7  ;;  %v5034_v19 = vld [vmem:[#allocation4 + $0xa0] sm:$0xff]   ;;  %vm626_vm15 = vsmask.f32 7946  ;;  %v5037_v21 = vld [vmem:[#allocation4 + $0xd8] sm:$0xff]   ;;  %v616_v22 = vrot.slane %v5811_v11, 4  ;;  %vm645_vm12 = vmor %vm643_vm13, %vm644_vm14 }
  0x73   : > { %4412 = vmatprep.subr.bf16.mxu1 %v5012_v14  ;;  %598 = vst [vmem:[#allocation2 + $0x3c] sm:$0xf] %v5801_v51  ;;  %4451 = vmatpush3.bf16.msra.mxu0 %v5032_v54  ;;  %v5043_v14 = vld [vmem:[#allocation4 + $0x150] sm:$0xff]   ;;  %v5048_v30 = vld [vmem:[#allocation4 + $0x108] sm:$0xff]   ;;  %v666_v37 = vrot.slane %v5756_v23, 7  ;;  %v5038_v38 = vld [vmem:[#allocation4 + $0x98] sm:$0xff]  }
  0x74   : > { %4452 = vmatprep.subr.bf16.mxu0 %v5035_v57  ;;  %v5819_v18 = vor.u32 %v677_v13, %v5761_v27  ;;  %v651_v27 = vrot.slane %v5767_v29, 7  ;;  %v5051_v40 = vld [vmem:[#allocation4 + $0x140] sm:$0xff]   ;;  %v516_v41 = vld [vmem:[#allocation2 + $0x8] sm:$0xff]  ;;  %vm625_vm6 = vcmask 1043458   ;;  %vm663_vm8 = vcmask 1040384   ;;  %v5041_v42 = vld [vmem:[#allocation4 + $0xd0] sm:$0xff]  }
  0x75   : > { %v545_v46 = vld [vmem:[#allocation2 + $0x44] sm:$0xff]  ;;  %v649_v48 = vrot.slane %v5826_v35, 4  ;;  %v5055_v54 = vld [vmem:[#allocation4 + $0x100] sm:$0xff]   ;;  %vm664_vm1 = vcmask 1044484   ;;  %s5430_s15 = sshll.u32 %s5512_s23, 4  ;;  %s5431_s15 = int_to_ptr.vmem [resolvable:$false] %s5430_s15 }
  0x76   : > { %4413 = vmatpush3.bf16.msra.mxu1 %v5013_v25  ;;  %v5020_v59 = vld [vmem:[#allocation2 + $0x4] ss:$60 sps:$4 sm:$0xff]   ;;  %v5047_v25 = vld [vmem:[#allocation4 + $0x148] sm:$0xff]   ;;  %v546_v52 = vsel %vm5737_vm11, 0, %v545_v46  ;;  %vm5875_vm14 = vmor %vm663_vm8, %vm664_vm1  ;;  %vm656_vm1 = vcmask 1043457   ;;  %s5432_s18 = scalar_lea.vmem %s5431_s15, 512 }
  0x77   : > { %4414 = vmatprep.subr.bf16.mxu1 %v5014_v26  ;;  %1857 = vmatprep.mubr.bf16.mxu1 %v5020_v59  ;;  %v650_v26 = vrot.slane %v5805_v60, 6  ;;  %v5042_v50 = vld [vmem:[#allocation4 + $0x90] sm:$0xff]   ;;  %547 = vst [vmem:[#allocation2 + $0x44] sm:$0xff] %v546_v52  ;;  %v519_v59 = vld [vmem:[#allocation2 + $0x10] sm:$0xff]  ;;  %v5056_v17 = vld [vmem:[#allocation4 + $0x1f8] sm:$0xff]  }
  0x78   : > { %4453 = vmatpush3.bf16.msra.mxu0 %v5036_v61  ;;  %v548_v61 = vld [vmem:[#allocation2 + $0x4c] sm:$0xff]  ;;  %v520_v63 = vsel %vm5721_vm7, 0, %v519_v59  ;;  %v5079_v59 = vld [vmem:[#allocation4 + $0x1d0] sm:$0xff]   ;;  %v551_v28 = vld [vmem:[#allocation2 + $0x54] sm:$0xff] }
  0x79   : > { %4454 = vmatprep.subr.bf16.mxu0 %v5039_v3  ;;  %521 = vst [vmem:[#allocation2 + $0x10] sm:$0xff] %v520_v63  ;;  %v5050_v15 = vld [vmem:[#allocation4 + $0x80] sm:$0xff]   ;;  %v679_v63 = vrot.slane %v677_v13, 4  ;;  %v5085_v13 = vld [vmem:[#allocation4 + $0x248] sm:$0xff]   ;;  %v5101_v0 = vld [vmem:[#allocation4 + $0x2f0] sm:$0xff]  }
  0x7a   : > { %4415 = vmatpush3.bf16.msra.mxu1 %v5015_v32  ;;  %v5018_v58 = vld [vmem:[#allocation2] ss:$60 sps:$4 sm:$0xff]   ;;  %v5824_v32 = vor.u32 %v620_v8, %v619_v5  ;;  %672 = vst [vmem:[#allocation2 + $0x14] sm:$0xe] %v666_v37  ;;  %v5072_v46 = vld [vmem:[#allocation4 + $0x1a0] sm:$0xff]   ;;  %v5135_v5 = vld [vmem:[#allocation4 + $0x3b8] sm:$0xff]  }
  0x7b   : > { %4416 = vmatprep.subr.bf16.mxu1 %v5016_v36  ;;  %v636_v36 = vrot.slane %v635_v20, 4  ;;  %v5046_v8 = vld [vmem:[#allocation4 + $0x88] sm:$0xff]   ;;  %v5074_v52 = vld [vmem:[#allocation4 + $0x220] sm:$0xff]   ;;  %v5136_v9 = vld [vmem:[#allocation4 + $0x3b0] sm:$0xff]  }
  0x7c   : > { %4455 = vmatpush3.bf16.msra.mxu0 %v5040_v4  ;;  %v5836_v47 = vsel %vm612_vm3, %v616_v22, %v5824_v32  ;;  %vm5862_vm3 = vmand %vm625_vm6, %vm626_vm15  ;;  %vm657_vm15 = vsmask.f32 7942  ;;  %v5125_v6 = vld [vmem:[#allocation4 + $0x2c0] sm:$0xff]   ;;  %v5186_v53 = vld [vmem:[#allocation7 + $0x170] sm:$0xff]  }
  0x7d   : > { %4456 = vmatprep.subr.bf16.mxu0 %v5043_v14  ;;  %v5853_v57 = vsel %vm5845_vm0, %v636_v36, %v637_v39  ;;  %631 = vst [vmem:[#allocation2 + $0x44] sm:$0xf] %v5836_v47  ;;  %vm5888_vm6 = vmand %vm632_vm10, %vm643_vm13  ;;  %vm674_vm13 = vsmask.f32 256 }
  0x7e   : > { %4417 = vmatpush3.bf16.msra.mxu1 %v5017_v45  ;;  %v517_v45 = vsel %vm5721_vm7, 0, %v516_v41  ;;  %642 = vst [vmem:[#allocation2 + $0x48] sm:$0xf] %v5853_v57  ;;  %vm658_vm10 = vmand %vm656_vm1, %vm657_vm15  ;;  %v5069_v41 = vld [vmem:[#allocation4 + $0x268] sm:$0xff]  }
  0x7f   : > { %4424 = vmatprep.subr.bf16.mxu1 %v5021_v49  ;;  %v5839_v49 = vor.u32 %v651_v27, %v650_v26  ;;  %518 = vst [vmem:[#allocation2 + $0x8] sm:$0xff] %v517_v45  ;;  %v5063_v26 = vld [vmem:[#allocation4 + $0x1f0] sm:$0xff]   ;;  %v5070_v45 = vld [vmem:[#allocation4 + $0x228] sm:$0xff]  }
  0x80   : > { %4457 = vmatpush3.bf16.msra.mxu0 %v5044_v16  ;;  %641 = vst [vmem:[#allocation2 + $0xc] sm:$0xc] %v635_v20  ;;  %v5064_v27 = vld [vmem:[#allocation4 + $0x1b0] sm:$0xff]  }
  0x81   : > { %1858 = vmatmul.mubr.bf16.vlgmr.msra.gmra.mxu1 %v5018_v58  ;;  %4458 = vmatprep.subr.bf16.mxu0 %v5047_v25  ;;  %v668_v58 = vrot.slane %v5758_v24, 7  ;;  %v5871_v2 = vsel %vm645_vm12, %v649_v48, %v5839_v49  ;;  %vm675_vm12 = vsmask.f32 4368  ;;  %v5073_v48 = vld [vmem:[#allocation4 + $0x260] sm:$0xff]   ;;  %v716_v12 = vrot.slane %v5839_v49, 4 }
  0x82   : > { %4425 = vmatpush3.bf16.msra.mxu1 %v5022_v55  ;;  %v667_v55 = vrot.slane %v666_v37, 4 }
  0x83   : > { %4426 = vmatprep.subr.bf16.mxu1 %v5025_v56  ;;  %v5045_v56 = vld [vmem:[#allocation4 + $0xc8] sm:$0xff]  }
  0x84   : > { %4459 = vmatpush3.bf16.msra.mxu0 %v5048_v30  ;;  %v5884_v4 = vsel %vm5875_vm14, %v667_v55, %v668_v58  ;;  %v5062_v30 = vld [vmem:[#allocation4 + $0x238] sm:$0xff]   ;;  %v680_v55 = vrot.slane %v5805_v60, 7 }
  0x85   : > { %4460 = vmatprep.subr.bf16.mxu0 %v5051_v40  ;;  %v5066_v40 = vld [vmem:[#allocation4 + $0x230] sm:$0xff]  }
  0x86   : > { %4427 = vmatpush3.bf16.msra.mxu1 %v5026_v62  ;;  %v628_v14 = vld [vmem:[#allocation2 + $0x8] sm:$0xc]  ;;  %v5080_v62 = vld [vmem:[#allocation4 + $0x190] sm:$0xff]  }
  0x87   : > { %4428 = vmatprep.subr.bf16.mxu1 %v5029_v1  ;;  %v549_v1 = vsel %vm5737_vm11, 0, %v548_v61  ;;  %v629_v16 = vsel %vm5862_vm3, %v5811_v11, %v628_v14  ;;  %v5054_v25 = vld [vmem:[#allocation2 + $0xc] ss:$60 sps:$4 sm:$0xff]   ;;  %v5065_v11 = vld [vmem:[#allocation4 + $0x270] sm:$0xff]   ;;  %v693_v14 = vrot.slane %v5805_v60, 4  ;;  %vm676_vm3 = vmor %vm674_vm13, %vm675_vm12 }
  0x88   : > { %4461 = vmatpush3.bf16.msra.mxu0 %v5055_v54  ;;  %550 = vst [vmem:[#allocation2 + $0x4c] sm:$0xff] %v549_v1  ;;  %630 = vst [vmem:[#allocation2 + $0x8] sm:$0xc] %v629_v16  ;;  %1898 = vmatprep.mubr.bf16.mxu1 %v5054_v25  ;;  %v5076_v54 = vld [vmem:[#allocation4 + $0x198] sm:$0xff]   ;;  %v681_v1 = vor.u32 %v680_v55, %v5767_v29  ;;  %v5084_v16 = vld [vmem:[#allocation4 + $0x188] sm:$0xff]   ;;  %v701_v25 = vrot.slane %v604_v34, 4 }
  0x89   : > { %662 = vst [vmem:[#allocation2 + $0x4c] sm:$0xf] %v5871_v2  ;;  %673 = vst [vmem:[#allocation2 + $0x50] sm:$0xf] %v5884_v4  ;;  %v5078_v61 = vld [vmem:[#allocation4 + $0x218] sm:$0xff]   ;;  %v5089_v34 = vld [vmem:[#allocation4 + $0x240] sm:$0xff]  }
  0x8a   : > { %4429 = vmatpush3.bf16.msra.mxu1 %v5030_v7  ;;  %v5061_v7 = vld [vmem:[#allocation4 + $0x278] sm:$0xff]  }
  0x8b   : > { %4430 = vmatprep.subr.bf16.mxu1 %v5033_v10  ;;  %v5049_v10 = vld [vmem:[#allocation4 + $0xc0] sm:$0xff]   ;;  %4490 = vmatprep.subr.bf16.mxu0 %v5061_v7  ;;  %v5081_v7 = vld [vmem:[#allocation4 + $0x250] sm:$0xff]  }
  0x8e   : > { %4431 = vmatpush3.bf16.msra.mxu1 %v5034_v19  ;;  %v659_v19 = vld [vmem:[#allocation2 + $0x10] sm:$0xe] }
  0x8f   : > { %4432 = vmatprep.subr.bf16.mxu1 %v5037_v21  ;;  %v660_v20 = vsel %vm658_vm10, %v5826_v35, %v659_v19  ;;  %v5060_v21 = vld [vmem:[#allocation4 + $0x1b8] sm:$0xff]   ;;  %v5068_v35 = vld [vmem:[#allocation4 + $0x1a8] sm:$0xff]   ;;  %v552_v19 = vsel %vm5737_vm11, 0, %v551_v28 }
  0x90   : > { %661 = vst [vmem:[#allocation2 + $0x10] sm:$0xe] %v660_v20  ;;  %v5052_v22 = vld [vmem:[#allocation2 + $0x8] ss:$60 sps:$4 sm:$0xff]   ;;  %v5059_v37 = vld [vmem:[#allocation2 + $0x14] ss:$60 sps:$4 sm:$0xff]   ;;  %v682_v20 = vsel %vm676_vm3, %v679_v63, %v681_v1 }
  0x91   : > { %1939 = vmatprep.mubr.bf16.mxu0 %v5059_v37  ;;  %553 = vst [vmem:[#allocation2 + $0x54] sm:$0xff] %v552_v19  ;;  %729 = vst [vmem:[#allocation2 + $0x38] sm:$0xf] %v682_v20  ;;  %v5094_v37 = vld [vmem:[#allocation4 + $0x2f8] sm:$0xff]   ;;  %v5109_v63 = vld [vmem:[#allocation4 + $0x2e0] sm:$0xff]  }
  0x92   : > { %4433 = vmatpush3.bf16.msra.mxu1 %v5038_v38  ;;  %v5067_v38 = vld [vmem:[#allocation4 + $0x1e8] sm:$0xff]   ;;  %688 = vst [vmem:[#allocation2 + $0x54] sm:$0xf] %v682_v20  ;;  %692 = vst [vmem:[#allocation2 + $0x58] sm:$0xf] %v5758_v24  ;;  %v5116_v28 = vld [vmem:[#allocation4 + $0x318] sm:$0xff]  }
  0x93   : > { %4434 = vmatprep.subr.bf16.mxu1 %v5041_v42  ;;  %v5071_v42 = vld [vmem:[#allocation4 + $0x1e0] sm:$0xff]   ;;  %v5108_v1 = vld [vmem:[#allocation4 + $0x328] sm:$0xff]   ;;  %v5119_v19 = vld [vmem:[#allocation4 + $0x350] sm:$0xff]  }
  0x94   : > { %v528_v20 = vld [vmem:[#allocation2 + $0x28] sm:$0xff] }
  0x96   : > { %4435 = vmatpush3.bf16.msra.mxu1 %v5042_v50  ;;  %v5075_v50 = vld [vmem:[#allocation4 + $0x1d8] sm:$0xff]  }
  0x97   : > { %4436 = vmatprep.subr.bf16.mxu1 %v5045_v56  ;;  %v5057_v36 = vld [vmem:[#allocation2 + $0x10] ss:$60 sps:$4 sm:$0xff]  }
  0x98   : > { %1940 = vmatmul.mubr.bf16.vlgmr.msra.gmra.mxu0 %v5057_v36  ;;  %v5077_v56 = vld [vmem:[#allocation4 + $0x258] sm:$0xff]   ;;  %v5088_v36 = vld [vmem:[#allocation4 + $0x180] sm:$0xff]  }
  0x99   : > { %4491 = vmatpush3.bf16.msra.mxu0 %v5062_v30  ;;  %v554_v30 = vld [vmem:[#allocation2 + $0x5c] sm:$0xff] }
  0x9a   : > { %4437 = vmatpush3.bf16.msra.mxu1 %v5046_v8  ;;  %4492 = vmatprep.subr.bf16.mxu0 %v5065_v11  ;;  %v5083_v8 = vld [vmem:[#allocation4 + $0x1c8] sm:$0xff]   ;;  %v555_v11 = vsel %vm5737_vm11, 0, %v554_v30 }
  0x9b   : > { %4438 = vmatprep.subr.bf16.mxu1 %v5049_v10  ;;  %v522_v10 = vld [vmem:[#allocation2 + $0x18] sm:$0xff]  ;;  %556 = vst [vmem:[#allocation2 + $0x5c] sm:$0xff] %v555_v11  ;;  %v531_v11 = vld [vmem:[#allocation2 + $0x30] sm:$0xff] }
  0x9c   : > { %704 = vst [vmem:[#allocation2 + $0x60] sm:$0x7] %v701_v25  ;;  %v529_v25 = vsel %vm5721_vm7, 0, %v528_v20  ;;  %v5121_v30 = vld [vmem:[#allocation4 + $0x2c8] sm:$0xff]   ;;  %v532_v24 = vsel %vm5721_vm7, 0, %v531_v11  ;;  %v5158_v20 = vld [vmem:[#allocation7 + $0xe0] sm:$0xff]  }
  0x9d   : > { %4493 = vmatpush3.bf16.msra.mxu0 %v5066_v40  ;;  %530 = vst [vmem:[#allocation2 + $0x28] sm:$0xff] %v529_v25  ;;  %533 = vst [vmem:[#allocation2 + $0x30] sm:$0xff] %v532_v24  ;;  %v5161_v25 = vld [vmem:[#allocation7 + $0x18] sm:$0xff]   ;;  %v5165_v11 = vld [vmem:[#allocation7 + $0x10] sm:$0xff]  }
  0x9e   : > { %4439 = vmatpush3.bf16.msra.mxu1 %v5050_v15  ;;  %4494 = vmatprep.subr.bf16.mxu0 %v5069_v41  ;;  %v5082_v15 = vld [vmem:[#allocation4 + $0x210] sm:$0xff]   ;;  %v5098_v41 = vld [vmem:[#allocation4 + $0x2b8] sm:$0xff]   ;;  %707 = vst [vmem:[#allocation2 + $0x28] sm:$0xf] %v5836_v47  ;;  %714 = vst [vmem:[#allocation2 + $0x2c] sm:$0xf] %v5853_v57 }
  0x9f   : > { %4468 = vmatprep.subr.bf16.mxu1 %v5056_v17  ;;  %v523_v17 = vsel %vm5721_vm7, 0, %v522_v10  ;;  %v5113_v10 = vld [vmem:[#allocation4 + $0x2d8] sm:$0xff]   ;;  %718 = vst [vmem:[#allocation2 + $0x30] sm:$0xf] %v5871_v2  ;;  %725 = vst [vmem:[#allocation2 + $0x34] sm:$0xf] %v5884_v4 }
  0xa0   : > { %524 = vst [vmem:[#allocation2 + $0x18] sm:$0xff] %v523_v17  ;;  %v5117_v17 = vld [vmem:[#allocation4 + $0x2d0] sm:$0xff]   ;;  %v705_v47 = vrot.slane %v5824_v32, 4  ;;  %v5124_v57 = vld [vmem:[#allocation4 + $0x308] sm:$0xff]  }
  0xa1   : > { %1899 = vmatmul.mubr.bf16.vlgmr.msra.gmra.mxu1 %v5052_v22  ;;  %4495 = vmatpush3.bf16.msra.mxu0 %v5070_v45  ;;  %691 = vst [vmem:[#allocation2 + $0x1c] sm:$0xf] %v5756_v23  ;;  %v525_v22 = vld [vmem:[#allocation2 + $0x20] sm:$0xff]  ;;  %v694_v23 = vor.u32 %v693_v14, %v588_v43  ;;  %v5093_v43 = vld [vmem:[#allocation4 + $0x200] sm:$0xff]   ;;  %v5168_v24 = vld [vmem:[#allocation7 + $0x48] sm:$0xff]  }
  0xa2   : > { %4469 = vmatpush3.bf16.msra.mxu1 %v5060_v21  ;;  %4496 = vmatprep.subr.bf16.mxu0 %v5073_v48  ;;  %v5087_v21 = vld [vmem:[#allocation4 + $0x1c0] sm:$0xff]   ;;  %v5102_v48 = vld [vmem:[#allocation4 + $0x2b0] sm:$0xff]  }
  0xa3   : > { %4470 = vmatprep.subr.bf16.mxu1 %v5063_v26  ;;  %v526_v26 = vsel %vm5721_vm7, 0, %v525_v22  ;;  %v695_v40 = vrot.slane %v694_v23, 4  ;;  %v5112_v14 = vld [vmem:[#allocation4 + $0x320] sm:$0xff]   ;;  %v723_v22 = vrot.slane %v668_v58, 4  ;;  %v5122_v58 = vld [vmem:[#allocation4 + $0x288] sm:$0xff]   ;;  %vm5511_vm7 = vmmov 0  }
  0xa4   : > { %527 = vst [vmem:[#allocation2 + $0x20] sm:$0xff] %v526_v26  ;;  %v557_v26 = vld [vmem:[#allocation2 + $0x64] sm:$0xff]  ;;  %v560_v23 = vld [vmem:[#allocation2 + $0x6c] sm:$0xff] }
  0xa5   : > { %4497 = vmatpush3.bf16.msra.mxu0 %v5074_v52  ;;  %697 = vst [vmem:[#allocation2 + $0x20] sm:$0xf] %v5801_v51  ;;  %703 = vst [vmem:[#allocation2 + $0x24] sm:$0xf] %v5794_v44  ;;  %v5099_v44 = vld [vmem:[#allocation4 + $0x378] sm:$0xff]  }
  0xa6   : > { %4471 = vmatpush3.bf16.msra.mxu1 %v5064_v27  ;;  %4498 = vmatprep.subr.bf16.mxu0 %v5077_v56  ;;  %v5086_v27 = vld [vmem:[#allocation4 + $0x208] sm:$0xff]  }
  0xa7   : > { %4472 = vmatprep.subr.bf16.mxu1 %v5067_v38  ;;  %v685_v38 = vld [vmem:[#allocation2 + $0x18] sm:$0xf]  ;;  %v698_v51 = vld [vmem:[#allocation2 + $0x5c] sm:$0xf] }
  0xa8   : > { %v686_v29 = vsel %vm5729_vm9, %v5819_v18, %v685_v38  ;;  %v5092_v45 = vld [vmem:[#allocation2 + $0x1c] ss:$60 sps:$4 sm:$0xff]   ;;  %v5100_v18 = vld [vmem:[#allocation4 + $0x338] sm:$0xff]   ;;  %v5127_v38 = vld [vmem:[#allocation4 + $0x340] sm:$0xff]  }
  0xa9   : > { %4499 = vmatpush3.bf16.msra.mxu0 %v5078_v61  ;;  %687 = vst [vmem:[#allocation2 + $0x18] sm:$0xf] %v686_v29  ;;  %1980 = vmatprep.mubr.bf16.mxu1 %v5092_v45  ;;  %v5105_v56 = vld [vmem:[#allocation4 + $0x2e8] sm:$0xff]   ;;  %v563_v29 = vld [vmem:[#allocation2 + $0x74] sm:$0xf] }
  0xaa   : > { %4473 = vmatpush3.bf16.msra.mxu1 %v5068_v35  ;;  %4500 = vmatprep.subr.bf16.mxu0 %v5081_v7  ;;  %v699_v35 = vsel %vm5713_vm4, %v695_v40, %v698_v51  ;;  %v5106_v61 = vld [vmem:[#allocation4 + $0x2a8] sm:$0xff]   ;;  %v5110_v7 = vld [vmem:[#allocation4 + $0x2a0] sm:$0xff]   ;;  %vm5957_vm4 = vmand %vm663_vm8, %vm674_vm13  ;;  %v564_v31 = vsel %vm5729_vm9, 0, %v563_v29  ;;  %v727_v51 = vrot.slane %v680_v55, 4 }
  0xab   : > { %4474 = vmatprep.subr.bf16.mxu1 %v5071_v42  ;;  %700 = vst [vmem:[#allocation2 + $0x5c] sm:$0xf] %v699_v35  ;;  %v5510_v35 = vmov 0.0   ;;  %565 = vst [vmem:[#allocation2 + $0x74] sm:$0xf] %v564_v31  ;;  %v5137_v55 = vld [vmem:[#allocation4 + $0x3a8] sm:$0xff]  }
  0xad   : > { %4501 = vmatpush3.bf16.msra.mxu0 %v5082_v15  ;;  %v5114_v15 = vld [vmem:[#allocation4 + $0x298] sm:$0xff]  }
  0xae   : > { %4475 = vmatpush3.bf16.msra.mxu1 %v5072_v46  ;;  %4502 = vmatprep.subr.bf16.mxu0 %v5085_v13  ;;  %v5509_v46 = vmov 0   ;;  %v5118_v13 = vld [vmem:[#allocation4 + $0x290] sm:$0xff]  }
  0xaf   : > { %4476 = vmatprep.subr.bf16.mxu1 %v5075_v50  ;;  %5000 = vset.pattern.permute.xlu0 %v5509_v46  ;;  %734 = vst [vmem:[#allocation3] sm:$0xff] %v5509_v46  ;;  %735 = vst [vmem:[#allocation3 + $0x8] sm:$0xff] %v5509_v46  ;;  %v5103_v50 = vld [vmem:[#allocation4 + $0x370] sm:$0xff]  }
  0xb0   : > { %v5090_v42 = vld [vmem:[#allocation2 + $0x18] ss:$60 sps:$4 sm:$0xff]   ;;  %736 = vst [vmem:[#allocation3 + $0x10] sm:$0xff] %v5509_v46  ;;  %737 = vst [vmem:[#allocation3 + $0x18] sm:$0xff] %v5509_v46  ;;  %5001 = vset.pattern.permute.xlu1 %v5509_v46 }
  0xb1   : > { %4503 = vmatpush3.bf16.msra.mxu0 %v5086_v27  ;;  %738 = vst [vmem:[#allocation3 + $0x20] sm:$0xff] %v5509_v46  ;;  %739 = vst [vmem:[#allocation3 + $0x28] sm:$0xff] %v5509_v46  ;;  %v558_v27 = vsel %vm5737_vm11, 0, %v557_v26  ;;  %v5162_v26 = vld [vmem:[#allocation7 + $0xd8] sm:$0xff]  }
  0xb2   : > { %4477 = vmatpush3.bf16.msra.mxu1 %v5076_v54  ;;  %4504 = vmatprep.subr.bf16.mxu0 %v5089_v34  ;;  %740 = vst [vmem:[#allocation3 + $0x30] sm:$0xff] %v5509_v46  ;;  %741 = vst [vmem:[#allocation3 + $0x38] sm:$0xf] %v5509_v46  ;;  %v5095_v52 = vld [vmem:[#allocation2 + $0x20] ss:$60 sps:$4 sm:$0xff]  }
  0xb3   : > { %4478 = vmatprep.subr.bf16.mxu1 %v5079_v59  ;;  %742 = vst [vmem:[#allocation3 + $0x3c] sm:$0x77] %v5509_v46  ;;  %743 = vst [vmem:[#allocation3 + $0x44] sm:$0x77] %v5509_v46  ;;  %v5097_v54 = vld [vmem:[#allocation2 + $0x24] ss:$60 sps:$4 sm:$0xff]  }
  0xb4   : > { %744 = vst [vmem:[#allocation3 + $0x4c] sm:$0x77] %v5509_v46  ;;  %745 = vst [vmem:[#allocation3 + $0x54] sm:$0x77] %v5509_v46  ;;  %2021 = vmatprep.mubr.bf16.mxu0 %v5097_v54  ;;  %v5104_v59 = vld [vmem:[#allocation4 + $0x330] sm:$0xff]   ;;  %v5123_v34 = vld [vmem:[#allocation4 + $0x348] sm:$0xff]  }
  0xb5   : > { %4505 = vmatpush3.bf16.msra.mxu0 %v5093_v43  ;;  %746 = vst [vmem:[#allocation3 + $0x5c] sm:$0x77] %v5509_v46  ;;  %747 = vst [vmem:[#allocation3 + $0x64] sm:$0x77] %v5509_v46  ;;  %v5131_v43 = vld [vmem:[#allocation4 + $0x300] sm:$0xff]   ;;  %v5141_v54 = vld [vmem:[#allocation4 + $0x388] sm:$0xff]  }
  0xb6   : > { %4479 = vmatpush3.bf16.msra.mxu1 %v5080_v62  ;;  %4534 = vmatprep.subr.bf16.mxu0 %v5099_v44  ;;  %748 = vst [vmem:[#allocation3 + $0x6c] sm:$0x77] %v5509_v46  ;;  %749 = vst [vmem:[#allocation3 + $0x74] sm:$0x7] %v5509_v46  ;;  %v5107_v62 = vld [vmem:[#allocation4 + $0x368] sm:$0xff]   ;;  %v2155_v44 = vld [vmem:[%s5951_s17] sm:$0xff] }
  0xb7   : > { %4480 = vmatprep.subr.bf16.mxu1 %v5083_v8  ;;  %750 = vst [vmem:[#allocation3] sm:$0xee] %v5509_v46  ;;  %751 = vst [vmem:[#allocation3 + $0x8] sm:$0xee] %v5509_v46  ;;  %v5111_v8 = vld [vmem:[#allocation4 + $0x360] sm:$0xff]   ;;  %2159 = vperm.xlu0 %5000, %v2155_v44  }
  0xb8   : > { %752 = vst [vmem:[#allocation3 + $0x10] sm:$0xee] %v5509_v46  ;;  %753 = vst [vmem:[#allocation3 + $0x18] sm:$0xee] %v5509_v46  ;;  %2022 = vmatmul.mubr.bf16.vlgmr.msra.gmra.mxu0 %v5095_v52  ;;  %v5140_v52 = vld [vmem:[#allocation4 + $0x390] sm:$0xff]  }
  0xb9   : > { %754 = vst [vmem:[#allocation3 + $0x20] sm:$0xee] %v5509_v46  ;;  %755 = vst [vmem:[#allocation3 + $0x28] sm:$0xee] %v5509_v46  ;;  %4535 = vmatpush3.bf16.msra.mxu0 %v5100_v18  ;;  %v731_v18 = vld [vmem:[#allocation2 + $0x74] sm:$0x1] }
  0xba   : > { %4481 = vmatpush3.bf16.msra.mxu1 %v5084_v16  ;;  %756 = vst [vmem:[#allocation3 + $0x30] sm:$0xee] %v5509_v46  ;;  %757 = vst [vmem:[#allocation3 + $0x38] sm:$0xe] %v5509_v46  ;;  %4536 = vmatprep.subr.bf16.mxu0 %v5103_v50  ;;  %v5115_v16 = vld [vmem:[#allocation4 + $0x358] sm:$0xff]   ;;  %v732_v60 = vsel %vm5957_vm4, %v727_v51, %v731_v18 }
  0xbb   : > { %4482 = vmatprep.subr.bf16.mxu1 %v5087_v21  ;;  %758 = vst [vmem:[#allocation3 + $0x3c] sm:$0xff] %v5509_v46  ;;  %759 = vst [vmem:[#allocation3 + $0x44] sm:$0xff] %v5509_v46  ;;  %v712_v21 = vrot.slane %v637_v39, 4  ;;  %v561_v39 = vsel %vm5737_vm11, 0, %v560_v23  ;;  %v5139_v50 = vld [vmem:[#allocation4 + $0x398] sm:$0xff]   ;;  %v5166_v23 = vld [vmem:[#allocation7 + $0xd0] sm:$0xff]  }
  0xbc   : > { %760 = vst [vmem:[#allocation3 + $0x4c] sm:$0xff] %v5509_v46  ;;  %761 = vst [vmem:[#allocation3 + $0x54] sm:$0xff] %v5509_v46 }
  0xbd   : > { %762 = vst [vmem:[#allocation3 + $0x5c] sm:$0xff] %v5509_v46  ;;  %763 = vst [vmem:[#allocation3 + $0x64] sm:$0xff] %v5509_v46  ;;  %4537 = vmatpush3.bf16.msra.mxu0 %v5104_v59 }
  0xbe   : > { %4483 = vmatpush3.bf16.msra.mxu1 %v5088_v36  ;;  %764 = vst [vmem:[#allocation3 + $0x6c] sm:$0xff] %v5509_v46  ;;  %765 = vst [vmem:[#allocation3 + $0x74] sm:$0xf] %v5509_v46  ;;  %4538 = vmatprep.subr.bf16.mxu0 %v5107_v62  ;;  %v5120_v36 = vld [vmem:[#allocation4 + $0x310] sm:$0xff]   ;;  %v5145_v62 = vld [vmem:[#allocation7 + $0x38] sm:$0xff]  }
  0xbf   : > { %4512 = vmatprep.subr.bf16.mxu1 %v5094_v37  ;;  %559 = vst [vmem:[#allocation2 + $0x64] sm:$0xff] %v558_v27  ;;  %562 = vst [vmem:[#allocation2 + $0x6c] sm:$0xff] %v561_v39  ;;  %v5126_v37 = vld [vmem:[#allocation4 + $0x280] sm:$0xff]   ;;  %v5164_v27 = vld [vmem:[#allocation7 + $0x50] sm:$0xff]  }
  0xc0   : > { %715 = vst [vmem:[#allocation2 + $0x68] sm:$0x3] %v712_v21  ;;  %726 = vst [vmem:[#allocation2 + $0x70] sm:$0x1] %v723_v22  ;;  %v5159_v21 = vld [vmem:[#allocation7 + $0xa0] sm:$0xff]   ;;  %v5160_v22 = vld [vmem:[#allocation7 + $0x58] sm:$0xff]  }
  0xc1   : > { %1981 = vmatmul.mubr.bf16.vlgmr.msra.gmra.mxu1 %v5090_v42  ;;  %4539 = vmatpush3.bf16.msra.mxu0 %v5108_v1  ;;  %733 = vst [vmem:[#allocation2 + $0x74] sm:$0x1] %v732_v60  ;;  %v5147_v1 = vld [vmem:[#allocation7 + $0xb8] sm:$0xff]   ;;  %v5169_v39 = vld [vmem:[#allocation7 + $0x8] sm:$0xff]   ;;  %v4106_v60 = vld [vmem:[%s6126_s3] ss:$0 sm:$0xff] }
  0xc2   : > { %4513 = vmatpush3.bf16.msra.mxu1 %v5098_v41  ;;  %4540 = vmatprep.subr.bf16.mxu0 %v5111_v8  ;;  %v2156_v41 = vld [vmem:[%s5951_s17 + $0x8] sm:$0xff]  ;;  %v5149_v8 = vld [vmem:[#allocation7 + $0x30] sm:$0xff]  }
  0xc3   : > { %4514 = vmatprep.subr.bf16.mxu1 %v5101_v0  ;;  %2164 = vperm.xlu0 %5000, %v2156_v41  }
  0xc5   : > { %4541 = vmatpush3.bf16.msra.mxu0 %v5112_v14  ;;  %v5151_v14 = vld [vmem:[#allocation7 + $0xb0] sm:$0xff]  }
  0xc6   : > { %4515 = vmatpush3.bf16.msra.mxu1 %v5102_v48  ;;  %4542 = vmatprep.subr.bf16.mxu0 %v5115_v16  ;;  %v709_v40 = vld [vmem:[#allocation2 + $0x64] sm:$0x7]  ;;  %v720_v2 = vld [vmem:[#allocation2 + $0x6c] sm:$0x3]  ;;  %v5138_v48 = vld [vmem:[#allocation4 + $0x3a0] sm:$0xff]  }
  0xc7   : > { %4516 = vmatprep.subr.bf16.mxu1 %v5105_v56  ;;  %v710_v32 = vsel %vm5771_vm2, %v705_v47, %v709_v40  ;;  %v721_v4 = vsel %vm5888_vm6, %v716_v12, %v720_v2  ;;  %v5130_v45 = vld [vmem:[#allocation2 + $0x2c] ss:$60 sps:$4 sm:$0xff]   ;;  %v5134_v0 = vld [vmem:[#allocation2 + $0x34] ss:$60 sps:$4 sm:$0xff]   ;;  %v5154_v16 = vld [vmem:[#allocation7 + $0xe8] sm:$0xff]  }
  0xc8   : > { %711 = vst [vmem:[#allocation2 + $0x64] sm:$0x7] %v710_v32  ;;  %722 = vst [vmem:[#allocation2 + $0x6c] sm:$0x3] %v721_v4  ;;  %2062 = vmatprep.mubr.bf16.mxu1 %v5130_v45  ;;  %2103 = vmatprep.mubr.bf16.mxu0 %v5134_v0  ;;  %v5142_v56 = vld [vmem:[#allocation4 + $0x380] sm:$0xff]  }
  0xc9   : > { %4543 = vmatpush3.bf16.msra.mxu0 %v5116_v28  ;;  %v5143_v59 = vld [vmem:[#allocation2 + $0x38] ss:$60 sps:$4 sm:$0xff]  }
  0xca   : > { %4517 = vmatpush3.bf16.msra.mxu1 %v5106_v61  ;;  %4544 = vmatprep.subr.bf16.mxu0 %v5119_v19  ;;  %v5144_v61 = vld [vmem:[#allocation7 + $0x78] sm:$0xff]   ;;  %v5155_v28 = vld [vmem:[#allocation7 + $0xa8] sm:$0xff]   ;;  %v5157_v19 = vld [vmem:[#allocation7 + $0x20] sm:$0xff]  }
  0xcb   : > { %4518 = vmatprep.subr.bf16.mxu1 %v5109_v63  ;;  %v5146_v63 = vld [vmem:[#allocation7 + $0xf8] sm:$0xff]   ;;  %v5173_v47 = vld [vmem:[#allocation7] sm:$0xff]  }
  0xcc   : > { %v5174_v12 = vld [vmem:[#allocation7 + $0xc0] sm:$0xff]  }
  0xcd   : > { %4545 = vmatpush3.bf16.msra.mxu0 %v5120_v36  ;;  %v5167_v36 = vld [vmem:[#allocation7 + $0x90] sm:$0xff]  }
  0xce   : > { %4519 = vmatpush3.bf16.msra.mxu1 %v5110_v7  ;;  %4546 = vmatprep.subr.bf16.mxu0 %v5123_v34  ;;  %v5148_v7 = vld [vmem:[#allocation7 + $0x70] sm:$0xff]   ;;  %v5171_v34 = vld [vmem:[#allocation7 + $0x88] sm:$0xff]  }
  0xcf   : > { %4520 = vmatprep.subr.bf16.mxu1 %v5113_v10  ;;  %v5128_v42 = vld [vmem:[#allocation2 + $0x28] ss:$60 sps:$4 sm:$0xff]   ;;  %v5132_v46 = vld [vmem:[#allocation2 + $0x30] ss:$60 sps:$4 sm:$0xff]  }
  0xd0   : > { %v5150_v10 = vld [vmem:[#allocation7 + $0xf0] sm:$0xff]  }
  0xd1   : > { %4547 = vmatpush3.bf16.msra.mxu0 %v5124_v57  ;;  %v5175_v57 = vld [vmem:[#allocation7 + $0x80] sm:$0xff]  }
  0xd2   : > { %4521 = vmatpush3.bf16.msra.mxu1 %v5114_v15  ;;  %4548 = vmatprep.subr.bf16.mxu0 %v5127_v38  ;;  %v5152_v15 = vld [vmem:[#allocation7 + $0x68] sm:$0xff]   ;;  %v5184_v38 = vld [vmem:[#allocation7 + $0x1f8] sm:$0xff]  }
  0xd3   : > { %4522 = vmatprep.subr.bf16.mxu1 %v5117_v17  ;;  %v5153_v17 = vld [vmem:[#allocation7 + $0x28] sm:$0xff]  }
  0xd5   : > { %4549 = vmatpush3.bf16.msra.mxu0 %v5131_v43 }
  0xd6   : > { %4523 = vmatpush3.bf16.msra.mxu1 %v5118_v13  ;;  %4565 = vmatprep.subr.bf16.mxu0 %v5144_v61  ;;  %v5156_v13 = vld [vmem:[#allocation7 + $0x60] sm:$0xff]  }
  0xd7   : > { %4524 = vmatprep.subr.bf16.mxu1 %v5121_v30  ;;  %v5163_v30 = vld [vmem:[#allocation7 + $0x98] sm:$0xff]  }
  0xd8   : > { %2104 = vmatmul.mubr.bf16.vlgmr.msra.gmra.mxu0 %v5132_v46 }
  0xd9   : > { %4566 = vmatpush3.bf16.msra.mxu0 %v5145_v62 }
  0xda   : > { %4525 = vmatpush3.bf16.msra.mxu1 %v5122_v58  ;;  %4567 = vmatprep.subr.bf16.mxu0 %v5148_v7  ;;  %v5170_v58 = vld [vmem:[#allocation7 + $0xc8] sm:$0xff]  }
  0xdb   : > { %4526 = vmatprep.subr.bf16.mxu1 %v5125_v6  ;;  %v5172_v6 = vld [vmem:[#allocation7 + $0x40] sm:$0xff]  }
  0xdd   : > { %4568 = vmatpush3.bf16.msra.mxu0 %v5149_v8 }
  0xde   : > { %4527 = vmatpush3.bf16.msra.mxu1 %v5126_v37  ;;  %4569 = vmatprep.subr.bf16.mxu0 %v5152_v15  ;;  %v5179_v37 = vld [vmem:[#allocation7 + $0x178] sm:$0xff]  }
  0xdf   : > { %4771 = vmatprep.subr.bf16.mxu1 %v5510_v35 }
  0xe1   : > { %2063 = vmatmul.mubr.bf16.vlgmr.msra.gmra.mxu1 %v5128_v42  ;;  %4570 = vmatpush3.bf16.msra.mxu0 %v5153_v17 }
  0xe2   : > { %4772 = vmatpush3.bf16.msra.mxu1 %v5135_v5  ;;  %4787 = vmatprep.mubr.msk.bf16.mxu1 %vm5511_vm7, %v5510_v35 }
  0xe3   : > { %4773 = vmatprep.subr.bf16.mxu1 %v5510_v35  ;;  %4571 = vmatprep.subr.bf16.mxu0 %v5156_v13 }
  0xe5   : > { %4572 = vmatpush3.bf16.msra.mxu0 %v5157_v19 }
  0xe6   : > { %4774 = vmatpush3.bf16.msra.mxu1 %v5136_v9  ;;  %4573 = vmatprep.subr.bf16.mxu0 %v5160_v22 }
  0xe7   : > { %4775 = vmatprep.subr.bf16.mxu1 %v5510_v35 }
  0xe9   : > { %4574 = vmatpush3.bf16.msra.mxu0 %v5161_v25  ;;  %v3612_v25 = vld [vmem:[%s5951_s17] sm:$0xff] }
  0xea   : > { %4776 = vmatpush3.bf16.msra.mxu1 %v5137_v55  ;;  %4575 = vmatprep.subr.bf16.mxu0 %v5164_v27 }
  0xeb   : > { %4777 = vmatprep.subr.bf16.mxu1 %v5510_v35  ;;  %3616 = vperm.xlu1 %5001, %v3612_v25   ;;  %v5202_v25 = vld [vmem:[#allocation7 + $0x1e0] sm:$0xff]  }
  0xed   : > { %4576 = vmatpush3.bf16.msra.mxu0 %v5165_v11 }
  0xee   : > { %4778 = vmatpush3.bf16.msra.mxu1 %v5138_v48  ;;  %4577 = vmatprep.subr.bf16.mxu0 %v5168_v24 }
  0xef   : > { %4779 = vmatprep.subr.bf16.mxu1 %v5510_v35 }
  0xf1   : > { %4578 = vmatpush3.bf16.msra.mxu0 %v5169_v39 }
  0xf2   : > { %4780 = vmatpush3.bf16.msra.mxu1 %v5139_v50  ;;  %4579 = vmatprep.subr.bf16.mxu0 %v5172_v6 }
  0xf3   : > { %4781 = vmatprep.subr.bf16.mxu1 %v5510_v35 }
  0xf5   : > { %4580 = vmatpush3.bf16.msra.mxu0 %v5173_v47 }
  0xf6   : > { %4782 = vmatpush3.bf16.msra.mxu1 %v5140_v52  ;;  %4609 = vmatprep.subr.bf16.mxu0 %v5179_v37 }
  0xf7   : > { %4783 = vmatprep.subr.bf16.mxu1 %v5510_v35 }
  0xfa   : > { %4784 = vmatpush3.bf16.msra.mxu1 %v5141_v54 }
  0xfb   : > { %4785 = vmatprep.subr.bf16.mxu1 %v5510_v35 }
  0xfe   : > { %4786 = vmatpush3.bf16.msra.mxu1 %v5142_v56 }
  0xff   : > { %4587 = vmatprep.subr.bf16.mxu1 %v5146_v63 }
 0x101   : > { %4788 = vmatmul.mubr.bf16.vlgmr.msra.gmra.mxu1 %v5143_v59 }
 0x102   : > { %4588 = vmatpush3.bf16.msra.mxu1 %v5147_v1 }
 0x103   : > { %4589 = vmatprep.subr.bf16.mxu1 %v5150_v10 }
 0x106   : > { %4590 = vmatpush3.bf16.msra.mxu1 %v5151_v14 }
 0x107   : > { %4591 = vmatprep.subr.bf16.mxu1 %v5154_v16 }
 0x10a   : > { %4592 = vmatpush3.bf16.msra.mxu1 %v5155_v28 }
 0x10b   : > { %4593 = vmatprep.subr.bf16.mxu1 %v5158_v20 }
 0x10e   : > { %4594 = vmatpush3.bf16.msra.mxu1 %v5159_v21 }
 0x10f   : > { %4595 = vmatprep.subr.bf16.mxu1 %v5162_v26 }
 0x112   : > { %4596 = vmatpush3.bf16.msra.mxu1 %v5163_v30 }
 0x113   : > { %4597 = vmatprep.subr.bf16.mxu1 %v5166_v23 }
 0x116   : > { %4598 = vmatpush3.bf16.msra.mxu1 %v5167_v36  ;;  %v3613_v36 = vld [vmem:[%s5951_s17 + $0x8] sm:$0xff]  ;;  %s494_s17 = scalar_lea.vmem [#allocation13], %s4099_s29 }
 0x117   : > { %4599 = vmatprep.subr.bf16.mxu1 %v5170_v58  ;;  %3621 = vperm.xlu1 %5001, %v3613_v36   ;;  %v5208_v36 = vld [vmem:[#allocation7 + $0x150] sm:$0xff]   ;;  %s3961_s14 = sshll.u32 %s494_s17, 4  ;;  %s6081_s14 = int_to_ptr.vmem [resolvable:$true] %s3961_s14 }
 0x118   : > { %s5426_s25 = scalar_lea.vmem %s6081_s14, 256  ;;  %p5433_p11 = scmp.lt.s32.totalorder %s6081_s14, %s5431_s15 }
 0x119   : > { %p5427_p7 = scmp.ne.s32.totalorder %s6081_s14, %s5426_s25  ;;  %p5434_p1 = scmp.lt.s32.totalorder %s5432_s18, %s5426_s25 }
 0x11a   : > { %4600 = vmatpush3.bf16.msra.mxu1 %v5171_v34 }
 0x11b   : > { %4601 = vmatprep.subr.bf16.mxu1 %v5174_v12  ;;  %p5428_p8 = pnand %p5427_p7, %p5618_p5  ;;  %p5435_p13 = por %p5434_p1, %p5433_p11 }
 0x11d   : > { %p5429_p0 = pneg %p5428_p8 }
 0x11e   : > { %4602 = vmatpush3.bf16.msra.mxu1 %v5175_v57 }
 0x11f   : > { %4631 = vmatprep.subr.bf16.mxu1 %v5184_v38  ;;  %p5436_p2 = pnand %p5435_p13, %p5429_p0 }
 0x141   : > { %v4418_v40 = vpop.f32.mrf.mxu1 }
 0x143   : > { %v4419_v32 = vpop.f32.mrf.mxu1 }
 0x144   : > { %v4420_v18 = vadd.f32 %v4419_v32, %v4418_v40  ;;  %v2160_v40 = vpop.permute.xlu0 %2159 }
 0x145   : > { %v4421_v2 = vpop.f32.mrf.mxu1 }
 0x146   : > { %v1860_v54 = vadd.f32 %v4420_v18, %v4106_v60 }
 0x147   : > { %v4422_v49 = vpop.f32.mrf.mxu1 }
 0x148   : > { %v4423_v56 = vadd.f32 %v4422_v49, %v4421_v2 }
 0x14a   : > { %v1863_v8 = vadd.f32 %v4423_v56, %v4106_v60 }
 0x158   : > { %v4462_v43 = vpop.f32.mrf.mxu0 }
 0x15a   : > { %v4463_v44 = vpop.f32.mrf.mxu0 }
 0x15b   : > { %v4464_v62 = vadd.f32 %v4463_v44, %v4462_v43 }
 0x15c   : > { %v4465_v41 = vpop.f32.mrf.mxu0 }
 0x15e   : > { %v4466_v42 = vpop.f32.mrf.mxu0 }
 0x15f   : > { %v4467_v16 = vadd.f32 %v4466_v42, %v4465_v41  ;;  %v2165_v41 = vpop.permute.xlu0 %2164 }
 0x161   : > { %v4440_v4 = vpop.f32.mrf.mxu1 }
 0x163   : > { %v4441_v29 = vpop.f32.mrf.mxu1 }
 0x164   : > { %v4442_v50 = vadd.f32 %v4441_v29, %v4440_v4 }
 0x165   : > { %v4443_v31 = vpop.f32.mrf.mxu1 }
 0x166   : > { %v1901_v61 = vadd.f32 %v4442_v50, %v1860_v54 }
 0x167   : > { %v4444_v51 = vpop.f32.mrf.mxu1 }
 0x168   : > { %v4445_v63 = vadd.f32 %v4444_v51, %v4443_v31  ;;  %v1942_v14 = vadd.f32 %v4464_v62, %v1901_v61 }
 0x16a   : > { %v1904_v15 = vadd.f32 %v4445_v63, %v1863_v8  ;;  %v5185_v8 = vld [vmem:[#allocation7 + $0x1b8] sm:$0xff]  }
 0x16c   : > { %v1945_v21 = vadd.f32 %v4467_v16, %v1904_v15  ;;  %v5187_v15 = vld [vmem:[#allocation7 + $0x130] sm:$0xff]   ;;  %v5196_v16 = vld [vmem:[#allocation7 + $0x168] sm:$0xff]  }
 0x178   : > { %v4506_v46 = vpop.f32.mrf.mxu0 }
 0x17a   : > { %v4507_v9 = vpop.f32.mrf.mxu0 }
 0x17b   : > { %v4508_v19 = vadd.f32 %v4507_v9, %v4506_v46 }
 0x17c   : > { %v4509_v48 = vpop.f32.mrf.mxu0 }
 0x17e   : > { %v4510_v59 = vpop.f32.mrf.mxu0 }
 0x17f   : > { %v4511_v23 = vadd.f32 %v4510_v59, %v4509_v48 }
 0x181   : > { %v4484_v5 = vpop.f32.mrf.mxu1 }
 0x183   : > { %v4485_v45 = vpop.f32.mrf.mxu1 }
 0x184   : > { %v4486_v10 = vadd.f32 %v4485_v45, %v4484_v5 }
 0x185   : > { %v4487_v0 = vpop.f32.mrf.mxu1 }
 0x186   : > { %v1983_v13 = vadd.f32 %v4486_v10, %v1942_v14  ;;  %v5194_v14 = vld [vmem:[#allocation7 + $0x1f0] sm:$0xff]  }
 0x187   : > { %v4488_v55 = vpop.f32.mrf.mxu1 }
 0x188   : > { %v4489_v20 = vadd.f32 %v4488_v55, %v4487_v0  ;;  %v2024_v27 = vadd.f32 %v4508_v19, %v1983_v13  ;;  %v5198_v19 = vld [vmem:[#allocation7 + $0x1e8] sm:$0xff]  }
 0x18a   : > { %v1986_v11 = vadd.f32 %v4489_v20, %v1945_v21  ;;  %v5197_v20 = vld [vmem:[#allocation7 + $0x128] sm:$0xff]   ;;  %v5200_v21 = vld [vmem:[#allocation7 + $0x160] sm:$0xff]  }
 0x18c   : > { %v2027_v6 = vadd.f32 %v4511_v23, %v1986_v11  ;;  %v5206_v11 = vld [vmem:[#allocation7 + $0x1d8] sm:$0xff]  }
 0x18d   : > { %v5205_v23 = vld [vmem:[#allocation7 + $0x118] sm:$0xff]  }
 0x198   : > { %v4550_v7 = vpop.f32.mrf.mxu0 }
 0x19a   : > { %v4551_v28 = vpop.f32.mrf.mxu0 }
 0x19b   : > { %v4552_v39 = vadd.f32 %v4551_v28, %v4550_v7  ;;  %v5195_v28 = vld [vmem:[#allocation7 + $0x1b0] sm:$0xff]  }
 0x19c   : > { %v4553_v30 = vpop.f32.mrf.mxu0 }
 0x19e   : > { %v4554_v34 = vpop.f32.mrf.mxu0 }
 0x19f   : > { %v4555_v12 = vadd.f32 %v4554_v34, %v4553_v30  ;;  %v5204_v30 = vld [vmem:[#allocation7 + $0x158] sm:$0xff]   ;;  %v5212_v34 = vld [vmem:[#allocation7 + $0x148] sm:$0xff]  }
 0x1a1   : > { %v4528_v52 = vpop.f32.mrf.mxu1 }
 0x1a3   : > { %v4529_v1 = vpop.f32.mrf.mxu1 }
 0x1a4   : > { %v4530_v22 = vadd.f32 %v4529_v1, %v4528_v52  ;;  %v5180_v1 = vld [vmem:[#allocation7 + $0x138] sm:$0xff]  }
 0x1a5   : > { %v4531_v17 = vpop.f32.mrf.mxu1 }
 0x1a6   : > { %v2065_v24 = vadd.f32 %v4530_v22, %v2024_v27  ;;  %v5199_v22 = vld [vmem:[#allocation7 + $0x1a8] sm:$0xff]   ;;  %v5203_v27 = vld [vmem:[#allocation7 + $0x1a0] sm:$0xff]  }
 0x1a7   : > { %v4532_v26 = vpop.f32.mrf.mxu1 }
 0x1a8   : > { %v4533_v58 = vadd.f32 %v4532_v26, %v4531_v17  ;;  %v2106_v57 = vadd.f32 %v4552_v39, %v2065_v24  ;;  %v5201_v26 = vld [vmem:[#allocation7 + $0x120] sm:$0xff]   ;;  %v5207_v24 = vld [vmem:[#allocation7 + $0x198] sm:$0xff]   ;;  %v5210_v39 = vld [vmem:[#allocation7 + $0x1d0] sm:$0xff]  }
 0x1aa   : > { %v2068_v47 = vadd.f32 %v4533_v58, %v2027_v6  ;;  %v5209_v58 = vld [vmem:[#allocation7 + $0x110] sm:$0xff]  }
 0x1ab   : > { %v5211_v6 = vld [vmem:[#allocation7 + $0x190] sm:$0xff]  }
 0x1ac   : > { %v2109_v49 = vadd.f32 %v4555_v12, %v2068_v47  ;;  %v5214_v47 = vld [vmem:[#allocation7 + $0x1c8] sm:$0xff]  }
 0x1ad   : > { %v5213_v12 = vld [vmem:[#allocation7 + $0x108] sm:$0xff]  }
 0x1c1   : > { %v2146_v37 = vpop.f32.mrf.mxu1 }
 0x1c2   : > { %v2147_v38 = vadd.f32 %v2146_v37, %v2106_v57  ;;  %v5216_v57 = vld [vmem:[#allocation7 + $0x140] sm:$0xff]   ;;  %v5215_v37 = vld [vmem:[#allocation7 + $0x188] sm:$0xff]  }
 0x1c3   : > { %v4789_v32 = vpop.f32.mrf.mxu1 }
 0x1c4   : > { %v2153_v2 = vmax.f32 %v2147_v38, 0.0  ;;  %v5218_v38 = vld [vmem:[#allocation7 + $0x1c0] sm:$0xff]   ;;  %v5220_v32 = vld [vmem:[#allocation7 + $0x278] sm:$0xff]  }
 0x1c5   : > { %v2149_v4 = vpop.f32.mrf.mxu1 }
 0x1c6   : > { %v2167_v29 = vmul.f32 %v2160_v40, %v2153_v2  ;;  %v2150_v43 = vadd.f32 %v2149_v4, %v2109_v49  ;;  %v5217_v40 = vld [vmem:[#allocation7 + $0x100] sm:$0xff]   ;;  %v5225_v49 = vld [vmem:[#allocation7 + $0x2f8] sm:$0xff]  }
 0x1c7   : > { %v4790_v31 = vpop.f32.mrf.mxu1  ;;  %v5219_v2 = vld [vmem:[#allocation7 + $0x180] sm:$0xff]   ;;  %v5221_v4 = vld [vmem:[#allocation7 + $0x238] sm:$0xff]  }
 0x1c8   : > { %v4399_v44 = vpack.c.bf16 %v2167_v29, %v2167_v29  ;;  %v2154_v51 = vmax.f32 %v2150_v43, 0.0  ;;  %v5230_v43 = vld [vmem:[#allocation7 + $0x270] sm:$0xff]  }
 0x1ca   : > { %v2173_v5 = vrot.slane %v4399_v44, 5  ;;  %v2176_v42 = vrot.slane %v4399_v44, 6  ;;  %v2179_v45 = vrot.slane %v4399_v44, 7  ;;  %2205 = vst [vmem:[#allocation3 + $0x1c] sm:$0xf] %v4399_v44  ;;  %v2168_v46 = vmul.f32 %v2165_v41, %v2154_v51  ;;  %v5226_v44 = vld [vmem:[#allocation7 + $0x2b8] sm:$0xff]  }
 0x1cb   : > { %v5232_v41 = vld [vmem:[#allocation7 + $0x2f0] sm:$0xff]  }
 0x1cc   : > { %2175 = vst [vmem:[#allocation3 + $0x3c] sm:$0x8] %v2173_v5  ;;  %2178 = vst [vmem:[#allocation3 + $0x40] sm:$0xc] %v2176_v42  ;;  %v2169_v0 = vpack.c.bf16 %v2168_v46, %v2167_v29  ;;  %v4400_v9 = vpack.c.bf16 %v2168_v46, %v2168_v46  ;;  %v2185_v18 = vrot.slane %v2173_v5, 4  ;;  %v2191_v60 = vrot.slane %v2176_v42, 4 }
 0x1cd   : > { %2189 = vst [vmem:[#allocation3 + $0x10] sm:$0x8] %v2173_v5  ;;  %2195 = vst [vmem:[#allocation3 + $0x14] sm:$0xc] %v2176_v42  ;;  %v2197_v55 = vrot.slane %v2179_v45, 4  ;;  %v5231_v42 = vld [vmem:[#allocation7 + $0x230] sm:$0xff]  }
 0x1ce   : > { %2201 = vst [vmem:[#allocation3 + $0x18] sm:$0xe] %v2179_v45  ;;  %2181 = vst [vmem:[#allocation3 + $0x44] sm:$0xe] %v2179_v45  ;;  %v2186_v48 = vrot.slane %v4400_v9, 5  ;;  %v2192_v50 = vrot.slane %v4400_v9, 6 }
 0x1cf   : > { %2182 = vst [vmem:[#allocation3 + $0x48] sm:$0xf] %v2169_v0  ;;  %v2198_v52 = vrot.slane %v4400_v9, 7  ;;  %2206 = vst [vmem:[#allocation3 + $0x58] sm:$0xf] %v4400_v9  ;;  %v5234_v45 = vld [vmem:[#allocation7 + $0x268] sm:$0xff]  }
 0x1d0   : > { %2219 = vst [vmem:[#allocation3 + $0x2c] sm:$0xf] %v4400_v9  ;;  %v2187_v54 = vsel %vm5775_vm5, %v2185_v18, %v2186_v48  ;;  %v2193_v56 = vsel %vm5845_vm0, %v2191_v60, %v2192_v50  ;;  %v2207_v61 = vrot.slane %v2186_v48, 4  ;;  %v2211_v62 = vrot.slane %v2192_v50, 4  ;;  %v5233_v46 = vld [vmem:[#allocation7 + $0x2b0] sm:$0xff]   ;;  %v5236_v0 = vld [vmem:[#allocation7 + $0x2e8] sm:$0xff]  }
 0x1d1   : > { %v2199_v59 = vsel %vm5875_vm14, %v2197_v55, %v2198_v52  ;;  %2190 = vst [vmem:[#allocation3 + $0x4c] sm:$0xf] %v2187_v54  ;;  %2196 = vst [vmem:[#allocation3 + $0x50] sm:$0xf] %v2193_v56  ;;  %v2215_v63 = vrot.slane %v2198_v52, 4  ;;  %v5235_v9 = vld [vmem:[#allocation7 + $0x228] sm:$0xff]  }
 0x1d2   : > { %2202 = vst [vmem:[#allocation3 + $0x54] sm:$0xf] %v2199_v59  ;;  %2209 = vst [vmem:[#allocation3 + $0x20] sm:$0xf] %v2187_v54  ;;  %v5238_v18 = vld [vmem:[#allocation7 + $0x260] sm:$0xff]   ;;  %v5237_v60 = vld [vmem:[#allocation7 + $0x2a8] sm:$0xff]  }
 0x1d3   : > { %2213 = vst [vmem:[#allocation3 + $0x24] sm:$0xf] %v2193_v56  ;;  %2217 = vst [vmem:[#allocation3 + $0x28] sm:$0xf] %v2199_v59  ;;  %v5176_v33 = vld [vmem:[#allocation3] ss:$60 sps:$4 sm:$0xff]  }
 0x1d4   : > { %2210 = vst [vmem:[#allocation3 + $0x5c] sm:$0x7] %v2207_v61  ;;  %2220 = vst [vmem:[#allocation3 + $0x30] sm:$0x7] %v2207_v61  ;;  %v5178_v7 = vld [vmem:[#allocation3 + $0x4] ss:$60 sps:$4 sm:$0xff]  }
 0x1d5   : > { %2214 = vst [vmem:[#allocation3 + $0x60] sm:$0x3] %v2211_v62  ;;  %2218 = vst [vmem:[#allocation3 + $0x64] sm:$0x1] %v2215_v63  ;;  %3314 = vmatprep.mubr.bf16.mxu0 %v5178_v7  ;;  %v5181_v3 = vld [vmem:[#allocation3 + $0x8] ss:$60 sps:$4 sm:$0xff]  }
 0x1d6   : > { %2221 = vst [vmem:[#allocation3 + $0x34] sm:$0x3] %v2211_v62  ;;  %2222 = vst [vmem:[#allocation3 + $0x38] sm:$0x1] %v2215_v63  ;;  %v5183_v10 = vld [vmem:[#allocation3 + $0xc] ss:$60 sps:$4 sm:$0xff]   ;;  %3315 = vmatmul.mubr.bf16.vlgmr.msra.gmra.mxu0 %v5176_v33 }
 0x1d7   : > { %4610 = vmatpush3.bf16.msra.mxu0 %v5180_v1  ;;  %3355 = vmatprep.mubr.bf16.mxu1 %v5183_v10  ;;  %v5193_v13 = vld [vmem:[#allocation3 + $0x1c] ss:$60 sps:$4 sm:$0xff]   ;;  %v5229_v5 = vld [vmem:[#allocation3 + $0x2c] ss:$60 sps:$4 sm:$0xff]   ;;  %v5242_v50 = vld [vmem:[#allocation7 + $0x258] sm:$0xff]  }
 0x1d8   : > { %3356 = vmatmul.mubr.bf16.vlgmr.msra.gmra.mxu1 %v5181_v3  ;;  %4611 = vmatprep.subr.bf16.mxu0 %v5186_v53  ;;  %v5190_v17 = vld [vmem:[#allocation3 + $0x14] ss:$60 sps:$4 sm:$0xff]   ;;  %v5240_v55 = vld [vmem:[#allocation7 + $0x2e0] sm:$0xff]   ;;  %v5246_v59 = vld [vmem:[#allocation7 + $0x250] sm:$0xff]  }
 0x1d9   : > { %4632 = vmatpush3.bf16.msra.mxu1 %v5185_v8  ;;  %3396 = vmatprep.mubr.bf16.mxu0 %v5190_v17  ;;  %v5188_v29 = vld [vmem:[#allocation3 + $0x10] ss:$60 sps:$4 sm:$0xff]   ;;  %v5191_v51 = vld [vmem:[#allocation3 + $0x18] ss:$60 sps:$4 sm:$0xff]   ;;  %v5250_v1 = vld [vmem:[#allocation7 + $0x248] sm:$0xff]  }
 0x1da   : > { %4633 = vmatprep.subr.bf16.mxu1 %v5194_v14  ;;  %3437 = vmatprep.mubr.bf16.mxu1 %v5193_v13  ;;  %v5239_v48 = vld [vmem:[#allocation7 + $0x220] sm:$0xff]   ;;  %v5244_v54 = vld [vmem:[#allocation7 + $0x2d8] sm:$0xff]   ;;  %v5248_v62 = vld [vmem:[#allocation7 + $0x2d0] sm:$0xff]  }
 0x1db   : > { %4612 = vmatpush3.bf16.msra.mxu0 %v5187_v15  ;;  %v5241_v52 = vld [vmem:[#allocation7 + $0x2a0] sm:$0xff]   ;;  %v5243_v56 = vld [vmem:[#allocation7 + $0x218] sm:$0xff]   ;;  %v5247_v63 = vld [vmem:[#allocation7 + $0x210] sm:$0xff]  }
 0x1dc   : > { %4613 = vmatprep.subr.bf16.mxu0 %v5196_v16  ;;  %v5224_v31 = vld [vmem:[#allocation3 + $0x24] ss:$60 sps:$4 sm:$0xff]   ;;  %v5245_v61 = vld [vmem:[#allocation7 + $0x298] sm:$0xff]   ;;  %v5249_v33 = vld [vmem:[#allocation7 + $0x290] sm:$0xff]  }
 0x1dd   : > { %4634 = vmatpush3.bf16.msra.mxu1 %v5195_v28  ;;  %v5252_v7 = vld [vmem:[#allocation7 + $0x2c8] sm:$0xff]   ;;  %v5254_v53 = vld [vmem:[#allocation7 + $0x240] sm:$0xff]   ;;  %v5258_v15 = vld [vmem:[#allocation7 + $0x378] sm:$0xff]  }
 0x1de   : > { %4635 = vmatprep.subr.bf16.mxu1 %v5198_v19  ;;  %v5251_v8 = vld [vmem:[#allocation7 + $0x208] sm:$0xff]   ;;  %v5256_v10 = vld [vmem:[#allocation7 + $0x2c0] sm:$0xff]   ;;  %v5992_v17 = vld [vmem:[#allocation3 + $0x30] sm:$0xff] }
 0x1df   : > { %4614 = vmatpush3.bf16.msra.mxu0 %v5197_v20  ;;  %v5253_v3 = vld [vmem:[#allocation7 + $0x288] sm:$0xff]   ;;  %v5255_v14 = vld [vmem:[#allocation7 + $0x200] sm:$0xff]   ;;  %v5259_v28 = vld [vmem:[#allocation7 + $0x338] sm:$0xff]  }
 0x1e0   : > { %4615 = vmatprep.subr.bf16.mxu0 %v5200_v21  ;;  %v5257_v16 = vld [vmem:[#allocation7 + $0x280] sm:$0xff]   ;;  %v5261_v19 = vld [vmem:[#allocation7 + $0x370] sm:$0xff]  }
 0x1e1   : > { %4636 = vmatpush3.bf16.msra.mxu1 %v5199_v22  ;;  %v5222_v13 = vld [vmem:[#allocation3 + $0x20] ss:$60 sps:$4 sm:$0xff]   ;;  %v5295_v20 = vld [vmem:[#allocation3 + $0x6c] sm:$0xff] }
 0x1e2   : > { %4637 = vmatprep.subr.bf16.mxu1 %v5202_v25  ;;  %v4258_v21 = vcombine.high %v5992_v17, %v5295_v20  ;;  %v5260_v22 = vld [vmem:[#allocation7 + $0x3b8] sm:$0xff]   ;;  %v5227_v25 = vld [vmem:[#allocation3 + $0x28] ss:$60 sps:$4 sm:$0xff]  }
 0x1e3   : > { %4616 = vmatpush3.bf16.msra.mxu0 %v5201_v26  ;;  %v5262_v26 = vld [vmem:[#allocation7 + $0x330] sm:$0xff]  }
 0x1e4   : > { %4617 = vmatprep.subr.bf16.mxu0 %v5204_v30  ;;  %v5264_v30 = vld [vmem:[#allocation7 + $0x368] sm:$0xff]  }
 0x1e5   : > { %4638 = vmatpush3.bf16.msra.mxu1 %v5203_v27  ;;  %v5263_v27 = vld [vmem:[#allocation7 + $0x3b0] sm:$0xff]  }
 0x1e6   : > { %4639 = vmatprep.subr.bf16.mxu1 %v5206_v11  ;;  %v5265_v11 = vld [vmem:[#allocation7 + $0x328] sm:$0xff]  }
 0x1e7   : > { %4618 = vmatpush3.bf16.msra.mxu0 %v5205_v23  ;;  %v5267_v23 = vld [vmem:[#allocation7 + $0x360] sm:$0xff]  }
 0x1e8   : > { %4619 = vmatprep.subr.bf16.mxu0 %v5208_v36  ;;  %v5266_v36 = vld [vmem:[#allocation7 + $0x3a8] sm:$0xff]  }
 0x1e9   : > { %4640 = vmatpush3.bf16.msra.mxu1 %v5207_v24  ;;  %v5268_v24 = vld [vmem:[#allocation7 + $0x320] sm:$0xff]  }
 0x1ea   : > { %4641 = vmatprep.subr.bf16.mxu1 %v5210_v39  ;;  %v5270_v39 = vld [vmem:[#allocation7 + $0x358] sm:$0xff]  }
 0x1eb   : > { %4620 = vmatpush3.bf16.msra.mxu0 %v5209_v58  ;;  %v5269_v58 = vld [vmem:[#allocation7 + $0x3a0] sm:$0xff]  }
 0x1ec   : > { %4621 = vmatprep.subr.bf16.mxu0 %v5212_v34  ;;  %v5271_v34 = vld [vmem:[#allocation7 + $0x318] sm:$0xff]  }
 0x1ed   : > { %4642 = vmatpush3.bf16.msra.mxu1 %v5211_v6  ;;  %v5273_v6 = vld [vmem:[#allocation7 + $0x350] sm:$0xff]  }
 0x1ee   : > { %4643 = vmatprep.subr.bf16.mxu1 %v5214_v47  ;;  %v5272_v47 = vld [vmem:[#allocation7 + $0x398] sm:$0xff]  }
 0x1ef   : > { %4622 = vmatpush3.bf16.msra.mxu0 %v5213_v12  ;;  %v5274_v12 = vld [vmem:[#allocation7 + $0x310] sm:$0xff]  }
 0x1f0   : > { %4623 = vmatprep.subr.bf16.mxu0 %v5216_v57  ;;  %v5276_v57 = vld [vmem:[#allocation7 + $0x348] sm:$0xff]  }
 0x1f1   : > { %4644 = vmatpush3.bf16.msra.mxu1 %v5215_v37  ;;  %v5275_v37 = vld [vmem:[#allocation7 + $0x390] sm:$0xff]  }
 0x1f2   : > { %4645 = vmatprep.subr.bf16.mxu1 %v5218_v38  ;;  %v5277_v38 = vld [vmem:[#allocation7 + $0x308] sm:$0xff]  }
 0x1f3   : > { %4624 = vmatpush3.bf16.msra.mxu0 %v5217_v40  ;;  %v5279_v40 = vld [vmem:[#allocation7 + $0x340] sm:$0xff]  }
 0x1f4   : > { %4653 = vmatprep.subr.bf16.mxu0 %v5220_v32  ;;  %v5278_v32 = vld [vmem:[#allocation7 + $0x388] sm:$0xff]  }
 0x1f5   : > { %4646 = vmatpush3.bf16.msra.mxu1 %v5219_v2  ;;  %v5280_v2 = vld [vmem:[#allocation7 + $0x300] sm:$0xff]  }
 0x1f6   : > { %3397 = vmatmul.mubr.bf16.vlgmr.msra.gmra.mxu0 %v5188_v29  ;;  %4675 = vmatprep.subr.bf16.mxu1 %v5225_v49  ;;  %v5281_v49 = vld [vmem:[#allocation7 + $0x380] sm:$0xff]  }
 0x1f7   : > { %4654 = vmatpush3.bf16.msra.mxu0 %v5221_v4  ;;  %3478 = vmatprep.mubr.bf16.mxu0 %v5224_v31  ;;  %v4257_v4 = vcombine.low %v5992_v17, %v5295_v20  ;;  %v5282_v29 = vld [vmem:[#allocation3 + $0x38] ss:$60 sps:$4 sm:$0xff]   ;;  %v3651_v31 = vld [vmem:[#allocation9 + $0x70] sm:$0xff] }
 0x1f8   : > { %3438 = vmatmul.mubr.bf16.vlgmr.msra.gmra.mxu1 %v5191_v51  ;;  %4655 = vmatprep.subr.bf16.mxu0 %v5230_v43  ;;  %v3652_v43 = vld [vmem:[#allocation9 + $0x78] sm:$0xff]  ;;  %v3649_v51 = vld [vmem:[#allocation9 + $0x60] sm:$0xff] }
 0x1f9   : > { %4676 = vmatpush3.bf16.msra.mxu1 %v5226_v44  ;;  %3519 = vmatprep.mubr.bf16.mxu1 %v5229_v5  ;;  %v3650_v44 = vld [vmem:[#allocation9 + $0x68] sm:$0xff]  ;;  %v3647_v5 = vld [vmem:[#allocation9 + $0x50] sm:$0xff] }
 0x1fa   : > { %4677 = vmatprep.subr.bf16.mxu1 %v5232_v41  ;;  %v3648_v41 = vld [vmem:[#allocation9 + $0x58] sm:$0xff] }
 0x1fb   : > { %4656 = vmatpush3.bf16.msra.mxu0 %v5231_v42  ;;  %v3646_v42 = vld [vmem:[#allocation9 + $0x48] sm:$0xff] }
 0x1fc   : > { %4657 = vmatprep.subr.bf16.mxu0 %v5234_v45  ;;  %v3645_v45 = vld [vmem:[#allocation9 + $0x40] sm:$0xff] }
 0x1fd   : > { %4678 = vmatpush3.bf16.msra.mxu1 %v5233_v46  ;;  %v3644_v46 = vld [vmem:[#allocation9 + $0x38] sm:$0xff] }
 0x1fe   : > { %4679 = vmatprep.subr.bf16.mxu1 %v5236_v0  ;;  %v3643_v0 = vld [vmem:[#allocation9 + $0x30] sm:$0xff] }
 0x1ff   : > { %4658 = vmatpush3.bf16.msra.mxu0 %v5235_v9  ;;  %v3642_v9 = vld [vmem:[#allocation9 + $0x28] sm:$0xff] }
 0x200   : > { %4659 = vmatprep.subr.bf16.mxu0 %v5238_v18  ;;  %v3641_v18 = vld [vmem:[#allocation9 + $0x20] sm:$0xff] }
 0x201   : > { %4680 = vmatpush3.bf16.msra.mxu1 %v5237_v60  ;;  %v3640_v60 = vld [vmem:[#allocation9 + $0x18] sm:$0xff] }
 0x202   : > { %4681 = vmatprep.subr.bf16.mxu1 %v5240_v55  ;;  %v3639_v55 = vld [vmem:[#allocation9 + $0x10] sm:$0xff] }
 0x203   : > { %4660 = vmatpush3.bf16.msra.mxu0 %v5239_v48  ;;  %v3638_v48 = vld [vmem:[#allocation9 + $0x8] sm:$0xff] }
 0x204   : > { %4661 = vmatprep.subr.bf16.mxu0 %v5242_v50  ;;  %v3637_v50 = vld [vmem:[#allocation9] sm:$0xff] }
 0x205   : > { %4682 = vmatpush3.bf16.msra.mxu1 %v5241_v52  ;;  %v3740_v52 = vld [vmem:[#allocation10 + $0x78] sm:$0xff] }
 0x206   : > { %4683 = vmatprep.subr.bf16.mxu1 %v5244_v54  ;;  %v3739_v54 = vld [vmem:[#allocation10 + $0x70] sm:$0xff] }
 0x207   : > { %4662 = vmatpush3.bf16.msra.mxu0 %v5243_v56  ;;  %v3738_v56 = vld [vmem:[#allocation10 + $0x68] sm:$0xff] }
 0x208   : > { %4663 = vmatprep.subr.bf16.mxu0 %v5246_v59  ;;  %v3737_v59 = vld [vmem:[#allocation10 + $0x60] sm:$0xff] }
 0x209   : > { %4684 = vmatpush3.bf16.msra.mxu1 %v5245_v61  ;;  %v3736_v61 = vld [vmem:[#allocation10 + $0x58] sm:$0xff] }
 0x20a   : > { %4685 = vmatprep.subr.bf16.mxu1 %v5248_v62  ;;  %v3735_v62 = vld [vmem:[#allocation10 + $0x50] sm:$0xff] }
 0x20b   : > { %4664 = vmatpush3.bf16.msra.mxu0 %v5247_v63  ;;  %v3734_v63 = vld [vmem:[#allocation10 + $0x48] sm:$0xff] }
 0x20c   : > { %4665 = vmatprep.subr.bf16.mxu0 %v5250_v1  ;;  %v3733_v1 = vld [vmem:[#allocation10 + $0x40] sm:$0xff] }
 0x20d   : > { %4686 = vmatpush3.bf16.msra.mxu1 %v5249_v33  ;;  %v3732_v33 = vld [vmem:[#allocation10 + $0x38] sm:$0xff] }
 0x20e   : > { %4687 = vmatprep.subr.bf16.mxu1 %v5252_v7  ;;  %v3731_v7 = vld [vmem:[#allocation10 + $0x30] sm:$0xff] }
 0x20f   : > { %4666 = vmatpush3.bf16.msra.mxu0 %v5251_v8  ;;  %v3730_v8 = vld [vmem:[#allocation10 + $0x28] sm:$0xff] }
 0x210   : > { %4667 = vmatprep.subr.bf16.mxu0 %v5254_v53  ;;  %v3729_v53 = vld [vmem:[#allocation10 + $0x20] sm:$0xff] }
 0x211   : > { %4688 = vmatpush3.bf16.msra.mxu1 %v5253_v3  ;;  %v3728_v3 = vld [vmem:[#allocation10 + $0x18] sm:$0xff] }
 0x212   : > { %4689 = vmatprep.subr.bf16.mxu1 %v5256_v10 }
 0x213   : > { %4668 = vmatpush3.bf16.msra.mxu0 %v5255_v14 }
 0x214   : > { %4697 = vmatprep.subr.bf16.mxu0 %v5258_v15 }
 0x215   : > { %4690 = vmatpush3.bf16.msra.mxu1 %v5257_v16 }
 0x216   : > { %3479 = vmatmul.mubr.bf16.vlgmr.msra.gmra.mxu0 %v5222_v13  ;;  %4791 = vmatprep.subr.bf16.mxu1 %v5510_v35 }
 0x217   : > { %4698 = vmatpush3.bf16.msra.mxu0 %v5259_v28  ;;  %3560 = vmatprep.mubr.bf16.mxu0 %v4258_v21 }
 0x218   : > { %3520 = vmatmul.mubr.bf16.vlgmr.msra.gmra.mxu1 %v5227_v25  ;;  %4699 = vmatprep.subr.bf16.mxu0 %v5261_v19 }
 0x219   : > { %4792 = vmatpush3.bf16.msra.mxu1 %v5260_v22  ;;  %4807 = vmatprep.mubr.msk.bf16.mxu1 %vm5511_vm7, %v5510_v35 }
 0x21a   : > { %4793 = vmatprep.subr.bf16.mxu1 %v5510_v35 }
 0x21b   : > { %4700 = vmatpush3.bf16.msra.mxu0 %v5262_v26 }
 0x21c   : > { %4701 = vmatprep.subr.bf16.mxu0 %v5264_v30 }
 0x21d   : > { %4794 = vmatpush3.bf16.msra.mxu1 %v5263_v27 }
 0x21e   : > { %4795 = vmatprep.subr.bf16.mxu1 %v5510_v35 }
 0x21f   : > { %4702 = vmatpush3.bf16.msra.mxu0 %v5265_v11 }
 0x220   : > { %4703 = vmatprep.subr.bf16.mxu0 %v5267_v23  ;;  %v4244_v23 = vld [vmem:[%s6128_s5] ss:$0 sm:$0xff] }
 0x221   : > { %4796 = vmatpush3.bf16.msra.mxu1 %v5266_v36 }
 0x222   : > { %4797 = vmatprep.subr.bf16.mxu1 %v5510_v35 }
 0x223   : > { %4704 = vmatpush3.bf16.msra.mxu0 %v5268_v24 }
 0x224   : > { %4705 = vmatprep.subr.bf16.mxu0 %v5270_v39 }
 0x225   : > { %4798 = vmatpush3.bf16.msra.mxu1 %v5269_v58 }
 0x226   : > { %4799 = vmatprep.subr.bf16.mxu1 %v5510_v35 }
 0x227   : > { %4706 = vmatpush3.bf16.msra.mxu0 %v5271_v34 }
 0x228   : > { %4707 = vmatprep.subr.bf16.mxu0 %v5273_v6 }
 0x229   : > { %4800 = vmatpush3.bf16.msra.mxu1 %v5272_v47 }
 0x22a   : > { %4801 = vmatprep.subr.bf16.mxu1 %v5510_v35 }
 0x22b   : > { %4708 = vmatpush3.bf16.msra.mxu0 %v5274_v12 }
 0x22c   : > { %4709 = vmatprep.subr.bf16.mxu0 %v5276_v57 }
 0x22d   : > { %4802 = vmatpush3.bf16.msra.mxu1 %v5275_v37 }
 0x22e   : > { %4803 = vmatprep.subr.bf16.mxu1 %v5510_v35 }
 0x22f   : > { %4710 = vmatpush3.bf16.msra.mxu0 %v5277_v38 }
 0x230   : > { %4711 = vmatprep.subr.bf16.mxu0 %v5279_v40 }
 0x231   : > { %4804 = vmatpush3.bf16.msra.mxu1 %v5278_v32 }
 0x232   : > { %4805 = vmatprep.subr.bf16.mxu1 %v5510_v35 }
 0x233   : > { %4712 = vmatpush3.bf16.msra.mxu0 %v5280_v2 }
 0x234   : > { %4811 = vmatprep.subr.mxu0 %v5510_v35 }
 0x235   : > { %4806 = vmatpush3.bf16.msra.mxu1 %v5281_v49 }
 0x236   : > { %3561 = vmatmul.mubr.bf16.vlgmr.msra.gmra.mxu0 %v4257_v4  ;;  %4846 = vmatprep.subr.mxu1 %v5510_v35 }
 0x237   : > { %4843 = vmatprep.mubr.msk.f32.mxu0 %vm5511_vm7, %v5510_v35  ;;  %4812 = vmatpush3.msra.mxu0 %v3652_v43 }
 0x238   : > { %4808 = vmatmul.mubr.bf16.vlgmr.msra.gmra.mxu1 %v5282_v29  ;;  %4813 = vmatprep.subr.mxu0 %v5510_v35 }
 0x239   : > { %4878 = vmatprep.mubr.msk.f32.mxu1 %vm5511_vm7, %v5510_v35  ;;  %4814 = vmatpush3.msra.mxu0 %v3651_v31 }
 0x23a   : > { %4815 = vmatprep.subr.mxu0 %v5510_v35  ;;  %4847 = vmatpush3.msra.mxu1 %v3740_v52 }
 0x23b   : > { %4816 = vmatpush3.msra.mxu0 %v3650_v44  ;;  %4848 = vmatprep.subr.mxu1 %v5510_v35 }
 0x23c   : > { %4817 = vmatprep.subr.mxu0 %v5510_v35  ;;  %4849 = vmatpush3.msra.mxu1 %v3739_v54 }
 0x23d   : > { %4818 = vmatpush3.msra.mxu0 %v3649_v51  ;;  %4850 = vmatprep.subr.mxu1 %v5510_v35 }
 0x23e   : > { %4819 = vmatprep.subr.mxu0 %v5510_v35  ;;  %4851 = vmatpush3.msra.mxu1 %v3738_v56 }
 0x23f   : > { %4820 = vmatpush3.msra.mxu0 %v3648_v41  ;;  %4852 = vmatprep.subr.mxu1 %v5510_v35 }
 0x240   : > { %4821 = vmatprep.subr.mxu0 %v5510_v35  ;;  %4853 = vmatpush3.msra.mxu1 %v3737_v59 }
 0x241   : > { %4822 = vmatpush3.msra.mxu0 %v3647_v5  ;;  %4854 = vmatprep.subr.mxu1 %v5510_v35 }
 0x242   : > { %4823 = vmatprep.subr.mxu0 %v5510_v35  ;;  %4855 = vmatpush3.msra.mxu1 %v3736_v61 }
 0x243   : > { %4824 = vmatpush3.msra.mxu0 %v3646_v42  ;;  %4856 = vmatprep.subr.mxu1 %v5510_v35 }
 0x244   : > { %4825 = vmatprep.subr.mxu0 %v5510_v35  ;;  %4857 = vmatpush3.msra.mxu1 %v3735_v62 }
 0x245   : > { %4826 = vmatpush3.msra.mxu0 %v3645_v45  ;;  %4858 = vmatprep.subr.mxu1 %v5510_v35 }
 0x246   : > { %4827 = vmatprep.subr.mxu0 %v5510_v35  ;;  %4859 = vmatpush3.msra.mxu1 %v3734_v63 }
 0x247   : > { %4828 = vmatpush3.msra.mxu0 %v3644_v46  ;;  %4860 = vmatprep.subr.mxu1 %v5510_v35 }
 0x248   : > { %4829 = vmatprep.subr.mxu0 %v5510_v35  ;;  %4861 = vmatpush3.msra.mxu1 %v3733_v1 }
 0x249   : > { %4830 = vmatpush3.msra.mxu0 %v3643_v0  ;;  %4862 = vmatprep.subr.mxu1 %v5510_v35 }
 0x24a   : > { %4831 = vmatprep.subr.mxu0 %v5510_v35  ;;  %4863 = vmatpush3.msra.mxu1 %v3732_v33 }
 0x24b   : > { %4832 = vmatpush3.msra.mxu0 %v3642_v9  ;;  %4864 = vmatprep.subr.mxu1 %v5510_v35 }
 0x24c   : > { %4833 = vmatprep.subr.mxu0 %v5510_v35  ;;  %4865 = vmatpush3.msra.mxu1 %v3731_v7 }
 0x24d   : > { %4834 = vmatpush3.msra.mxu0 %v3641_v18  ;;  %4866 = vmatprep.subr.mxu1 %v5510_v35 }
 0x24e   : > { %4835 = vmatprep.subr.mxu0 %v5510_v35  ;;  %4867 = vmatpush3.msra.mxu1 %v3730_v8  ;;  %v3617_v8 = vpop.permute.xlu1 %3616 }
 0x24f   : > { %4836 = vmatpush3.msra.mxu0 %v3640_v60  ;;  %4868 = vmatprep.subr.mxu1 %v5510_v35 }
 0x250   : > { %4837 = vmatprep.subr.mxu0 %v5510_v35  ;;  %4869 = vmatpush3.msra.mxu1 %v3729_v53 }
 0x251   : > { %4838 = vmatpush3.msra.mxu0 %v3639_v55  ;;  %4870 = vmatprep.subr.mxu1 %v5510_v35 }
 0x252   : > { %4839 = vmatprep.subr.mxu0 %v5510_v35  ;;  %4871 = vmatpush3.msra.mxu1 %v3728_v3 }
 0x253   : > { %4840 = vmatpush3.msra.mxu0 %v3638_v48  ;;  %4872 = vmatprep.subr.mxu1 %v5510_v35 }
 0x254   : > { %4841 = vmatprep.subr.mxu0 %v5510_v35 }
 0x255   : > { %4842 = vmatpush3.msra.mxu0 %v3637_v50 }
 0x256   : > { %4881 = vmatprep.subr.bf16.mxu0 %v5510_v35 }
 0x296   : > { %v4581_v10 = vpop.f32.mrf.mxu0 }
 0x298   : > { %v4582_v14 = vpop.f32.mrf.mxu0  ;;  %v4603_v15 = vpop.f32.mrf.mxu1 }
 0x299   : > { %v4583_v11 = vadd.f32 %v4582_v14, %v4581_v10 }
 0x29a   : > { %v4584_v16 = vpop.f32.mrf.mxu0  ;;  %v4604_v17 = vpop.f32.mrf.mxu1 }
 0x29b   : > { %v3317_v39 = vadd.f32 %v4583_v11, %v4244_v23  ;;  %v4605_v58 = vadd.f32 %v4604_v17, %v4603_v15  ;;  %v3727_v11 = vld [vmem:[#allocation10 + $0x10] sm:$0xff] }
 0x29c   : > { %v4585_v28 = vpop.f32.mrf.mxu0  ;;  %v4606_v13 = vpop.f32.mrf.mxu1  ;;  %4873 = vmatpush3.msra.mxu1 %v3727_v11 }
 0x29d   : > { %v4586_v34 = vadd.f32 %v4585_v28, %v4584_v16  ;;  %v3358_v57 = vadd.f32 %v4605_v58, %v3317_v39  ;;  %v3622_v16 = vpop.permute.xlu1 %3621  ;;  %4874 = vmatprep.subr.mxu1 %v5510_v35  ;;  %v5285_v39 = vld [vmem:[#allocation12 + $0x28] sm:$0xff]   ;;  %v5286_v58 = vld [vmem:[#allocation12 + $0x20] sm:$0xff]  }
 0x29e   : > { %v4607_v20 = vpop.f32.mrf.mxu1 }
 0x29f   : > { %v3320_v37 = vadd.f32 %v4586_v34, %v4244_v23  ;;  %v4608_v38 = vadd.f32 %v4607_v20, %v4606_v13  ;;  %v3726_v23 = vld [vmem:[#allocation10 + $0x8] sm:$0xff]  ;;  %v5287_v34 = vld [vmem:[#allocation12 + $0x18] sm:$0xff]  }
 0x2a0   : > { %4875 = vmatpush3.msra.mxu1 %v3726_v23 }
 0x2a1   : > { %v3361_v29 = vadd.f32 %v4608_v38, %v3320_v37  ;;  %4876 = vmatprep.subr.mxu1 %v5510_v35  ;;  %v3836_v37 = vld [vmem:[%s5746_s16 + $0x8] sm:$0xff] }
 0x2b6   : > { %v4625_v19 = vpop.f32.mrf.mxu0 }
 0x2b8   : > { %v4626_v21 = vpop.f32.mrf.mxu0  ;;  %v4647_v22 = vpop.f32.mrf.mxu1 }
 0x2b9   : > { %v4627_v12 = vadd.f32 %v4626_v21, %v4625_v19 }
 0x2ba   : > { %v4628_v25 = vpop.f32.mrf.mxu0  ;;  %v4648_v26 = vpop.f32.mrf.mxu1 }
 0x2bb   : > { %v3399_v2 = vadd.f32 %v4627_v12, %v3358_v57  ;;  %v4649_v49 = vadd.f32 %v4648_v26, %v4647_v22  ;;  %v5290_v12 = vld [vmem:[#allocation12] sm:$0xff]   ;;  %v3835_v57 = vld [vmem:[%s5746_s16] sm:$0xff] }
 0x2bc   : > { %v4629_v30 = vpop.f32.mrf.mxu0  ;;  %v4650_v27 = vpop.f32.mrf.mxu1  ;;  %v3837_v38 = vpack.c.bf16 %v3836_v37, %v3835_v57 }
 0x2bd   : > { %v4630_v4 = vadd.f32 %v4629_v30, %v4628_v25  ;;  %v3440_v51 = vadd.f32 %v4649_v49, %v3399_v2 }
 0x2be   : > { %v4651_v24 = vpop.f32.mrf.mxu1 }
 0x2bf   : > { %v3402_v41 = vadd.f32 %v4630_v4, %v3361_v29  ;;  %v4652_v5 = vadd.f32 %v4651_v24, %v4650_v27  ;;  %v5283_v27 = vld [vmem:[#allocation12 + $0x38] sm:$0xff]   ;;  %v3725_v24 = vld [vmem:[#allocation10] sm:$0xff] }
 0x2c0   : > { %4877 = vmatpush3.msra.mxu1 %v3725_v24 }
 0x2c1   : > { %v3443_v18 = vadd.f32 %v4652_v5, %v3402_v41 }
 0x2d6   : > { %v4669_v36 = vpop.f32.mrf.mxu0 }
 0x2d8   : > { %v4670_v6 = vpop.f32.mrf.mxu0  ;;  %v4691_v47 = vpop.f32.mrf.mxu1 }
 0x2d9   : > { %v4671_v43 = vadd.f32 %v4670_v6, %v4669_v36  ;;  %v5284_v36 = vld [vmem:[#allocation12 + $0x30] sm:$0xff]  }
 0x2da   : > { %v4672_v40 = vpop.f32.mrf.mxu0  ;;  %v4692_v32 = vpop.f32.mrf.mxu1  ;;  %v5288_v6 = vld [vmem:[#allocation12 + $0x10] sm:$0xff]  }
 0x2db   : > { %v3481_v42 = vadd.f32 %v4671_v43, %v3440_v51  ;;  %v4693_v45 = vadd.f32 %v4692_v32, %v4691_v47  ;;  %v5289_v47 = vld [vmem:[#allocation12 + $0x8] sm:$0xff]  }
 0x2dc   : > { %v4673_v31 = vpop.f32.mrf.mxu0  ;;  %v4694_v44 = vpop.f32.mrf.mxu1 }
 0x2dd   : > { %v4674_v46 = vadd.f32 %v4673_v31, %v4672_v40  ;;  %v3522_v48 = vadd.f32 %v4693_v45, %v3481_v42  ;;  %v3653_v40 = vld [vmem:[%s6130_s7] sm:$0x1] }
 0x2de   : > { %v4695_v0 = vpop.f32.mrf.mxu1 }
 0x2df   : > { %v3484_v50 = vadd.f32 %v4674_v46, %v3443_v18  ;;  %v4696_v52 = vadd.f32 %v4695_v0, %v4694_v44  ;;  %v3935_v0 = vlaneseq }
 0x2e1   : > { %v3525_v1 = vadd.f32 %v4696_v52, %v3484_v50 }
 0x2f6   : > { %v4713_v9 = vpop.f32.mrf.mxu0 }
 0x2f8   : > { %v4714_v60 = vpop.f32.mrf.mxu0  ;;  %v3603_v55 = vpop.f32.mrf.mxu1 }
 0x2f9   : > { %v4715_v54 = vadd.f32 %v4714_v60, %v4713_v9  ;;  %v3936_v9 = vshrl.u32 %v3935_v0, 7 }
 0x2fa   : > { %v4716_v56 = vpop.f32.mrf.mxu0  ;;  %v4809_v59 = vpop.f32.mrf.mxu1 }
 0x2fb   : > { %v3563_v61 = vadd.f32 %v4715_v54, %v3522_v48  ;;  %v3937_v18 = vsub.s32 0, %v3936_v9 }
 0x2fc   : > { %v4717_v62 = vpop.f32.mrf.mxu0  ;;  %v3606_v63 = vpop.f32.mrf.mxu1 }
 0x2fd   : > { %v3604_v33 = vadd.f32 %v3603_v55, %v3563_v61  ;;  %v4718_v7 = vadd.f32 %v4717_v62, %v4716_v56  ;;  %v4381_v55 = vld [vmem:[%s6134_s11] ss:$0 sm:$0xff] }
 0x2fe   : > { %v4810_v53 = vpop.f32.mrf.mxu1 }
 0x2ff   : > { %v3566_v3 = vadd.f32 %v4718_v7, %v3525_v1  ;;  %v3610_v10 = vmax.f32 %v3604_v33, 0.0 }
 0x301   : > { %v3607_v14 = vadd.f32 %v3606_v63, %v3566_v3  ;;  %v6044_v17 = vmul.f32 %v3617_v8, %v3610_v10 }
 0x303   : > { %v3611_v15 = vmax.f32 %v3607_v14, 0.0 }
 0x305   : > { %v6046_v28 = vmul.f32 %v3622_v16, %v3611_v15 }
 0x307   : > { %v3626_v13 = vadd.f32 %v6046_v28, %v6044_v17 }
 0x309   : > { %v3627_v19 = vrot.slane %v3626_v13, 4 }
 0x30b   : > { %v3628_v20 = vadd.f32 %v3627_v19, %v3626_v13 }
 0x30d   : > { %v3629_v21 = vrot.slane %v3628_v20, 2 }
 0x30f   : > { %v3630_v22 = vadd.f32 %v3629_v21, %v3628_v20 }
 0x311   : > { %v3631_v25 = vrot.slane %v3630_v22, 1 }
 0x313   : > { %v3632_v26 = vadd.f32 %v3631_v25, %v3630_v22 }
 0x315   : > { %v3636_v30 = vmul.f32 0.0625, %v3632_v26 }
 0x317   : > { %4844 = vmatmul.mubr.f32.vlgmr.msra.gmra.mxu0 %v3636_v30 }
 0x318   : > { %4897 = vmatprep.mubr.msk.bf16.mxu0 %vm5511_vm7, %v5510_v35  ;;  %4882 = vmatpush3.bf16.msra.mxu0 %v5283_v27 }
 0x319   : > { %4883 = vmatprep.subr.bf16.mxu0 %v5510_v35 }
 0x31c   : > { %4884 = vmatpush3.bf16.msra.mxu0 %v5284_v36 }
 0x31d   : > { %4885 = vmatprep.subr.bf16.mxu0 %v5510_v35 }
 0x320   : > { %4886 = vmatpush3.bf16.msra.mxu0 %v5285_v39 }
 0x321   : > { %4887 = vmatprep.subr.bf16.mxu0 %v5510_v35 }
 0x324   : > { %4888 = vmatpush3.bf16.msra.mxu0 %v5286_v58 }
 0x325   : > { %4889 = vmatprep.subr.bf16.mxu0 %v5510_v35 }
 0x328   : > { %4890 = vmatpush3.bf16.msra.mxu0 %v5287_v34 }
 0x329   : > { %4891 = vmatprep.subr.bf16.mxu0 %v5510_v35 }
 0x32c   : > { %4892 = vmatpush3.bf16.msra.mxu0 %v5288_v6 }
 0x32d   : > { %4893 = vmatprep.subr.bf16.mxu0 %v5510_v35 }
 0x330   : > { %4894 = vmatpush3.bf16.msra.mxu0 %v5289_v47 }
 0x331   : > { %4895 = vmatprep.subr.bf16.mxu0 %v5510_v35  ;;  %v3741_v35 = vld [vmem:[%s6132_s9] sm:$0x1] }
 0x334   : > { %4896 = vmatpush3.bf16.msra.mxu0 %v5290_v12 }
 0x337   : > { %4898 = vmatmul.mubr.bf16.vlgmr.msra.gmra.mxu0 %v3837_v38 }
 0x3d7   : > { %v3720_v32 = vpop.f32.mrf.mxu0 }
 0x3d8   : > { %v3721_v2 = vadd.f32 %v3720_v32, %v3653_v40 }
 0x3d9   : > { %v4845_v49 = vpop.f32.mrf.mxu0 }
 0x3da   : > { %v3724_v4 = vmax.f32 %v3721_v2, 0.0 }
 0x3dc   : > { %4879 = vmatmul.mubr.f32.vlgmr.msra.gmra.mxu1 %v3724_v4 }
 0x3f7   : > { %v3926_v29 = vpop.f32.mrf.mxu0 }
 0x3f8   : > { %v3927_v50 = vadd.f32 %v4381_v55, %v3926_v29 }
 0x3f9   : > { %v4899_v43 = vpop.f32.mrf.mxu0 }
 0x3fb   : > { %v3929_v31 = vpop.f32.mrf.mxu0 }
 0x3fc   : > { %v3930_v54 = vadd.f32 %v4381_v55, %v3929_v31 }
 0x3fd   : > { %v4900_v44 = vpop.f32.mrf.mxu0 }
 0x49c   : > { %v3808_v51 = vpop.f32.mrf.mxu1 }
 0x49d   : > { %v3809_v41 = vadd.f32 %v3808_v51, %v3741_v35 }
 0x49e   : > { %v4880_v5 = vpop.f32.mrf.mxu1 }
 0x49f   : > { %v4380_v42 = vmul.f32 -1.442695, %v3809_v41 }
 0x4a1   : > { %5291 = vpow2.f32 %v4380_v42 }
 0x4ae   : > { %v5292_v45 = vpop.eup %5291 }
 0x4af   : > { %v3815_v46 = vadd.f32 1.0, %v5292_v45 }
 0x4b1   : > { %5293 = vrcp.f32 %v3815_v46 }
 0x4be   : > { %v5294_v60 = vpop.eup %5293 }
 0x4bf   : > { %v3938_v48 = vrot.slane %v5294_v60, %v3937_v18 }
 0x4c1   : > { %v3939_v52 = vmul.f32 %v3938_v48, %v6044_v17  ;;  %v3940_v56 = vmul.f32 %v3938_v48, %v6046_v28 }
 0x4c3   : > { %v3941_v59 = vadd.f32 %v3939_v52, %v3927_v50  ;;  %v3942_v61 = vadd.f32 %v3940_v56, %v3930_v54 }
 0x4c5   : > { %v3943_v62 = vmax.f32 %v3941_v59, 0.0  ;;  %v3944_v63 = vmax.f32 %v3942_v61, 0.0 }
 0x4c7   : > { %3945 = vst [vmem:[%s494_s17] sm:$0xff] %v3943_v62  ;;  %3946 = vst [vmem:[%s494_s17 + $0x8] sm:$0xff] %v3944_v63 }
 0x4c8   : > { %5439 = shalt.err (!%p5436_p2)
}
 0x4c9   : > { %s5440_s26 = scalar_lea.hbm %s6079_s20, 256  ;;  %s5444_s28 = scalar_lea.hbm %s6135_s12, 512 }
 0x4ca   : > { %p5441_p9 = scmp.ne.s32.totalorder %s6079_s20, %s5440_s26  ;;  %p5445_p12 = scmp.lt.s32.totalorder %s6079_s20, %s6135_s12 }
 0x4cb   : > { %p5446_p10 = scmp.lt.s32.totalorder %s5444_s28, %s5440_s26 }
 0x4cc   : > { %p5442_p3 = pnand %p5441_p9, %p5618_p5 }
 0x4cd   : > { %p5447_p7 = por %p5446_p10, %p5445_p12 }
 0x4ce   : > { %p5443_p4 = pneg %p5442_p3 }
 0x4d0   : > { %p5448_p8 = pnand %p5447_p7, %p5443_p4 }
 0x4d2   : > { %5451 = shalt.err (!%p5448_p8)
}
 0x4d3   : > { %s5513_s27 = smov 128   ;;  %s5514_s19 = smov 8  }
 0x4d4   : > { %4921 = dma.vmem_to_hbm [thread:$0]  (%p5618_p5), %s6081_s14, 256, %s6079_s20, %s6083_s21, %s5513_s27, %s5513_s27, %s5514_s19  }
 0x4d5 PF: > { %s6186_s25 = sld [smem:[#allocation18_spill]]  ;;  %p4953_p0 = scmp.ge.s32.totalorder %s5498_s24, 2 }
 0x4d7   : > { %p4940_p11 = pnand %p4953_p0, %p5622_p6 }
 0x4d9   : > { %p4941_p1 = pneg %p4940_p11 }
 0x4db   : > { %s3976_s15 = sand.u32 1, %s6186_s25  }
 0x4dc   : > { %s3977_s18 = scalar_lea.sflag [#allocation6], %s3976_s15 }
 0x4dd   : > { %5481 = dma.done.wait (%p4941_p1), %s3977_s18, 256  }
 0x4de   : > { %5483 = vsyncadd (%p4941_p1), %s3977_s18, 4294967040  ;;  %s6188_s24 = sld [smem:[#allocation20_spill]]  ;;  %s6191_s21 = smov %s5490_s22 }
 0x4df   : > { %s6189_s26 = sld [smem:[#allocation19_spill]] }
 0x4e0   : > { %s6190_s23 = sld [smem:[#allocation21_spill]] }
 0x4e4   : > { %p25_p13 = scmp.ge.s32.totalorder %s6188_s24, 4  }
 0x4e5   : > { %s6192_s22 = smov %s6189_s26 }
 0x4e6   :  { %27 = sbr.rel (!%p25_p13) target bundleno = 6 (0x6), region = 127 }
 0x4eb   :  { %3982 = vsyncpa [#allocation5], 1 }
 0x4ec   :  { %3984 = vsyncpa [#allocation5 + $0x1], 1 }
 0x4ed   :  { %3985 = vsyncpa [#allocation8], 1 }
 0x4ee   :  { %3986 = vsyncpa [#allocation11], 1 }
 0x4ef   :  { %3987 = vsyncpa [#allocation6], 1 }
 0x4f0   :  { %3989 = vsyncpa [#allocation6 + $0x1], 1 }

// kernel: tpu_custom_call.1
= control target key start
LH: loop header
LB: loop body
LE: loop exit
PB: predicated region body
PF: predicated region fallthrough
CT: control target
= control target key end

     0   :  { %17 = vsyncpa [#allocation5], 0  ;;  %s6123_s0 = inlined_call_operand.vmem [shape: f32[2,16,128], index: 0, kind: input, shape index: {}]   ;;  %s6124_s1 = inlined_call_operand.vmem [shape: f32[2,16,1], index: 1, kind: input, shape index: {}]   ;;  %s6125_s2 = inlined_call_operand.hbm [shape: bf16[1920,128], index: 2, kind: input, shape index: {}]   ;;  %s6126_s3 = inlined_call_operand.vmem [shape: f32[1,128], index: 3, kind: input, shape index: {}]   ;;  %s6127_s4 = inlined_call_operand.hbm [shape: bf16[1920,128], index: 4, kind: input, shape index: {}]   ;;  %s6128_s5 = inlined_call_operand.vmem [shape: f32[1,128], index: 5, kind: input, shape index: {}]   ;;  %s6129_s6 = inlined_call_operand.hbm [shape: f32[128,128], index: 6, kind: input, shape index: {}]   ;;  %s6130_s7 = inlined_call_operand.vmem [shape: f32[1,128], index: 7, kind: input, shape index: {}]   ;;  %s6131_s8 = inlined_call_operand.hbm [shape: f32[128,128], index: 8, kind: input, shape index: {}]   ;;  %s6132_s9 = inlined_call_operand.vmem [shape: f32[1,128], index: 9, kind: input, shape index: {}]   ;;  %s6133_s10 = inlined_call_operand.hbm [shape: bf16[128,128], index: 10, kind: input, shape index: {}]   ;;  %s6134_s11 = inlined_call_operand.vmem [shape: f32[1,128], index: 11, kind: input, shape index: {}]   ;;  %s6135_s12 = inlined_call_operand.hbm [shape: f32[2,16,128], index: 12, kind: output, shape index: {}]  }
   0x1   :  { %18 = vsyncpa [#allocation8], 0 }
   0x2   :  { %19 = vsyncpa [#allocation11], 0 }
   0x3   :  { %20 = vsyncpa [#allocation6], 0 }
   0x4   :  { %22 = vsyncpa [#allocation6 + $0x1], 0  ;;  %s5580_s21 = smov 0   ;;  %s5582_s22 = smov 0  }
   0x5   :  { %s5584_s23 = smov 0   ;;  %s5586_s24 = smov 0  }
   0x6 LB: > { %6144 = sst [smem:[#allocation18_spill]] %s5486_s21  ;;  %s5601_s25 = sadd.s32 4294967295, %s5498_s24   ;;  %s5498_s24 = sphi %s5586_s24, %s6188_s24   ;;  %s5494_s23 = sphi %s5584_s23, %s6190_s23   ;;  %s5490_s22 = sphi %s5582_s22, %s6192_s22   ;;  %s5486_s21 = sphi %s5580_s21, %s6191_s21  }
   0x7   : > { %6145 = sst [smem:[#allocation19_spill]] %s5494_s23  ;;  %s4085_s26 = sadd.s32 4294967294, %s5498_s24  }
   0x8   : > { %s5605_s27 = sadd.s32 1, %s5498_s24   ;;  %s297_s28 = sadd.s32 1, %s5494_s23 }
   0x9   : > { %6146 = sst [smem:[#allocation20_spill]] %s5605_s27  ;;  %s294_s29 = ssub.s32 %s5498_s24, %s5605_s27 }
   0xa   : > { %p307_p0 = scmp.ne.s32.totalorder %s5494_s23, %s5490_s22  ;;  %p295_p1 = scmp.eq.s32.totalorder %s294_s29, 0 }
   0xb   : > { %p308_p2 = scmp.eq.s32.totalorder %s5601_s25, 1  ;;  %p313_p3 = scmp.ne.s32.totalorder %s5490_s22, %s5486_s21 }
   0xc   : > { %p314_p4 = scmp.eq.s32.totalorder %s4085_s26, 1  ;;  %p4086_p7 = scmp.ge.s32.totalorder %s5498_s24, 1 }
   0xd   : > { %s5616_s30 = scalar_select %p295_p1, %s5494_s23, %s297_s28  }
   0xe   : > { %p5618_p5 = por %p308_p2, %p307_p0  ;;  %p5622_p6 = por %p314_p4, %p313_p3 }
   0xf   : > { %6147 = sst [smem:[#allocation21_spill]] %s5616_s30  ;;  %p321_p8 = scmp.lt.s32.totalorder %s5498_s24, 3 }
  0x10   : > { %s6149_s14 = scalar_select %p5622_p6, 1, 0 }
  0x11   : > { %p6143_p9 = scmp.eq.s32.totalorder %s5601_s25, 0  ;;  %p5629_p10 = pnand %p4086_p7, %p321_p8 }
  0x12   : > { %6150 = sst [smem:[#allocation22_spill]] %s6149_s14  ;;  %s5500_s16 = smov [#allocation7]  }
  0x13   : > { %p4923_p11 = pneg %p5629_p10  ;;  %s349_s17 = sshll.u32 %s5500_s16, 4  ;;  %s350_s17 = int_to_ptr.vmem [resolvable:$true] %s349_s17 }
  0x14   : > { %s5501_s19 = smov [#allocation10]   ;;  %s5307_s28 = scalar_lea.vmem %s350_s17, 15360 }
  0x15   : > { %p5637_p12 = pnand %p6143_p9, %p4923_p11  ;;  %s381_s20 = sshll.u32 %s5501_s19, 4  ;;  %s382_s20 = int_to_ptr.vmem [resolvable:$true] %s381_s20 }
  0x16   : > { %p5308_p0 = scmp.ne.s32.totalorder %s350_s17, %s5307_s28  ;;  %p5315_p3 = scmp.lt.s32.totalorder %s350_s17, %s350_s17 }
  0x17   : > { %p5643_p13 = pneg %p5637_p12  ;;  %p5316_p4 = scmp.lt.s32.totalorder %s5307_s28, %s5307_s28 }
  0x19   : > { %p5310_p1 = pnand %p5308_p0, %p5643_p13  ;;  %p5317_p7 = por %p5316_p4, %p5315_p3 }
  0x1b   : > { %p5311_p2 = pneg %p5310_p1 }
  0x1d   : > { %p5318_p8 = pnand %p5317_p7, %p5311_p2 }
  0x1f   : > { %5321 = shalt.err (!%p5318_p8)
}
  0x20   : > { %s5502_s29 = smov 64   ;;  %s5503_s16 = smov 4  }
  0x21   : > { %4929 = dma.hbm_to_vmem [thread:$0]  (!%p5637_p12), %s6127_s4, 15360, %s350_s17, [#allocation8], %s5502_s29, %s5502_s29, %s5503_s16  }
  0x22   : > { %s5504_s23 = smov [#allocation4]   ;;  %s5333_s14 = scalar_lea.vmem %s382_s20, 2048 }
  0x23   : > { %s333_s27 = sshll.u32 %s5504_s23, 4  ;;  %p5334_p11 = scmp.ne.s32.totalorder %s382_s20, %s5333_s14  ;;  %s334_s27 = int_to_ptr.vmem [resolvable:$true] %s333_s27 }
  0x24   : > { %p5341_p2 = scmp.lt.s32.totalorder %s382_s20, %s382_s20  ;;  %p5342_p3 = scmp.lt.s32.totalorder %s5333_s14, %s5333_s14 }
  0x25   : > { %p5336_p0 = pnand %p5334_p11, %p5643_p13 }
  0x26   : > { %p5343_p4 = por %p5342_p3, %p5341_p2 }
  0x27   : > { %p5337_p1 = pneg %p5336_p0 }
  0x29   : > { %p5344_p7 = pnand %p5343_p4, %p5337_p1 }
  0x2b   : > { %5347 = shalt.err (!%p5344_p7)
}
  0x2c   : > { %s6141_s28 = smov 128   ;;  %s6142_s21 = smov 8  }
  0x2d   : > { %4935 = dma.hbm_to_vmem [thread:$0]  (!%p5637_p12), %s6131_s8, 2048, %s382_s20, [#allocation11], %s6141_s28, %s6141_s28, %s6142_s21  }
  0x2e   : > { %s5359_s17 = scalar_lea.vmem %s334_s27, 15360  ;;  %p5367_p1 = scmp.lt.s32.totalorder %s334_s27, %s334_s27 }
  0x2f   : > { %p5360_p8 = scmp.ne.s32.totalorder %s334_s27, %s5359_s17  ;;  %p5368_p2 = scmp.lt.s32.totalorder %s5359_s17, %s5359_s17 }
  0x31   : > { %p5362_p11 = pnand %p5360_p8, %p5643_p13  ;;  %p5369_p3 = por %p5368_p2, %p5367_p1 }
  0x33   : > { %p5363_p0 = pneg %p5362_p11 }
  0x35   : > { %p5370_p4 = pnand %p5369_p3, %p5363_p0 }
  0x37   : > { %5373 = shalt.err (!%p5370_p4)
}
  0x38   : > { %4926 = dma.hbm_to_vmem [thread:$0]  (!%p5637_p12), %s6125_s2, 15360, %s334_s27, [#allocation5], %s5502_s29, %s5502_s29, %s5503_s16  }
  0x39   : > { %s5507_s20 = smov [#allocation9]   ;;  %s5508_s23 = smov [#allocation12]  }
  0x3a   : > { %s365_s30 = sshll.u32 %s5507_s20, 4  ;;  %s397_s28 = sshll.u32 %s5508_s23, 4  ;;  %s366_s30 = int_to_ptr.vmem [resolvable:$true] %s365_s30  ;;  %s398_s28 = int_to_ptr.vmem [resolvable:$true] %s397_s28 }
  0x3b   : > { %s5385_s21 = scalar_lea.vmem %s366_s30, 2048  ;;  %p5393_p0 = scmp.lt.s32.totalorder %s366_s30, %s366_s30 }
  0x3c   : > { %p5386_p7 = scmp.ne.s32.totalorder %s366_s30, %s5385_s21  ;;  %p5394_p1 = scmp.lt.s32.totalorder %s5385_s21, %s5385_s21 }
  0x3e   : > { %p5388_p8 = pnand %p5386_p7, %p5643_p13  ;;  %p5395_p2 = por %p5394_p1, %p5393_p0 }
  0x40   : > { %p5389_p11 = pneg %p5388_p8 }
  0x42   : > { %p5396_p3 = pnand %p5395_p2, %p5389_p11 }
  0x44   : > { %5399 = shalt.err (!%p5396_p3)
}
  0x45   : > { %s6154_s17 = smov 8   ;;  %s6155_s14 = smov 128  }
  0x46   : > { %4932 = dma.hbm_to_vmem [thread:$0]  (!%p5637_p12), %s6129_s6, 2048, %s366_s30, [#allocation8], %s6155_s14, %s6155_s14, %s6154_s17  }
  0x47   : > { %s5411_s20 = scalar_lea.vmem %s398_s28, 1024  ;;  %p5419_p9 = scmp.lt.s32.totalorder %s398_s28, %s398_s28 }
  0x48   : > { %p5412_p4 = scmp.ne.s32.totalorder %s398_s28, %s5411_s20  ;;  %p5420_p0 = scmp.lt.s32.totalorder %s5411_s20, %s5411_s20 }
  0x4a   : > { %p5414_p7 = pnand %p5412_p4, %p5643_p13  ;;  %p5421_p11 = por %p5420_p0, %p5419_p9 }
  0x4c   : > { %p5415_p8 = pneg %p5414_p7 }
  0x4e   : > { %p5422_p1 = pnand %p5421_p11, %p5415_p8 }
  0x50   : > { %5425 = shalt.err (!%p5422_p1)
}
  0x51   : > { %4938 = dma.hbm_to_vmem [thread:$0]  (!%p5637_p12), %s6133_s10, 1024, %s398_s28, [#allocation11], %s5502_s29, %s5502_s29, %s5503_s16  }
  0x52   : > { %432 = sbr.rel (%p5629_p10) target bundleno = 1237 (0x4d5), region = 68  ;;  %p6156_p13 = scmp.eq.s32.totalorder (!%p5629_p10), %s5601_s25, 0 }
  0x57   : > { %5469 = dma.done.wait (%p6156_p13), [#allocation5], 15360   ;;  %p6157_p2 = pmov %p6156_p13 }
  0x59   : > { %5471 = vsyncadd (%p6157_p2), [#allocation5], 4294951936  ;;  %p6158_p9 = pmov %p6157_p2 }
  0x5a   : > { %p6159_p3 = pmov %p6157_p2 }
  0x5b   : > { %5473 = dma.done.wait (%p6158_p9), [#allocation8], 17408  }
  0x5c   : > { %5475 = vsyncadd (%p6159_p3), [#allocation8], 4294949888  ;;  %p6160_p4 = pmov %p6157_p2 }
  0x5d   : > { %p6161_p12 = pmov %p6157_p2 }
  0x5e   : > { %5477 = dma.done.wait (%p6160_p4), [#allocation11], 3072  }
  0x5f   : > { %5479 = vsyncadd (%p6161_p12), [#allocation11], 4294964224  ;;  %vm506_vm0 = vcmask 1043456   ;;  %vm507_vm1 = vsmask.f32 3328  ;;  %vm509_vm2 = vcmask 1047556  }
  0x60   : > { %vm510_vm3 = vsmask.f32 7424  ;;  %vm5713_vm4 = vmand %vm506_vm0, %vm507_vm1  ;;  %v5002_v1 = vld [vmem:[#allocation4 + $0x78] sm:$0xff]   ;;  %v5004_v3 = vld [vmem:[#allocation4 + $0x70] sm:$0xff]   ;;  %p495_p10 = scmp.lt.s32.totalorder %s5601_s25, 1  ;;  %vm592_vm13 = vcmask 1043459  }
  0x61   : > { %vm511_vm5 = vmand %vm509_vm2, %vm510_vm3  ;;  %v5003_v2 = vld [vmem:[#allocation4 + $0x38] sm:$0xff]   ;;  %4402 = vmatprep.subr.bf16.mxu1 %v5002_v1  ;;  %v5005_v4 = vld [vmem:[#allocation4 + $0x30] sm:$0xff]   ;;  %vm537_vm6 = vsmask.f32 7938  ;;  %vm539_vm8 = vsmask.f32 7954 }
  0x62   : > { %4403 = vmatpush3.bf16.msra.mxu1 %v5003_v2  ;;  %v5006_v5 = vld [vmem:[#allocation4 + $0x68] sm:$0xff]   ;;  %vm5721_vm7 = vmor %vm511_vm5, %vm5713_vm4  ;;  %s5726_s15 = scalar_select %p495_p10, %s5601_s25, 1  ;;  %v5008_v8 = vld [vmem:[#allocation4 + $0x60] sm:$0xff]   ;;  %vm593_vm12 = vsmask.f32 7950  ;;  %vm599_vm14 = vcmask 1042432  }
  0x63   : > { %4404 = vmatprep.subr.bf16.mxu1 %v5004_v3  ;;  %v5007_v7 = vld [vmem:[#allocation4 + $0x28] sm:$0xff]   ;;  %vm5729_vm9 = vmand %vm506_vm0, %vm537_vm6  ;;  %v5009_v10 = vld [vmem:[#allocation4 + $0x20] sm:$0xff]   ;;  %vm600_vm15 = vcmask 1046532   ;;  %vm610_vm0 = vsmask.f32 2304  ;;  %s492_s26 = sand.u32 1, %s5490_s22  }
  0x64   : > { %vm540_vm10 = vmand %vm509_vm2, %vm539_vm8  ;;  %s4395_s18 = sshll.u32 %s5726_s15, 4  ;;  %v5010_v11 = vld [vmem:[#allocation4 + $0x58] sm:$0xff]   ;;  %v5012_v14 = vld [vmem:[#allocation4 + $0x50] sm:$0xff]   ;;  %vm574_vm3 = vsmask.f32 7440  ;;  %s4099_s29 = sshll.u32 %s492_s26, 4 }
  0x65   : > { %vm5737_vm11 = vmor %vm540_vm10, %vm5729_vm9  ;;  %v5011_v13 = vld [vmem:[#allocation4 + $0x18] sm:$0xff]   ;;  %s5746_s16 = scalar_lea.vmem %s6123_s0, %s4395_s18  ;;  %v513_v15 = vld [vmem:[#allocation2] sm:$0xff]  ;;  %vm632_vm10 = vcmask 1041408   ;;  %s5951_s17 = scalar_lea.vmem %s6124_s1, %s4395_s18 }
  0x66   : > { %4405 = vmatpush3.bf16.msra.mxu1 %v5005_v4  ;;  %v534_v16 = vld [vmem:[#allocation2 + $0x38] sm:$0xf]  ;;  %v542_v17 = vld [vmem:[#allocation2 + $0x3c] sm:$0xff]  ;;  %v514_v18 = vsel %vm5721_vm7, 0, %v513_v15  ;;  %v567_v22 = vld [vmem:[%s5746_s16 + $0x8] sm:$0xff]  ;;  %s4401_s30 = sshll.u32 %s5601_s25, 8 }
  0x67   : > { %4406 = vmatprep.subr.bf16.mxu1 %v5006_v5  ;;  %v535_v19 = vsel %vm5713_vm4, 0, %v534_v16  ;;  %v543_v20 = vsel %vm5737_vm11, 0, %v542_v17  ;;  %v566_v21 = vld [vmem:[%s5746_s16] sm:$0xff]  ;;  %515 = vst [vmem:[#allocation2] sm:$0xff] %v514_v18  ;;  %v5758_v24 = vpack.c.bf16 %v567_v22, %v567_v22  ;;  %v5014_v26 = vld [vmem:[#allocation4 + $0x48] sm:$0xff]   ;;  %vm5771_vm2 = vmand %vm599_vm14, %vm610_vm0  ;;  %s6079_s20 = scalar_lea.hbm %s6135_s12, %s4401_s30  ;;  %s6083_s21 = scalar_lea.sflag [#allocation6], %s492_s26 }
  0x68   : > { %536 = vst [vmem:[#allocation2 + $0x38] sm:$0xf] %v535_v19  ;;  %544 = vst [vmem:[#allocation2 + $0x3c] sm:$0xff] %v543_v20  ;;  %v5756_v23 = vpack.c.bf16 %v566_v21, %v566_v21  ;;  %v5013_v25 = vld [vmem:[#allocation4 + $0x10] sm:$0xff]   ;;  %v5015_v32 = vld [vmem:[#allocation4 + $0x8] sm:$0xff]   ;;  %s5512_s23 = smov [#allocation13]  }
  0x69   : > { %v5767_v29 = vshll.u32 %v5758_v24, 16  ;;  %vm5775_vm5 = vmor %vm599_vm14, %vm600_vm15  ;;  %v604_v34 = vrot.slane %v5758_v24, 5  ;;  %v5023_v35 = vld [vmem:[#allocation4 + $0x178] sm:$0xff]   ;;  %v5016_v36 = vld [vmem:[#allocation4 + $0x40] sm:$0xff]   ;;  %v5805_v60 = vshrl.u32 %v5758_v24, 16  ;;  %v637_v39 = vrot.slane %v5758_v24, 6 }
  0x6a   : > { %4407 = vmatpush3.bf16.msra.mxu1 %v5007_v7  ;;  %v5761_v27 = vshll.u32 %v5756_v23, 16  ;;  %v5764_v28 = vshrl.u32 %v5756_v23, 16  ;;  %v602_v30 = vrot.slane %v5756_v23, 5  ;;  %vm5784_vm6 = vmand %vm592_vm13, %vm593_vm12  ;;  %4446 = vmatprep.subr.bf16.mxu0 %v5023_v35  ;;  %v5024_v41 = vld [vmem:[#allocation4 + $0x138] sm:$0xff]   ;;  %v5017_v45 = vld [vmem:[#allocation4] sm:$0xff]   ;;  %vm633_vm12 = vcmask 1045508  }
  0x6b   : > { %4408 = vmatprep.subr.bf16.mxu1 %v5008_v8  ;;  %vm575_vm8 = vmor %vm507_vm1, %vm574_vm3  ;;  %v588_v43 = vrot.slane %v5767_v29, 5  ;;  %4447 = vmatpush3.bf16.msra.mxu0 %v5024_v41  ;;  %v5021_v49 = vld [vmem:[#allocation4 + $0xf8] sm:$0xff]   ;;  %v5027_v50 = vld [vmem:[#allocation4 + $0x170] sm:$0xff]   ;;  %vm611_vm1 = vsmask.f32 6416  ;;  %v619_v5 = vrot.slane %v5805_v60, 5 }
  0x6c   : > { %v579_v37 = vrot.slane %v5761_v27, 5  ;;  %v582_v38 = vrot.slane %v5764_v28, 4  ;;  %v603_v40 = vrot.slane %v602_v30, 4  ;;  %608 = vst [vmem:[#allocation2 + $0x4] sm:$0x8] %v602_v30  ;;  %v5028_v52 = vld [vmem:[#allocation4 + $0x130] sm:$0xff]   ;;  %4448 = vmatprep.subr.bf16.mxu0 %v5027_v50  ;;  %vm612_vm3 = vmor %vm610_vm0, %vm611_vm1 }
  0x6d   : > { %v5031_v53 = vld [vmem:[#allocation4 + $0x168] sm:$0xff]   ;;  %v5022_v55 = vld [vmem:[#allocation4 + $0xb8] sm:$0xff]   ;;  %v5025_v56 = vld [vmem:[#allocation4 + $0xf0] sm:$0xff]   ;;  %v613_v63 = vrot.slane %v5764_v28, 5  ;;  %v614_v2 = vrot.slane %v5761_v27, 6  ;;  %v620_v8 = vrot.slane %v5767_v29, 6 }
  0x6e   : > { %4409 = vmatpush3.bf16.msra.mxu1 %v5009_v10  ;;  %v583_v42 = vor.u32 %v582_v38, %v579_v37  ;;  %v5794_v44 = vsel %vm5775_vm5, %v603_v40, %v604_v34  ;;  %v595_v46 = vld [vmem:[#allocation2] sm:$0x8]  ;;  %v5032_v54 = vld [vmem:[#allocation4 + $0x128] sm:$0xff]   ;;  %v5035_v57 = vld [vmem:[#allocation4 + $0x160] sm:$0xff]   ;;  %v646_v15 = vrot.slane %v5764_v28, 6  ;;  %v647_v17 = vrot.slane %v5761_v27, 7 }
  0x6f   : > { %4410 = vmatprep.subr.bf16.mxu1 %v5010_v11  ;;  %609 = vst [vmem:[#allocation2 + $0x40] sm:$0xf] %v5794_v44  ;;  %v596_v48 = vsel %vm5784_vm6, %v579_v37, %v595_v46  ;;  %4449 = vmatpush3.bf16.msra.mxu0 %v5028_v52  ;;  %v5036_v61 = vld [vmem:[#allocation4 + $0x120] sm:$0xff]   ;;  %v5026_v62 = vld [vmem:[#allocation4 + $0xb0] sm:$0xff]   ;;  %v5029_v1 = vld [vmem:[#allocation4 + $0xe8] sm:$0xff]   ;;  %v5811_v11 = vor.u32 %v614_v2, %v613_v63  ;;  %v635_v20 = vrot.slane %v5756_v23, 6 }
  0x70   : > { %v584_v47 = vrot.slane %v583_v42, 4  ;;  %597 = vst [vmem:[#allocation2] sm:$0x8] %v596_v48  ;;  %4450 = vmatprep.subr.bf16.mxu0 %v5031_v53  ;;  %v5039_v3 = vld [vmem:[#allocation4 + $0x158] sm:$0xff]   ;;  %v5030_v7 = vld [vmem:[#allocation4 + $0xa8] sm:$0xff]   ;;  %v5033_v10 = vld [vmem:[#allocation4 + $0xe0] sm:$0xff]   ;;  %v5826_v35 = vor.u32 %v647_v17, %v646_v15 }
  0x71   : > { %v5040_v4 = vld [vmem:[#allocation4 + $0x118] sm:$0xff]   ;;  %v5044_v16 = vld [vmem:[#allocation4 + $0x110] sm:$0xff]   ;;  %vm643_vm13 = vsmask.f32 1280  ;;  %vm644_vm14 = vsmask.f32 5392  ;;  %vm5845_vm0 = vmor %vm632_vm10, %vm633_vm12 }
  0x72   : > { %4411 = vmatpush3.bf16.msra.mxu1 %v5011_v13  ;;  %v5801_v51 = vsel %vm575_vm8, %v584_v47, %v588_v43  ;;  %v677_v13 = vrot.slane %v5764_v28, 7  ;;  %v5034_v19 = vld [vmem:[#allocation4 + $0xa0] sm:$0xff]   ;;  %vm626_vm15 = vsmask.f32 7946  ;;  %v5037_v21 = vld [vmem:[#allocation4 + $0xd8] sm:$0xff]   ;;  %v616_v22 = vrot.slane %v5811_v11, 4  ;;  %vm645_vm12 = vmor %vm643_vm13, %vm644_vm14 }
  0x73   : > { %4412 = vmatprep.subr.bf16.mxu1 %v5012_v14  ;;  %598 = vst [vmem:[#allocation2 + $0x3c] sm:$0xf] %v5801_v51  ;;  %4451 = vmatpush3.bf16.msra.mxu0 %v5032_v54  ;;  %v5043_v14 = vld [vmem:[#allocation4 + $0x150] sm:$0xff]   ;;  %v5048_v30 = vld [vmem:[#allocation4 + $0x108] sm:$0xff]   ;;  %v666_v37 = vrot.slane %v5756_v23, 7  ;;  %v5038_v38 = vld [vmem:[#allocation4 + $0x98] sm:$0xff]  }
  0x74   : > { %4452 = vmatprep.subr.bf16.mxu0 %v5035_v57  ;;  %v5819_v18 = vor.u32 %v677_v13, %v5761_v27  ;;  %v651_v27 = vrot.slane %v5767_v29, 7  ;;  %v5051_v40 = vld [vmem:[#allocation4 + $0x140] sm:$0xff]   ;;  %v516_v41 = vld [vmem:[#allocation2 + $0x8] sm:$0xff]  ;;  %vm625_vm6 = vcmask 1043458   ;;  %vm663_vm8 = vcmask 1040384   ;;  %v5041_v42 = vld [vmem:[#allocation4 + $0xd0] sm:$0xff]  }
  0x75   : > { %v545_v46 = vld [vmem:[#allocation2 + $0x44] sm:$0xff]  ;;  %v649_v48 = vrot.slane %v5826_v35, 4  ;;  %v5055_v54 = vld [vmem:[#allocation4 + $0x100] sm:$0xff]   ;;  %vm664_vm1 = vcmask 1044484   ;;  %s5430_s15 = sshll.u32 %s5512_s23, 4  ;;  %s5431_s15 = int_to_ptr.vmem [resolvable:$false] %s5430_s15 }
  0x76   : > { %4413 = vmatpush3.bf16.msra.mxu1 %v5013_v25  ;;  %v5020_v59 = vld [vmem:[#allocation2 + $0x4] ss:$60 sps:$4 sm:$0xff]   ;;  %v5047_v25 = vld [vmem:[#allocation4 + $0x148] sm:$0xff]   ;;  %v546_v52 = vsel %vm5737_vm11, 0, %v545_v46  ;;  %vm5875_vm14 = vmor %vm663_vm8, %vm664_vm1  ;;  %vm656_vm1 = vcmask 1043457   ;;  %s5432_s18 = scalar_lea.vmem %s5431_s15, 512 }
  0x77   : > { %4414 = vmatprep.subr.bf16.mxu1 %v5014_v26  ;;  %1857 = vmatprep.mubr.bf16.mxu1 %v5020_v59  ;;  %v650_v26 = vrot.slane %v5805_v60, 6  ;;  %v5042_v50 = vld [vmem:[#allocation4 + $0x90] sm:$0xff]   ;;  %547 = vst [vmem:[#allocation2 + $0x44] sm:$0xff] %v546_v52  ;;  %v519_v59 = vld [vmem:[#allocation2 + $0x10] sm:$0xff]  ;;  %v5056_v17 = vld [vmem:[#allocation4 + $0x1f8] sm:$0xff]  }
  0x78   : > { %4453 = vmatpush3.bf16.msra.mxu0 %v5036_v61  ;;  %v548_v61 = vld [vmem:[#allocation2 + $0x4c] sm:$0xff]  ;;  %v520_v63 = vsel %vm5721_vm7, 0, %v519_v59  ;;  %v5079_v59 = vld [vmem:[#allocation4 + $0x1d0] sm:$0xff]   ;;  %v551_v28 = vld [vmem:[#allocation2 + $0x54] sm:$0xff] }
  0x79   : > { %4454 = vmatprep.subr.bf16.mxu0 %v5039_v3  ;;  %521 = vst [vmem:[#allocation2 + $0x10] sm:$0xff] %v520_v63  ;;  %v5050_v15 = vld [vmem:[#allocation4 + $0x80] sm:$0xff]   ;;  %v679_v63 = vrot.slane %v677_v13, 4  ;;  %v5085_v13 = vld [vmem:[#allocation4 + $0x248] sm:$0xff]   ;;  %v5101_v0 = vld [vmem:[#allocation4 + $0x2f0] sm:$0xff]  }
  0x7a   : > { %4415 = vmatpush3.bf16.msra.mxu1 %v5015_v32  ;;  %v5018_v58 = vld [vmem:[#allocation2] ss:$60 sps:$4 sm:$0xff]   ;;  %v5824_v32 = vor.u32 %v620_v8, %v619_v5  ;;  %672 = vst [vmem:[#allocation2 + $0x14] sm:$0xe] %v666_v37  ;;  %v5072_v46 = vld [vmem:[#allocation4 + $0x1a0] sm:$0xff]   ;;  %v5135_v5 = vld [vmem:[#allocation4 + $0x3b8] sm:$0xff]  }
  0x7b   : > { %4416 = vmatprep.subr.bf16.mxu1 %v5016_v36  ;;  %v636_v36 = vrot.slane %v635_v20, 4  ;;  %v5046_v8 = vld [vmem:[#allocation4 + $0x88] sm:$0xff]   ;;  %v5074_v52 = vld [vmem:[#allocation4 + $0x220] sm:$0xff]   ;;  %v5136_v9 = vld [vmem:[#allocation4 + $0x3b0] sm:$0xff]  }
  0x7c   : > { %4455 = vmatpush3.bf16.msra.mxu0 %v5040_v4  ;;  %v5836_v47 = vsel %vm612_vm3, %v616_v22, %v5824_v32  ;;  %vm5862_vm3 = vmand %vm625_vm6, %vm626_vm15  ;;  %vm657_vm15 = vsmask.f32 7942  ;;  %v5125_v6 = vld [vmem:[#allocation4 + $0x2c0] sm:$0xff]   ;;  %v5186_v53 = vld [vmem:[#allocation7 + $0x170] sm:$0xff]  }
  0x7d   : > { %4456 = vmatprep.subr.bf16.mxu0 %v5043_v14  ;;  %v5853_v57 = vsel %vm5845_vm0, %v636_v36, %v637_v39  ;;  %631 = vst [vmem:[#allocation2 + $0x44] sm:$0xf] %v5836_v47  ;;  %vm5888_vm6 = vmand %vm632_vm10, %vm643_vm13  ;;  %vm674_vm13 = vsmask.f32 256 }
  0x7e   : > { %4417 = vmatpush3.bf16.msra.mxu1 %v5017_v45  ;;  %v517_v45 = vsel %vm5721_vm7, 0, %v516_v41  ;;  %642 = vst [vmem:[#allocation2 + $0x48] sm:$0xf] %v5853_v57  ;;  %vm658_vm10 = vmand %vm656_vm1, %vm657_vm15  ;;  %v5069_v41 = vld [vmem:[#allocation4 + $0x268] sm:$0xff]  }
  0x7f   : > { %4424 = vmatprep.subr.bf16.mxu1 %v5021_v49  ;;  %v5839_v49 = vor.u32 %v651_v27, %v650_v26  ;;  %518 = vst [vmem:[#allocation2 + $0x8] sm:$0xff] %v517_v45  ;;  %v5063_v26 = vld [vmem:[#allocation4 + $0x1f0] sm:$0xff]   ;;  %v5070_v45 = vld [vmem:[#allocation4 + $0x228] sm:$0xff]  }
  0x80   : > { %4457 = vmatpush3.bf16.msra.mxu0 %v5044_v16  ;;  %641 = vst [vmem:[#allocation2 + $0xc] sm:$0xc] %v635_v20  ;;  %v5064_v27 = vld [vmem:[#allocation4 + $0x1b0] sm:$0xff]  }
  0x81   : > { %1858 = vmatmul.mubr.bf16.vlgmr.msra.gmra.mxu1 %v5018_v58  ;;  %4458 = vmatprep.subr.bf16.mxu0 %v5047_v25  ;;  %v668_v58 = vrot.slane %v5758_v24, 7  ;;  %v5871_v2 = vsel %vm645_vm12, %v649_v48, %v5839_v49  ;;  %vm675_vm12 = vsmask.f32 4368  ;;  %v5073_v48 = vld [vmem:[#allocation4 + $0x260] sm:$0xff]   ;;  %v716_v12 = vrot.slane %v5839_v49, 4 }
  0x82   : > { %4425 = vmatpush3.bf16.msra.mxu1 %v5022_v55  ;;  %v667_v55 = vrot.slane %v666_v37, 4 }
  0x83   : > { %4426 = vmatprep.subr.bf16.mxu1 %v5025_v56  ;;  %v5045_v56 = vld [vmem:[#allocation4 + $0xc8] sm:$0xff]  }
  0x84   : > { %4459 = vmatpush3.bf16.msra.mxu0 %v5048_v30  ;;  %v5884_v4 = vsel %vm5875_vm14, %v667_v55, %v668_v58  ;;  %v5062_v30 = vld [vmem:[#allocation4 + $0x238] sm:$0xff]   ;;  %v680_v55 = vrot.slane %v5805_v60, 7 }
  0x85   : > { %4460 = vmatprep.subr.bf16.mxu0 %v5051_v40  ;;  %v5066_v40 = vld [vmem:[#allocation4 + $0x230] sm:$0xff]  }
  0x86   : > { %4427 = vmatpush3.bf16.msra.mxu1 %v5026_v62  ;;  %v628_v14 = vld [vmem:[#allocation2 + $0x8] sm:$0xc]  ;;  %v5080_v62 = vld [vmem:[#allocation4 + $0x190] sm:$0xff]  }
  0x87   : > { %4428 = vmatprep.subr.bf16.mxu1 %v5029_v1  ;;  %v549_v1 = vsel %vm5737_vm11, 0, %v548_v61  ;;  %v629_v16 = vsel %vm5862_vm3, %v5811_v11, %v628_v14  ;;  %v5054_v25 = vld [vmem:[#allocation2 + $0xc] ss:$60 sps:$4 sm:$0xff]   ;;  %v5065_v11 = vld [vmem:[#allocation4 + $0x270] sm:$0xff]   ;;  %v693_v14 = vrot.slane %v5805_v60, 4  ;;  %vm676_vm3 = vmor %vm674_vm13, %vm675_vm12 }
  0x88   : > { %4461 = vmatpush3.bf16.msra.mxu0 %v5055_v54  ;;  %550 = vst [vmem:[#allocation2 + $0x4c] sm:$0xff] %v549_v1  ;;  %630 = vst [vmem:[#allocation2 + $0x8] sm:$0xc] %v629_v16  ;;  %1898 = vmatprep.mubr.bf16.mxu1 %v5054_v25  ;;  %v5076_v54 = vld [vmem:[#allocation4 + $0x198] sm:$0xff]   ;;  %v681_v1 = vor.u32 %v680_v55, %v5767_v29  ;;  %v5084_v16 = vld [vmem:[#allocation4 + $0x188] sm:$0xff]   ;;  %v701_v25 = vrot.slane %v604_v34, 4 }
  0x89   : > { %662 = vst [vmem:[#allocation2 + $0x4c] sm:$0xf] %v5871_v2  ;;  %673 = vst [vmem:[#allocation2 + $0x50] sm:$0xf] %v5884_v4  ;;  %v5078_v61 = vld [vmem:[#allocation4 + $0x218] sm:$0xff]   ;;  %v5089_v34 = vld [vmem:[#allocation4 + $0x240] sm:$0xff]  }
  0x8a   : > { %4429 = vmatpush3.bf16.msra.mxu1 %v5030_v7  ;;  %v5061_v7 = vld [vmem:[#allocation4 + $0x278] sm:$0xff]  }
  0x8b   : > { %4430 = vmatprep.subr.bf16.mxu1 %v5033_v10  ;;  %v5049_v10 = vld [vmem:[#allocation4 + $0xc0] sm:$0xff]   ;;  %4490 = vmatprep.subr.bf16.mxu0 %v5061_v7  ;;  %v5081_v7 = vld [vmem:[#allocation4 + $0x250] sm:$0xff]  }
  0x8e   : > { %4431 = vmatpush3.bf16.msra.mxu1 %v5034_v19  ;;  %v659_v19 = vld [vmem:[#allocation2 + $0x10] sm:$0xe] }
  0x8f   : > { %4432 = vmatprep.subr.bf16.mxu1 %v5037_v21  ;;  %v660_v20 = vsel %vm658_vm10, %v5826_v35, %v659_v19  ;;  %v5060_v21 = vld [vmem:[#allocation4 + $0x1b8] sm:$0xff]   ;;  %v5068_v35 = vld [vmem:[#allocation4 + $0x1a8] sm:$0xff]   ;;  %v552_v19 = vsel %vm5737_vm11, 0, %v551_v28 }
  0x90   : > { %661 = vst [vmem:[#allocation2 + $0x10] sm:$0xe] %v660_v20  ;;  %v5052_v22 = vld [vmem:[#allocation2 + $0x8] ss:$60 sps:$4 sm:$0xff]   ;;  %v5059_v37 = vld [vmem:[#allocation2 + $0x14] ss:$60 sps:$4 sm:$0xff]   ;;  %v682_v20 = vsel %vm676_vm3, %v679_v63, %v681_v1 }
  0x91   : > { %1939 = vmatprep.mubr.bf16.mxu0 %v5059_v37  ;;  %553 = vst [vmem:[#allocation2 + $0x54] sm:$0xff] %v552_v19  ;;  %729 = vst [vmem:[#allocation2 + $0x38] sm:$0xf] %v682_v20  ;;  %v5094_v37 = vld [vmem:[#allocation4 + $0x2f8] sm:$0xff]   ;;  %v5109_v63 = vld [vmem:[#allocation4 + $0x2e0] sm:$0xff]  }
  0x92   : > { %4433 = vmatpush3.bf16.msra.mxu1 %v5038_v38  ;;  %v5067_v38 = vld [vmem:[#allocation4 + $0x1e8] sm:$0xff]   ;;  %688 = vst [vmem:[#allocation2 + $0x54] sm:$0xf] %v682_v20  ;;  %692 = vst [vmem:[#allocation2 + $0x58] sm:$0xf] %v5758_v24  ;;  %v5116_v28 = vld [vmem:[#allocation4 + $0x318] sm:$0xff]  }
  0x93   : > { %4434 = vmatprep.subr.bf16.mxu1 %v5041_v42  ;;  %v5071_v42 = vld [vmem:[#allocation4 + $0x1e0] sm:$0xff]   ;;  %v5108_v1 = vld [vmem:[#allocation4 + $0x328] sm:$0xff]   ;;  %v5119_v19 = vld [vmem:[#allocation4 + $0x350] sm:$0xff]  }
  0x94   : > { %v528_v20 = vld [vmem:[#allocation2 + $0x28] sm:$0xff] }
  0x96   : > { %4435 = vmatpush3.bf16.msra.mxu1 %v5042_v50  ;;  %v5075_v50 = vld [vmem:[#allocation4 + $0x1d8] sm:$0xff]  }
  0x97   : > { %4436 = vmatprep.subr.bf16.mxu1 %v5045_v56  ;;  %v5057_v36 = vld [vmem:[#allocation2 + $0x10] ss:$60 sps:$4 sm:$0xff]  }
  0x98   : > { %1940 = vmatmul.mubr.bf16.vlgmr.msra.gmra.mxu0 %v5057_v36  ;;  %v5077_v56 = vld [vmem:[#allocation4 + $0x258] sm:$0xff]   ;;  %v5088_v36 = vld [vmem:[#allocation4 + $0x180] sm:$0xff]  }
  0x99   : > { %4491 = vmatpush3.bf16.msra.mxu0 %v5062_v30  ;;  %v554_v30 = vld [vmem:[#allocation2 + $0x5c] sm:$0xff] }
  0x9a   : > { %4437 = vmatpush3.bf16.msra.mxu1 %v5046_v8  ;;  %4492 = vmatprep.subr.bf16.mxu0 %v5065_v11  ;;  %v5083_v8 = vld [vmem:[#allocation4 + $0x1c8] sm:$0xff]   ;;  %v555_v11 = vsel %vm5737_vm11, 0, %v554_v30 }
  0x9b   : > { %4438 = vmatprep.subr.bf16.mxu1 %v5049_v10  ;;  %v522_v10 = vld [vmem:[#allocation2 + $0x18] sm:$0xff]  ;;  %556 = vst [vmem:[#allocation2 + $0x5c] sm:$0xff] %v555_v11  ;;  %v531_v11 = vld [vmem:[#allocation2 + $0x30] sm:$0xff] }
  0x9c   : > { %704 = vst [vmem:[#allocation2 + $0x60] sm:$0x7] %v701_v25  ;;  %v529_v25 = vsel %vm5721_vm7, 0, %v528_v20  ;;  %v5121_v30 = vld [vmem:[#allocation4 + $0x2c8] sm:$0xff]   ;;  %v532_v24 = vsel %vm5721_vm7, 0, %v531_v11  ;;  %v5158_v20 = vld [vmem:[#allocation7 + $0xe0] sm:$0xff]  }
  0x9d   : > { %4493 = vmatpush3.bf16.msra.mxu0 %v5066_v40  ;;  %530 = vst [vmem:[#allocation2 + $0x28] sm:$0xff] %v529_v25  ;;  %533 = vst [vmem:[#allocation2 + $0x30] sm:$0xff] %v532_v24  ;;  %v5161_v25 = vld [vmem:[#allocation7 + $0x18] sm:$0xff]   ;;  %v5165_v11 = vld [vmem:[#allocation7 + $0x10] sm:$0xff]  }
  0x9e   : > { %4439 = vmatpush3.bf16.msra.mxu1 %v5050_v15  ;;  %4494 = vmatprep.subr.bf16.mxu0 %v5069_v41  ;;  %v5082_v15 = vld [vmem:[#allocation4 + $0x210] sm:$0xff]   ;;  %v5098_v41 = vld [vmem:[#allocation4 + $0x2b8] sm:$0xff]   ;;  %707 = vst [vmem:[#allocation2 + $0x28] sm:$0xf] %v5836_v47  ;;  %714 = vst [vmem:[#allocation2 + $0x2c] sm:$0xf] %v5853_v57 }
  0x9f   : > { %4468 = vmatprep.subr.bf16.mxu1 %v5056_v17  ;;  %v523_v17 = vsel %vm5721_vm7, 0, %v522_v10  ;;  %v5113_v10 = vld [vmem:[#allocation4 + $0x2d8] sm:$0xff]   ;;  %718 = vst [vmem:[#allocation2 + $0x30] sm:$0xf] %v5871_v2  ;;  %725 = vst [vmem:[#allocation2 + $0x34] sm:$0xf] %v5884_v4 }
  0xa0   : > { %524 = vst [vmem:[#allocation2 + $0x18] sm:$0xff] %v523_v17  ;;  %v5117_v17 = vld [vmem:[#allocation4 + $0x2d0] sm:$0xff]   ;;  %v705_v47 = vrot.slane %v5824_v32, 4  ;;  %v5124_v57 = vld [vmem:[#allocation4 + $0x308] sm:$0xff]  }
  0xa1   : > { %1899 = vmatmul.mubr.bf16.vlgmr.msra.gmra.mxu1 %v5052_v22  ;;  %4495 = vmatpush3.bf16.msra.mxu0 %v5070_v45  ;;  %691 = vst [vmem:[#allocation2 + $0x1c] sm:$0xf] %v5756_v23  ;;  %v525_v22 = vld [vmem:[#allocation2 + $0x20] sm:$0xff]  ;;  %v694_v23 = vor.u32 %v693_v14, %v588_v43  ;;  %v5093_v43 = vld [vmem:[#allocation4 + $0x200] sm:$0xff]   ;;  %v5168_v24 = vld [vmem:[#allocation7 + $0x48] sm:$0xff]  }
  0xa2   : > { %4469 = vmatpush3.bf16.msra.mxu1 %v5060_v21  ;;  %4496 = vmatprep.subr.bf16.mxu0 %v5073_v48  ;;  %v5087_v21 = vld [vmem:[#allocation4 + $0x1c0] sm:$0xff]   ;;  %v5102_v48 = vld [vmem:[#allocation4 + $0x2b0] sm:$0xff]  }
  0xa3   : > { %4470 = vmatprep.subr.bf16.mxu1 %v5063_v26  ;;  %v526_v26 = vsel %vm5721_vm7, 0, %v525_v22  ;;  %v695_v40 = vrot.slane %v694_v23, 4  ;;  %v5112_v14 = vld [vmem:[#allocation4 + $0x320] sm:$0xff]   ;;  %v723_v22 = vrot.slane %v668_v58, 4  ;;  %v5122_v58 = vld [vmem:[#allocation4 + $0x288] sm:$0xff]   ;;  %vm5511_vm7 = vmmov 0  }
  0xa4   : > { %527 = vst [vmem:[#allocation2 + $0x20] sm:$0xff] %v526_v26  ;;  %v557_v26 = vld [vmem:[#allocation2 + $0x64] sm:$0xff]  ;;  %v560_v23 = vld [vmem:[#allocation2 + $0x6c] sm:$0xff] }
  0xa5   : > { %4497 = vmatpush3.bf16.msra.mxu0 %v5074_v52  ;;  %697 = vst [vmem:[#allocation2 + $0x20] sm:$0xf] %v5801_v51  ;;  %703 = vst [vmem:[#allocation2 + $0x24] sm:$0xf] %v5794_v44  ;;  %v5099_v44 = vld [vmem:[#allocation4 + $0x378] sm:$0xff]  }
  0xa6   : > { %4471 = vmatpush3.bf16.msra.mxu1 %v5064_v27  ;;  %4498 = vmatprep.subr.bf16.mxu0 %v5077_v56  ;;  %v5086_v27 = vld [vmem:[#allocation4 + $0x208] sm:$0xff]  }
  0xa7   : > { %4472 = vmatprep.subr.bf16.mxu1 %v5067_v38  ;;  %v685_v38 = vld [vmem:[#allocation2 + $0x18] sm:$0xf]  ;;  %v698_v51 = vld [vmem:[#allocation2 + $0x5c] sm:$0xf] }
  0xa8   : > { %v686_v29 = vsel %vm5729_vm9, %v5819_v18, %v685_v38  ;;  %v5092_v45 = vld [vmem:[#allocation2 + $0x1c] ss:$60 sps:$4 sm:$0xff]   ;;  %v5100_v18 = vld [vmem:[#allocation4 + $0x338] sm:$0xff]   ;;  %v5127_v38 = vld [vmem:[#allocation4 + $0x340] sm:$0xff]  }
  0xa9   : > { %4499 = vmatpush3.bf16.msra.mxu0 %v5078_v61  ;;  %687 = vst [vmem:[#allocation2 + $0x18] sm:$0xf] %v686_v29  ;;  %1980 = vmatprep.mubr.bf16.mxu1 %v5092_v45  ;;  %v5105_v56 = vld [vmem:[#allocation4 + $0x2e8] sm:$0xff]   ;;  %v563_v29 = vld [vmem:[#allocation2 + $0x74] sm:$0xf] }
  0xaa   : > { %4473 = vmatpush3.bf16.msra.mxu1 %v5068_v35  ;;  %4500 = vmatprep.subr.bf16.mxu0 %v5081_v7  ;;  %v699_v35 = vsel %vm5713_vm4, %v695_v40, %v698_v51  ;;  %v5106_v61 = vld [vmem:[#allocation4 + $0x2a8] sm:$0xff]   ;;  %v5110_v7 = vld [vmem:[#allocation4 + $0x2a0] sm:$0xff]   ;;  %vm5957_vm4 = vmand %vm663_vm8, %vm674_vm13  ;;  %v564_v31 = vsel %vm5729_vm9, 0, %v563_v29  ;;  %v727_v51 = vrot.slane %v680_v55, 4 }
  0xab   : > { %4474 = vmatprep.subr.bf16.mxu1 %v5071_v42  ;;  %700 = vst [vmem:[#allocation2 + $0x5c] sm:$0xf] %v699_v35  ;;  %v5510_v35 = vmov 0.0   ;;  %565 = vst [vmem:[#allocation2 + $0x74] sm:$0xf] %v564_v31  ;;  %v5137_v55 = vld [vmem:[#allocation4 + $0x3a8] sm:$0xff]  }
  0xad   : > { %4501 = vmatpush3.bf16.msra.mxu0 %v5082_v15  ;;  %v5114_v15 = vld [vmem:[#allocation4 + $0x298] sm:$0xff]  }
  0xae   : > { %4475 = vmatpush3.bf16.msra.mxu1 %v5072_v46  ;;  %4502 = vmatprep.subr.bf16.mxu0 %v5085_v13  ;;  %v5509_v46 = vmov 0   ;;  %v5118_v13 = vld [vmem:[#allocation4 + $0x290] sm:$0xff]  }
  0xaf   : > { %4476 = vmatprep.subr.bf16.mxu1 %v5075_v50  ;;  %5000 = vset.pattern.permute.xlu0 %v5509_v46  ;;  %734 = vst [vmem:[#allocation3] sm:$0xff] %v5509_v46  ;;  %735 = vst [vmem:[#allocation3 + $0x8] sm:$0xff] %v5509_v46  ;;  %v5103_v50 = vld [vmem:[#allocation4 + $0x370] sm:$0xff]  }
  0xb0   : > { %v5090_v42 = vld [vmem:[#allocation2 + $0x18] ss:$60 sps:$4 sm:$0xff]   ;;  %736 = vst [vmem:[#allocation3 + $0x10] sm:$0xff] %v5509_v46  ;;  %737 = vst [vmem:[#allocation3 + $0x18] sm:$0xff] %v5509_v46  ;;  %5001 = vset.pattern.permute.xlu1 %v5509_v46 }
  0xb1   : > { %4503 = vmatpush3.bf16.msra.mxu0 %v5086_v27  ;;  %738 = vst [vmem:[#allocation3 + $0x20] sm:$0xff] %v5509_v46  ;;  %739 = vst [vmem:[#allocation3 + $0x28] sm:$0xff] %v5509_v46  ;;  %v558_v27 = vsel %vm5737_vm11, 0, %v557_v26  ;;  %v5162_v26 = vld [vmem:[#allocation7 + $0xd8] sm:$0xff]  }
  0xb2   : > { %4477 = vmatpush3.bf16.msra.mxu1 %v5076_v54  ;;  %4504 = vmatprep.subr.bf16.mxu0 %v5089_v34  ;;  %740 = vst [vmem:[#allocation3 + $0x30] sm:$0xff] %v5509_v46  ;;  %741 = vst [vmem:[#allocation3 + $0x38] sm:$0xf] %v5509_v46  ;;  %v5095_v52 = vld [vmem:[#allocation2 + $0x20] ss:$60 sps:$4 sm:$0xff]  }
  0xb3   : > { %4478 = vmatprep.subr.bf16.mxu1 %v5079_v59  ;;  %742 = vst [vmem:[#allocation3 + $0x3c] sm:$0x77] %v5509_v46  ;;  %743 = vst [vmem:[#allocation3 + $0x44] sm:$0x77] %v5509_v46  ;;  %v5097_v54 = vld [vmem:[#allocation2 + $0x24] ss:$60 sps:$4 sm:$0xff]  }
  0xb4   : > { %744 = vst [vmem:[#allocation3 + $0x4c] sm:$0x77] %v5509_v46  ;;  %745 = vst [vmem:[#allocation3 + $0x54] sm:$0x77] %v5509_v46  ;;  %2021 = vmatprep.mubr.bf16.mxu0 %v5097_v54  ;;  %v5104_v59 = vld [vmem:[#allocation4 + $0x330] sm:$0xff]   ;;  %v5123_v34 = vld [vmem:[#allocation4 + $0x348] sm:$0xff]  }
  0xb5   : > { %4505 = vmatpush3.bf16.msra.mxu0 %v5093_v43  ;;  %746 = vst [vmem:[#allocation3 + $0x5c] sm:$0x77] %v5509_v46  ;;  %747 = vst [vmem:[#allocation3 + $0x64] sm:$0x77] %v5509_v46  ;;  %v5131_v43 = vld [vmem:[#allocation4 + $0x300] sm:$0xff]   ;;  %v5141_v54 = vld [vmem:[#allocation4 + $0x388] sm:$0xff]  }
  0xb6   : > { %4479 = vmatpush3.bf16.msra.mxu1 %v5080_v62  ;;  %4534 = vmatprep.subr.bf16.mxu0 %v5099_v44  ;;  %748 = vst [vmem:[#allocation3 + $0x6c] sm:$0x77] %v5509_v46  ;;  %749 = vst [vmem:[#allocation3 + $0x74] sm:$0x7] %v5509_v46  ;;  %v5107_v62 = vld [vmem:[#allocation4 + $0x368] sm:$0xff]   ;;  %v2155_v44 = vld [vmem:[%s5951_s17] sm:$0xff] }
  0xb7   : > { %4480 = vmatprep.subr.bf16.mxu1 %v5083_v8  ;;  %750 = vst [vmem:[#allocation3] sm:$0xee] %v5509_v46  ;;  %751 = vst [vmem:[#allocation3 + $0x8] sm:$0xee] %v5509_v46  ;;  %v5111_v8 = vld [vmem:[#allocation4 + $0x360] sm:$0xff]   ;;  %2159 = vperm.xlu0 %5000, %v2155_v44  }
  0xb8   : > { %752 = vst [vmem:[#allocation3 + $0x10] sm:$0xee] %v5509_v46  ;;  %753 = vst [vmem:[#allocation3 + $0x18] sm:$0xee] %v5509_v46  ;;  %2022 = vmatmul.mubr.bf16.vlgmr.msra.gmra.mxu0 %v5095_v52  ;;  %v5140_v52 = vld [vmem:[#allocation4 + $0x390] sm:$0xff]  }
  0xb9   : > { %754 = vst [vmem:[#allocation3 + $0x20] sm:$0xee] %v5509_v46  ;;  %755 = vst [vmem:[#allocation3 + $0x28] sm:$0xee] %v5509_v46  ;;  %4535 = vmatpush3.bf16.msra.mxu0 %v5100_v18  ;;  %v731_v18 = vld [vmem:[#allocation2 + $0x74] sm:$0x1] }
  0xba   : > { %4481 = vmatpush3.bf16.msra.mxu1 %v5084_v16  ;;  %756 = vst [vmem:[#allocation3 + $0x30] sm:$0xee] %v5509_v46  ;;  %757 = vst [vmem:[#allocation3 + $0x38] sm:$0xe] %v5509_v46  ;;  %4536 = vmatprep.subr.bf16.mxu0 %v5103_v50  ;;  %v5115_v16 = vld [vmem:[#allocation4 + $0x358] sm:$0xff]   ;;  %v732_v60 = vsel %vm5957_vm4, %v727_v51, %v731_v18 }
  0xbb   : > { %4482 = vmatprep.subr.bf16.mxu1 %v5087_v21  ;;  %758 = vst [vmem:[#allocation3 + $0x3c] sm:$0xff] %v5509_v46  ;;  %759 = vst [vmem:[#allocation3 + $0x44] sm:$0xff] %v5509_v46  ;;  %v712_v21 = vrot.slane %v637_v39, 4  ;;  %v561_v39 = vsel %vm5737_vm11, 0, %v560_v23  ;;  %v5139_v50 = vld [vmem:[#allocation4 + $0x398] sm:$0xff]   ;;  %v5166_v23 = vld [vmem:[#allocation7 + $0xd0] sm:$0xff]  }
  0xbc   : > { %760 = vst [vmem:[#allocation3 + $0x4c] sm:$0xff] %v5509_v46  ;;  %761 = vst [vmem:[#allocation3 + $0x54] sm:$0xff] %v5509_v46 }
  0xbd   : > { %762 = vst [vmem:[#allocation3 + $0x5c] sm:$0xff] %v5509_v46  ;;  %763 = vst [vmem:[#allocation3 + $0x64] sm:$0xff] %v5509_v46  ;;  %4537 = vmatpush3.bf16.msra.mxu0 %v5104_v59 }
  0xbe   : > { %4483 = vmatpush3.bf16.msra.mxu1 %v5088_v36  ;;  %764 = vst [vmem:[#allocation3 + $0x6c] sm:$0xff] %v5509_v46  ;;  %765 = vst [vmem:[#allocation3 + $0x74] sm:$0xf] %v5509_v46  ;;  %4538 = vmatprep.subr.bf16.mxu0 %v5107_v62  ;;  %v5120_v36 = vld [vmem:[#allocation4 + $0x310] sm:$0xff]   ;;  %v5145_v62 = vld [vmem:[#allocation7 + $0x38] sm:$0xff]  }
  0xbf   : > { %4512 = vmatprep.subr.bf16.mxu1 %v5094_v37  ;;  %559 = vst [vmem:[#allocation2 + $0x64] sm:$0xff] %v558_v27  ;;  %562 = vst [vmem:[#allocation2 + $0x6c] sm:$0xff] %v561_v39  ;;  %v5126_v37 = vld [vmem:[#allocation4 + $0x280] sm:$0xff]   ;;  %v5164_v27 = vld [vmem:[#allocation7 + $0x50] sm:$0xff]  }
  0xc0   : > { %715 = vst [vmem:[#allocation2 + $0x68] sm:$0x3] %v712_v21  ;;  %726 = vst [vmem:[#allocation2 + $0x70] sm:$0x1] %v723_v22  ;;  %v5159_v21 = vld [vmem:[#allocation7 + $0xa0] sm:$0xff]   ;;  %v5160_v22 = vld [vmem:[#allocation7 + $0x58] sm:$0xff]  }
  0xc1   : > { %1981 = vmatmul.mubr.bf16.vlgmr.msra.gmra.mxu1 %v5090_v42  ;;  %4539 = vmatpush3.bf16.msra.mxu0 %v5108_v1  ;;  %733 = vst [vmem:[#allocation2 + $0x74] sm:$0x1] %v732_v60  ;;  %v5147_v1 = vld [vmem:[#allocation7 + $0xb8] sm:$0xff]   ;;  %v5169_v39 = vld [vmem:[#allocation7 + $0x8] sm:$0xff]   ;;  %v4106_v60 = vld [vmem:[%s6126_s3] ss:$0 sm:$0xff] }
  0xc2   : > { %4513 = vmatpush3.bf16.msra.mxu1 %v5098_v41  ;;  %4540 = vmatprep.subr.bf16.mxu0 %v5111_v8  ;;  %v2156_v41 = vld [vmem:[%s5951_s17 + $0x8] sm:$0xff]  ;;  %v5149_v8 = vld [vmem:[#allocation7 + $0x30] sm:$0xff]  }
  0xc3   : > { %4514 = vmatprep.subr.bf16.mxu1 %v5101_v0  ;;  %2164 = vperm.xlu0 %5000, %v2156_v41  }
  0xc5   : > { %4541 = vmatpush3.bf16.msra.mxu0 %v5112_v14  ;;  %v5151_v14 = vld [vmem:[#allocation7 + $0xb0] sm:$0xff]  }
  0xc6   : > { %4515 = vmatpush3.bf16.msra.mxu1 %v5102_v48  ;;  %4542 = vmatprep.subr.bf16.mxu0 %v5115_v16  ;;  %v709_v40 = vld [vmem:[#allocation2 + $0x64] sm:$0x7]  ;;  %v720_v2 = vld [vmem:[#allocation2 + $0x6c] sm:$0x3]  ;;  %v5138_v48 = vld [vmem:[#allocation4 + $0x3a0] sm:$0xff]  }
  0xc7   : > { %4516 = vmatprep.subr.bf16.mxu1 %v5105_v56  ;;  %v710_v32 = vsel %vm5771_vm2, %v705_v47, %v709_v40  ;;  %v721_v4 = vsel %vm5888_vm6, %v716_v12, %v720_v2  ;;  %v5130_v45 = vld [vmem:[#allocation2 + $0x2c] ss:$60 sps:$4 sm:$0xff]   ;;  %v5134_v0 = vld [vmem:[#allocation2 + $0x34] ss:$60 sps:$4 sm:$0xff]   ;;  %v5154_v16 = vld [vmem:[#allocation7 + $0xe8] sm:$0xff]  }
  0xc8   : > { %711 = vst [vmem:[#allocation2 + $0x64] sm:$0x7] %v710_v32  ;;  %722 = vst [vmem:[#allocation2 + $0x6c] sm:$0x3] %v721_v4  ;;  %2062 = vmatprep.mubr.bf16.mxu1 %v5130_v45  ;;  %2103 = vmatprep.mubr.bf16.mxu0 %v5134_v0  ;;  %v5142_v56 = vld [vmem:[#allocation4 + $0x380] sm:$0xff]  }
  0xc9   : > { %4543 = vmatpush3.bf16.msra.mxu0 %v5116_v28  ;;  %v5143_v59 = vld [vmem:[#allocation2 + $0x38] ss:$60 sps:$4 sm:$0xff]  }
  0xca   : > { %4517 = vmatpush3.bf16.msra.mxu1 %v5106_v61  ;;  %4544 = vmatprep.subr.bf16.mxu0 %v5119_v19  ;;  %v5144_v61 = vld [vmem:[#allocation7 + $0x78] sm:$0xff]   ;;  %v5155_v28 = vld [vmem:[#allocation7 + $0xa8] sm:$0xff]   ;;  %v5157_v19 = vld [vmem:[#allocation7 + $0x20] sm:$0xff]  }
  0xcb   : > { %4518 = vmatprep.subr.bf16.mxu1 %v5109_v63  ;;  %v5146_v63 = vld [vmem:[#allocation7 + $0xf8] sm:$0xff]   ;;  %v5173_v47 = vld [vmem:[#allocation7] sm:$0xff]  }
  0xcc   : > { %v5174_v12 = vld [vmem:[#allocation7 + $0xc0] sm:$0xff]  }
  0xcd   : > { %4545 = vmatpush3.bf16.msra.mxu0 %v5120_v36  ;;  %v5167_v36 = vld [vmem:[#allocation7 + $0x90] sm:$0xff]  }
  0xce   : > { %4519 = vmatpush3.bf16.msra.mxu1 %v5110_v7  ;;  %4546 = vmatprep.subr.bf16.mxu0 %v5123_v34  ;;  %v5148_v7 = vld [vmem:[#allocation7 + $0x70] sm:$0xff]   ;;  %v5171_v34 = vld [vmem:[#allocation7 + $0x88] sm:$0xff]  }
  0xcf   : > { %4520 = vmatprep.subr.bf16.mxu1 %v5113_v10  ;;  %v5128_v42 = vld [vmem:[#allocation2 + $0x28] ss:$60 sps:$4 sm:$0xff]   ;;  %v5132_v46 = vld [vmem:[#allocation2 + $0x30] ss:$60 sps:$4 sm:$0xff]  }
  0xd0   : > { %v5150_v10 = vld [vmem:[#allocation7 + $0xf0] sm:$0xff]  }
  0xd1   : > { %4547 = vmatpush3.bf16.msra.mxu0 %v5124_v57  ;;  %v5175_v57 = vld [vmem:[#allocation7 + $0x80] sm:$0xff]  }
  0xd2   : > { %4521 = vmatpush3.bf16.msra.mxu1 %v5114_v15  ;;  %4548 = vmatprep.subr.bf16.mxu0 %v5127_v38  ;;  %v5152_v15 = vld [vmem:[#allocation7 + $0x68] sm:$0xff]   ;;  %v5184_v38 = vld [vmem:[#allocation7 + $0x1f8] sm:$0xff]  }
  0xd3   : > { %4522 = vmatprep.subr.bf16.mxu1 %v5117_v17  ;;  %v5153_v17 = vld [vmem:[#allocation7 + $0x28] sm:$0xff]  }
  0xd5   : > { %4549 = vmatpush3.bf16.msra.mxu0 %v5131_v43 }
  0xd6   : > { %4523 = vmatpush3.bf16.msra.mxu1 %v5118_v13  ;;  %4565 = vmatprep.subr.bf16.mxu0 %v5144_v61  ;;  %v5156_v13 = vld [vmem:[#allocation7 + $0x60] sm:$0xff]  }
  0xd7   : > { %4524 = vmatprep.subr.bf16.mxu1 %v5121_v30  ;;  %v5163_v30 = vld [vmem:[#allocation7 + $0x98] sm:$0xff]  }
  0xd8   : > { %2104 = vmatmul.mubr.bf16.vlgmr.msra.gmra.mxu0 %v5132_v46 }
  0xd9   : > { %4566 = vmatpush3.bf16.msra.mxu0 %v5145_v62 }
  0xda   : > { %4525 = vmatpush3.bf16.msra.mxu1 %v5122_v58  ;;  %4567 = vmatprep.subr.bf16.mxu0 %v5148_v7  ;;  %v5170_v58 = vld [vmem:[#allocation7 + $0xc8] sm:$0xff]  }
  0xdb   : > { %4526 = vmatprep.subr.bf16.mxu1 %v5125_v6  ;;  %v5172_v6 = vld [vmem:[#allocation7 + $0x40] sm:$0xff]  }
  0xdd   : > { %4568 = vmatpush3.bf16.msra.mxu0 %v5149_v8 }
  0xde   : > { %4527 = vmatpush3.bf16.msra.mxu1 %v5126_v37  ;;  %4569 = vmatprep.subr.bf16.mxu0 %v5152_v15  ;;  %v5179_v37 = vld [vmem:[#allocation7 + $0x178] sm:$0xff]  }
  0xdf   : > { %4771 = vmatprep.subr.bf16.mxu1 %v5510_v35 }
  0xe1   : > { %2063 = vmatmul.mubr.bf16.vlgmr.msra.gmra.mxu1 %v5128_v42  ;;  %4570 = vmatpush3.bf16.msra.mxu0 %v5153_v17 }
  0xe2   : > { %4772 = vmatpush3.bf16.msra.mxu1 %v5135_v5  ;;  %4787 = vmatprep.mubr.msk.bf16.mxu1 %vm5511_vm7, %v5510_v35 }
  0xe3   : > { %4773 = vmatprep.subr.bf16.mxu1 %v5510_v35  ;;  %4571 = vmatprep.subr.bf16.mxu0 %v5156_v13 }
  0xe5   : > { %4572 = vmatpush3.bf16.msra.mxu0 %v5157_v19 }
  0xe6   : > { %4774 = vmatpush3.bf16.msra.mxu1 %v5136_v9  ;;  %4573 = vmatprep.subr.bf16.mxu0 %v5160_v22 }
  0xe7   : > { %4775 = vmatprep.subr.bf16.mxu1 %v5510_v35 }
  0xe9   : > { %4574 = vmatpush3.bf16.msra.mxu0 %v5161_v25  ;;  %v3612_v25 = vld [vmem:[%s5951_s17] sm:$0xff] }
  0xea   : > { %4776 = vmatpush3.bf16.msra.mxu1 %v5137_v55  ;;  %4575 = vmatprep.subr.bf16.mxu0 %v5164_v27 }
  0xeb   : > { %4777 = vmatprep.subr.bf16.mxu1 %v5510_v35  ;;  %3616 = vperm.xlu1 %5001, %v3612_v25   ;;  %v5202_v25 = vld [vmem:[#allocation7 + $0x1e0] sm:$0xff]  }
  0xed   : > { %4576 = vmatpush3.bf16.msra.mxu0 %v5165_v11 }
  0xee   : > { %4778 = vmatpush3.bf16.msra.mxu1 %v5138_v48  ;;  %4577 = vmatprep.subr.bf16.mxu0 %v5168_v24 }
  0xef   : > { %4779 = vmatprep.subr.bf16.mxu1 %v5510_v35 }
  0xf1   : > { %4578 = vmatpush3.bf16.msra.mxu0 %v5169_v39 }
  0xf2   : > { %4780 = vmatpush3.bf16.msra.mxu1 %v5139_v50  ;;  %4579 = vmatprep.subr.bf16.mxu0 %v5172_v6 }
  0xf3   : > { %4781 = vmatprep.subr.bf16.mxu1 %v5510_v35 }
  0xf5   : > { %4580 = vmatpush3.bf16.msra.mxu0 %v5173_v47 }
  0xf6   : > { %4782 = vmatpush3.bf16.msra.mxu1 %v5140_v52  ;;  %4609 = vmatprep.subr.bf16.mxu0 %v5179_v37 }
  0xf7   : > { %4783 = vmatprep.subr.bf16.mxu1 %v5510_v35 }
  0xfa   : > { %4784 = vmatpush3.bf16.msra.mxu1 %v5141_v54 }
  0xfb   : > { %4785 = vmatprep.subr.bf16.mxu1 %v5510_v35 }
  0xfe   : > { %4786 = vmatpush3.bf16.msra.mxu1 %v5142_v56 }
  0xff   : > { %4587 = vmatprep.subr.bf16.mxu1 %v5146_v63 }
 0x101   : > { %4788 = vmatmul.mubr.bf16.vlgmr.msra.gmra.mxu1 %v5143_v59 }
 0x102   : > { %4588 = vmatpush3.bf16.msra.mxu1 %v5147_v1 }
 0x103   : > { %4589 = vmatprep.subr.bf16.mxu1 %v5150_v10 }
 0x106   : > { %4590 = vmatpush3.bf16.msra.mxu1 %v5151_v14 }
 0x107   : > { %4591 = vmatprep.subr.bf16.mxu1 %v5154_v16 }
 0x10a   : > { %4592 = vmatpush3.bf16.msra.mxu1 %v5155_v28 }
 0x10b   : > { %4593 = vmatprep.subr.bf16.mxu1 %v5158_v20 }
 0x10e   : > { %4594 = vmatpush3.bf16.msra.mxu1 %v5159_v21 }
 0x10f   : > { %4595 = vmatprep.subr.bf16.mxu1 %v5162_v26 }
 0x112   : > { %4596 = vmatpush3.bf16.msra.mxu1 %v5163_v30 }
 0x113   : > { %4597 = vmatprep.subr.bf16.mxu1 %v5166_v23 }
 0x116   : > { %4598 = vmatpush3.bf16.msra.mxu1 %v5167_v36  ;;  %v3613_v36 = vld [vmem:[%s5951_s17 + $0x8] sm:$0xff]  ;;  %s494_s17 = scalar_lea.vmem [#allocation13], %s4099_s29 }
 0x117   : > { %4599 = vmatprep.subr.bf16.mxu1 %v5170_v58  ;;  %3621 = vperm.xlu1 %5001, %v3613_v36   ;;  %v5208_v36 = vld [vmem:[#allocation7 + $0x150] sm:$0xff]   ;;  %s3961_s14 = sshll.u32 %s494_s17, 4  ;;  %s6081_s14 = int_to_ptr.vmem [resolvable:$true] %s3961_s14 }
 0x118   : > { %s5426_s25 = scalar_lea.vmem %s6081_s14, 256  ;;  %p5433_p11 = scmp.lt.s32.totalorder %s6081_s14, %s5431_s15 }
 0x119   : > { %p5427_p7 = scmp.ne.s32.totalorder %s6081_s14, %s5426_s25  ;;  %p5434_p1 = scmp.lt.s32.totalorder %s5432_s18, %s5426_s25 }
 0x11a   : > { %4600 = vmatpush3.bf16.msra.mxu1 %v5171_v34 }
 0x11b   : > { %4601 = vmatprep.subr.bf16.mxu1 %v5174_v12  ;;  %p5428_p8 = pnand %p5427_p7, %p5618_p5  ;;  %p5435_p13 = por %p5434_p1, %p5433_p11 }
 0x11d   : > { %p5429_p0 = pneg %p5428_p8 }
 0x11e   : > { %4602 = vmatpush3.bf16.msra.mxu1 %v5175_v57 }
 0x11f   : > { %4631 = vmatprep.subr.bf16.mxu1 %v5184_v38  ;;  %p5436_p2 = pnand %p5435_p13, %p5429_p0 }
 0x141   : > { %v4418_v40 = vpop.f32.mrf.mxu1 }
 0x143   : > { %v4419_v32 = vpop.f32.mrf.mxu1 }
 0x144   : > { %v4420_v18 = vadd.f32 %v4419_v32, %v4418_v40  ;;  %v2160_v40 = vpop.permute.xlu0 %2159 }
 0x145   : > { %v4421_v2 = vpop.f32.mrf.mxu1 }
 0x146   : > { %v1860_v54 = vadd.f32 %v4420_v18, %v4106_v60 }
 0x147   : > { %v4422_v49 = vpop.f32.mrf.mxu1 }
 0x148   : > { %v4423_v56 = vadd.f32 %v4422_v49, %v4421_v2 }
 0x14a   : > { %v1863_v8 = vadd.f32 %v4423_v56, %v4106_v60 }
 0x158   : > { %v4462_v43 = vpop.f32.mrf.mxu0 }
 0x15a   : > { %v4463_v44 = vpop.f32.mrf.mxu0 }
 0x15b   : > { %v4464_v62 = vadd.f32 %v4463_v44, %v4462_v43 }
 0x15c   : > { %v4465_v41 = vpop.f32.mrf.mxu0 }
 0x15e   : > { %v4466_v42 = vpop.f32.mrf.mxu0 }
 0x15f   : > { %v4467_v16 = vadd.f32 %v4466_v42, %v4465_v41  ;;  %v2165_v41 = vpop.permute.xlu0 %2164 }
 0x161   : > { %v4440_v4 = vpop.f32.mrf.mxu1 }
 0x163   : > { %v4441_v29 = vpop.f32.mrf.mxu1 }
 0x164   : > { %v4442_v50 = vadd.f32 %v4441_v29, %v4440_v4 }
 0x165   : > { %v4443_v31 = vpop.f32.mrf.mxu1 }
 0x166   : > { %v1901_v61 = vadd.f32 %v4442_v50, %v1860_v54 }
 0x167   : > { %v4444_v51 = vpop.f32.mrf.mxu1 }
 0x168   : > { %v4445_v63 = vadd.f32 %v4444_v51, %v4443_v31  ;;  %v1942_v14 = vadd.f32 %v4464_v62, %v1901_v61 }
 0x16a   : > { %v1904_v15 = vadd.f32 %v4445_v63, %v1863_v8  ;;  %v5185_v8 = vld [vmem:[#allocation7 + $0x1b8] sm:$0xff]  }
 0x16c   : > { %v1945_v21 = vadd.f32 %v4467_v16, %v1904_v15  ;;  %v5187_v15 = vld [vmem:[#allocation7 + $0x130] sm:$0xff]   ;;  %v5196_v16 = vld [vmem:[#allocation7 + $0x168] sm:$0xff]  }
 0x178   : > { %v4506_v46 = vpop.f32.mrf.mxu0 }
 0x17a   : > { %v4507_v9 = vpop.f32.mrf.mxu0 }
 0x17b   : > { %v4508_v19 = vadd.f32 %v4507_v9, %v4506_v46 }
 0x17c   : > { %v4509_v48 = vpop.f32.mrf.mxu0 }
 0x17e   : > { %v4510_v59 = vpop.f32.mrf.mxu0 }
 0x17f   : > { %v4511_v23 = vadd.f32 %v4510_v59, %v4509_v48 }
 0x181   : > { %v4484_v5 = vpop.f32.mrf.mxu1 }
 0x183   : > { %v4485_v45 = vpop.f32.mrf.mxu1 }
 0x184   : > { %v4486_v10 = vadd.f32 %v4485_v45, %v4484_v5 }
 0x185   : > { %v4487_v0 = vpop.f32.mrf.mxu1 }
 0x186   : > { %v1983_v13 = vadd.f32 %v4486_v10, %v1942_v14  ;;  %v5194_v14 = vld [vmem:[#allocation7 + $0x1f0] sm:$0xff]  }
 0x187   : > { %v4488_v55 = vpop.f32.mrf.mxu1 }
 0x188   : > { %v4489_v20 = vadd.f32 %v4488_v55, %v4487_v0  ;;  %v2024_v27 = vadd.f32 %v4508_v19, %v1983_v13  ;;  %v5198_v19 = vld [vmem:[#allocation7 + $0x1e8] sm:$0xff]  }
 0x18a   : > { %v1986_v11 = vadd.f32 %v4489_v20, %v1945_v21  ;;  %v5197_v20 = vld [vmem:[#allocation7 + $0x128] sm:$0xff]   ;;  %v5200_v21 = vld [vmem:[#allocation7 + $0x160] sm:$0xff]  }
 0x18c   : > { %v2027_v6 = vadd.f32 %v4511_v23, %v1986_v11  ;;  %v5206_v11 = vld [vmem:[#allocation7 + $0x1d8] sm:$0xff]  }
 0x18d   : > { %v5205_v23 = vld [vmem:[#allocation7 + $0x118] sm:$0xff]  }
 0x198   : > { %v4550_v7 = vpop.f32.mrf.mxu0 }
 0x19a   : > { %v4551_v28 = vpop.f32.mrf.mxu0 }
 0x19b   : > { %v4552_v39 = vadd.f32 %v4551_v28, %v4550_v7  ;;  %v5195_v28 = vld [vmem:[#allocation7 + $0x1b0] sm:$0xff]  }
 0x19c   : > { %v4553_v30 = vpop.f32.mrf.mxu0 }
 0x19e   : > { %v4554_v34 = vpop.f32.mrf.mxu0 }
 0x19f   : > { %v4555_v12 = vadd.f32 %v4554_v34, %v4553_v30  ;;  %v5204_v30 = vld [vmem:[#allocation7 + $0x158] sm:$0xff]   ;;  %v5212_v34 = vld [vmem:[#allocation7 + $0x148] sm:$0xff]  }
 0x1a1   : > { %v4528_v52 = vpop.f32.mrf.mxu1 }
 0x1a3   : > { %v4529_v1 = vpop.f32.mrf.mxu1 }
 0x1a4   : > { %v4530_v22 = vadd.f32 %v4529_v1, %v4528_v52  ;;  %v5180_v1 = vld [vmem:[#allocation7 + $0x138] sm:$0xff]  }
 0x1a5   : > { %v4531_v17 = vpop.f32.mrf.mxu1 }
 0x1a6   : > { %v2065_v24 = vadd.f32 %v4530_v22, %v2024_v27  ;;  %v5199_v22 = vld [vmem:[#allocation7 + $0x1a8] sm:$0xff]   ;;  %v5203_v27 = vld [vmem:[#allocation7 + $0x1a0] sm:$0xff]  }
 0x1a7   : > { %v4532_v26 = vpop.f32.mrf.mxu1 }
 0x1a8   : > { %v4533_v58 = vadd.f32 %v4532_v26, %v4531_v17  ;;  %v2106_v57 = vadd.f32 %v4552_v39, %v2065_v24  ;;  %v5201_v26 = vld [vmem:[#allocation7 + $0x120] sm:$0xff]   ;;  %v5207_v24 = vld [vmem:[#allocation7 + $0x198] sm:$0xff]   ;;  %v5210_v39 = vld [vmem:[#allocation7 + $0x1d0] sm:$0xff]  }
 0x1aa   : > { %v2068_v47 = vadd.f32 %v4533_v58, %v2027_v6  ;;  %v5209_v58 = vld [vmem:[#allocation7 + $0x110] sm:$0xff]  }
 0x1ab   : > { %v5211_v6 = vld [vmem:[#allocation7 + $0x190] sm:$0xff]  }
 0x1ac   : > { %v2109_v49 = vadd.f32 %v4555_v12, %v2068_v47  ;;  %v5214_v47 = vld [vmem:[#allocation7 + $0x1c8] sm:$0xff]  }
 0x1ad   : > { %v5213_v12 = vld [vmem:[#allocation7 + $0x108] sm:$0xff]  }
 0x1c1   : > { %v2146_v37 = vpop.f32.mrf.mxu1 }
 0x1c2   : > { %v2147_v38 = vadd.f32 %v2146_v37, %v2106_v57  ;;  %v5216_v57 = vld [vmem:[#allocation7 + $0x140] sm:$0xff]   ;;  %v5215_v37 = vld [vmem:[#allocation7 + $0x188] sm:$0xff]  }
 0x1c3   : > { %v4789_v32 = vpop.f32.mrf.mxu1 }
 0x1c4   : > { %v2153_v2 = vmax.f32 %v2147_v38, 0.0  ;;  %v5218_v38 = vld [vmem:[#allocation7 + $0x1c0] sm:$0xff]   ;;  %v5220_v32 = vld [vmem:[#allocation7 + $0x278] sm:$0xff]  }
 0x1c5   : > { %v2149_v4 = vpop.f32.mrf.mxu1 }
 0x1c6   : > { %v2167_v29 = vmul.f32 %v2160_v40, %v2153_v2  ;;  %v2150_v43 = vadd.f32 %v2149_v4, %v2109_v49  ;;  %v5217_v40 = vld [vmem:[#allocation7 + $0x100] sm:$0xff]   ;;  %v5225_v49 = vld [vmem:[#allocation7 + $0x2f8] sm:$0xff]  }
 0x1c7   : > { %v4790_v31 = vpop.f32.mrf.mxu1  ;;  %v5219_v2 = vld [vmem:[#allocation7 + $0x180] sm:$0xff]   ;;  %v5221_v4 = vld [vmem:[#allocation7 + $0x238] sm:$0xff]  }
 0x1c8   : > { %v4399_v44 = vpack.c.bf16 %v2167_v29, %v2167_v29  ;;  %v2154_v51 = vmax.f32 %v2150_v43, 0.0  ;;  %v5230_v43 = vld [vmem:[#allocation7 + $0x270] sm:$0xff]  }
 0x1ca   : > { %v2173_v5 = vrot.slane %v4399_v44, 5  ;;  %v2176_v42 = vrot.slane %v4399_v44, 6  ;;  %v2179_v45 = vrot.slane %v4399_v44, 7  ;;  %2205 = vst [vmem:[#allocation3 + $0x1c] sm:$0xf] %v4399_v44  ;;  %v2168_v46 = vmul.f32 %v2165_v41, %v2154_v51  ;;  %v5226_v44 = vld [vmem:[#allocation7 + $0x2b8] sm:$0xff]  }
 0x1cb   : > { %v5232_v41 = vld [vmem:[#allocation7 + $0x2f0] sm:$0xff]  }
 0x1cc   : > { %2175 = vst [vmem:[#allocation3 + $0x3c] sm:$0x8] %v2173_v5  ;;  %2178 = vst [vmem:[#allocation3 + $0x40] sm:$0xc] %v2176_v42  ;;  %v2169_v0 = vpack.c.bf16 %v2168_v46, %v2167_v29  ;;  %v4400_v9 = vpack.c.bf16 %v2168_v46, %v2168_v46  ;;  %v2185_v18 = vrot.slane %v2173_v5, 4  ;;  %v2191_v60 = vrot.slane %v2176_v42, 4 }
 0x1cd   : > { %2189 = vst [vmem:[#allocation3 + $0x10] sm:$0x8] %v2173_v5  ;;  %2195 = vst [vmem:[#allocation3 + $0x14] sm:$0xc] %v2176_v42  ;;  %v2197_v55 = vrot.slane %v2179_v45, 4  ;;  %v5231_v42 = vld [vmem:[#allocation7 + $0x230] sm:$0xff]  }
 0x1ce   : > { %2201 = vst [vmem:[#allocation3 + $0x18] sm:$0xe] %v2179_v45  ;;  %2181 = vst [vmem:[#allocation3 + $0x44] sm:$0xe] %v2179_v45  ;;  %v2186_v48 = vrot.slane %v4400_v9, 5  ;;  %v2192_v50 = vrot.slane %v4400_v9, 6 }
 0x1cf   : > { %2182 = vst [vmem:[#allocation3 + $0x48] sm:$0xf] %v2169_v0  ;;  %v2198_v52 = vrot.slane %v4400_v9, 7  ;;  %2206 = vst [vmem:[#allocation3 + $0x58] sm:$0xf] %v4400_v9  ;;  %v5234_v45 = vld [vmem:[#allocation7 + $0x268] sm:$0xff]  }
 0x1d0   : > { %2219 = vst [vmem:[#allocation3 + $0x2c] sm:$0xf] %v4400_v9  ;;  %v2187_v54 = vsel %vm5775_vm5, %v2185_v18, %v2186_v48  ;;  %v2193_v56 = vsel %vm5845_vm0, %v2191_v60, %v2192_v50  ;;  %v2207_v61 = vrot.slane %v2186_v48, 4  ;;  %v2211_v62 = vrot.slane %v2192_v50, 4  ;;  %v5233_v46 = vld [vmem:[#allocation7 + $0x2b0] sm:$0xff]   ;;  %v5236_v0 = vld [vmem:[#allocation7 + $0x2e8] sm:$0xff]  }
 0x1d1   : > { %v2199_v59 = vsel %vm5875_vm14, %v2197_v55, %v2198_v52  ;;  %2190 = vst [vmem:[#allocation3 + $0x4c] sm:$0xf] %v2187_v54  ;;  %2196 = vst [vmem:[#allocation3 + $0x50] sm:$0xf] %v2193_v56  ;;  %v2215_v63 = vrot.slane %v2198_v52, 4  ;;  %v5235_v9 = vld [vmem:[#allocation7 + $0x228] sm:$0xff]  }
 0x1d2   : > { %2202 = vst [vmem:[#allocation3 + $0x54] sm:$0xf] %v2199_v59  ;;  %2209 = vst [vmem:[#allocation3 + $0x20] sm:$0xf] %v2187_v54  ;;  %v5238_v18 = vld [vmem:[#allocation7 + $0x260] sm:$0xff]   ;;  %v5237_v60 = vld [vmem:[#allocation7 + $0x2a8] sm:$0xff]  }
 0x1d3   : > { %2213 = vst [vmem:[#allocation3 + $0x24] sm:$0xf] %v2193_v56  ;;  %2217 = vst [vmem:[#allocation3 + $0x28] sm:$0xf] %v2199_v59  ;;  %v5176_v33 = vld [vmem:[#allocation3] ss:$60 sps:$4 sm:$0xff]  }
 0x1d4   : > { %2210 = vst [vmem:[#allocation3 + $0x5c] sm:$0x7] %v2207_v61  ;;  %2220 = vst [vmem:[#allocation3 + $0x30] sm:$0x7] %v2207_v61  ;;  %v5178_v7 = vld [vmem:[#allocation3 + $0x4] ss:$60 sps:$4 sm:$0xff]  }
 0x1d5   : > { %2214 = vst [vmem:[#allocation3 + $0x60] sm:$0x3] %v2211_v62  ;;  %2218 = vst [vmem:[#allocation3 + $0x64] sm:$0x1] %v2215_v63  ;;  %3314 = vmatprep.mubr.bf16.mxu0 %v5178_v7  ;;  %v5181_v3 = vld [vmem:[#allocation3 + $0x8] ss:$60 sps:$4 sm:$0xff]  }
 0x1d6   : > { %2221 = vst [vmem:[#allocation3 + $0x34] sm:$0x3] %v2211_v62  ;;  %2222 = vst [vmem:[#allocation3 + $0x38] sm:$0x1] %v2215_v63  ;;  %v5183_v10 = vld [vmem:[#allocation3 + $0xc] ss:$60 sps:$4 sm:$0xff]   ;;  %3315 = vmatmul.mubr.bf16.vlgmr.msra.gmra.mxu0 %v5176_v33 }
 0x1d7   : > { %4610 = vmatpush3.bf16.msra.mxu0 %v5180_v1  ;;  %3355 = vmatprep.mubr.bf16.mxu1 %v5183_v10  ;;  %v5193_v13 = vld [vmem:[#allocation3 + $0x1c] ss:$60 sps:$4 sm:$0xff]   ;;  %v5229_v5 = vld [vmem:[#allocation3 + $0x2c] ss:$60 sps:$4 sm:$0xff]   ;;  %v5242_v50 = vld [vmem:[#allocation7 + $0x258] sm:$0xff]  }
 0x1d8   : > { %3356 = vmatmul.mubr.bf16.vlgmr.msra.gmra.mxu1 %v5181_v3  ;;  %4611 = vmatprep.subr.bf16.mxu0 %v5186_v53  ;;  %v5190_v17 = vld [vmem:[#allocation3 + $0x14] ss:$60 sps:$4 sm:$0xff]   ;;  %v5240_v55 = vld [vmem:[#allocation7 + $0x2e0] sm:$0xff]   ;;  %v5246_v59 = vld [vmem:[#allocation7 + $0x250] sm:$0xff]  }
 0x1d9   : > { %4632 = vmatpush3.bf16.msra.mxu1 %v5185_v8  ;;  %3396 = vmatprep.mubr.bf16.mxu0 %v5190_v17  ;;  %v5188_v29 = vld [vmem:[#allocation3 + $0x10] ss:$60 sps:$4 sm:$0xff]   ;;  %v5191_v51 = vld [vmem:[#allocation3 + $0x18] ss:$60 sps:$4 sm:$0xff]   ;;  %v5250_v1 = vld [vmem:[#allocation7 + $0x248] sm:$0xff]  }
 0x1da   : > { %4633 = vmatprep.subr.bf16.mxu1 %v5194_v14  ;;  %3437 = vmatprep.mubr.bf16.mxu1 %v5193_v13  ;;  %v5239_v48 = vld [vmem:[#allocation7 + $0x220] sm:$0xff]   ;;  %v5244_v54 = vld [vmem:[#allocation7 + $0x2d8] sm:$0xff]   ;;  %v5248_v62 = vld [vmem:[#allocation7 + $0x2d0] sm:$0xff]  }
 0x1db   : > { %4612 = vmatpush3.bf16.msra.mxu0 %v5187_v15  ;;  %v5241_v52 = vld [vmem:[#allocation7 + $0x2a0] sm:$0xff]   ;;  %v5243_v56 = vld [vmem:[#allocation7 + $0x218] sm:$0xff]   ;;  %v5247_v63 = vld [vmem:[#allocation7 + $0x210] sm:$0xff]  }
 0x1dc   : > { %4613 = vmatprep.subr.bf16.mxu0 %v5196_v16  ;;  %v5224_v31 = vld [vmem:[#allocation3 + $0x24] ss:$60 sps:$4 sm:$0xff]   ;;  %v5245_v61 = vld [vmem:[#allocation7 + $0x298] sm:$0xff]   ;;  %v5249_v33 = vld [vmem:[#allocation7 + $0x290] sm:$0xff]  }
 0x1dd   : > { %4634 = vmatpush3.bf16.msra.mxu1 %v5195_v28  ;;  %v5252_v7 = vld [vmem:[#allocation7 + $0x2c8] sm:$0xff]   ;;  %v5254_v53 = vld [vmem:[#allocation7 + $0x240] sm:$0xff]   ;;  %v5258_v15 = vld [vmem:[#allocation7 + $0x378] sm:$0xff]  }
 0x1de   : > { %4635 = vmatprep.subr.bf16.mxu1 %v5198_v19  ;;  %v5251_v8 = vld [vmem:[#allocation7 + $0x208] sm:$0xff]   ;;  %v5256_v10 = vld [vmem:[#allocation7 + $0x2c0] sm:$0xff]   ;;  %v5992_v17 = vld [vmem:[#allocation3 + $0x30] sm:$0xff] }
 0x1df   : > { %4614 = vmatpush3.bf16.msra.mxu0 %v5197_v20  ;;  %v5253_v3 = vld [vmem:[#allocation7 + $0x288] sm:$0xff]   ;;  %v5255_v14 = vld [vmem:[#allocation7 + $0x200] sm:$0xff]   ;;  %v5259_v28 = vld [vmem:[#allocation7 + $0x338] sm:$0xff]  }
 0x1e0   : > { %4615 = vmatprep.subr.bf16.mxu0 %v5200_v21  ;;  %v5257_v16 = vld [vmem:[#allocation7 + $0x280] sm:$0xff]   ;;  %v5261_v19 = vld [vmem:[#allocation7 + $0x370] sm:$0xff]  }
 0x1e1   : > { %4636 = vmatpush3.bf16.msra.mxu1 %v5199_v22  ;;  %v5222_v13 = vld [vmem:[#allocation3 + $0x20] ss:$60 sps:$4 sm:$0xff]   ;;  %v5295_v20 = vld [vmem:[#allocation3 + $0x6c] sm:$0xff] }
 0x1e2   : > { %4637 = vmatprep.subr.bf16.mxu1 %v5202_v25  ;;  %v4258_v21 = vcombine.high %v5992_v17, %v5295_v20  ;;  %v5260_v22 = vld [vmem:[#allocation7 + $0x3b8] sm:$0xff]   ;;  %v5227_v25 = vld [vmem:[#allocation3 + $0x28] ss:$60 sps:$4 sm:$0xff]  }
 0x1e3   : > { %4616 = vmatpush3.bf16.msra.mxu0 %v5201_v26  ;;  %v5262_v26 = vld [vmem:[#allocation7 + $0x330] sm:$0xff]  }
 0x1e4   : > { %4617 = vmatprep.subr.bf16.mxu0 %v5204_v30  ;;  %v5264_v30 = vld [vmem:[#allocation7 + $0x368] sm:$0xff]  }
 0x1e5   : > { %4638 = vmatpush3.bf16.msra.mxu1 %v5203_v27  ;;  %v5263_v27 = vld [vmem:[#allocation7 + $0x3b0] sm:$0xff]  }
 0x1e6   : > { %4639 = vmatprep.subr.bf16.mxu1 %v5206_v11  ;;  %v5265_v11 = vld [vmem:[#allocation7 + $0x328] sm:$0xff]  }
 0x1e7   : > { %4618 = vmatpush3.bf16.msra.mxu0 %v5205_v23  ;;  %v5267_v23 = vld [vmem:[#allocation7 + $0x360] sm:$0xff]  }
 0x1e8   : > { %4619 = vmatprep.subr.bf16.mxu0 %v5208_v36  ;;  %v5266_v36 = vld [vmem:[#allocation7 + $0x3a8] sm:$0xff]  }
 0x1e9   : > { %4640 = vmatpush3.bf16.msra.mxu1 %v5207_v24  ;;  %v5268_v24 = vld [vmem:[#allocation7 + $0x320] sm:$0xff]  }
 0x1ea   : > { %4641 = vmatprep.subr.bf16.mxu1 %v5210_v39  ;;  %v5270_v39 = vld [vmem:[#allocation7 + $0x358] sm:$0xff]  }
 0x1eb   : > { %4620 = vmatpush3.bf16.msra.mxu0 %v5209_v58  ;;  %v5269_v58 = vld [vmem:[#allocation7 + $0x3a0] sm:$0xff]  }
 0x1ec   : > { %4621 = vmatprep.subr.bf16.mxu0 %v5212_v34  ;;  %v5271_v34 = vld [vmem:[#allocation7 + $0x318] sm:$0xff]  }
 0x1ed   : > { %4642 = vmatpush3.bf16.msra.mxu1 %v5211_v6  ;;  %v5273_v6 = vld [vmem:[#allocation7 + $0x350] sm:$0xff]  }
 0x1ee   : > { %4643 = vmatprep.subr.bf16.mxu1 %v5214_v47  ;;  %v5272_v47 = vld [vmem:[#allocation7 + $0x398] sm:$0xff]  }
 0x1ef   : > { %4622 = vmatpush3.bf16.msra.mxu0 %v5213_v12  ;;  %v5274_v12 = vld [vmem:[#allocation7 + $0x310] sm:$0xff]  }
 0x1f0   : > { %4623 = vmatprep.subr.bf16.mxu0 %v5216_v57  ;;  %v5276_v57 = vld [vmem:[#allocation7 + $0x348] sm:$0xff]  }
 0x1f1   : > { %4644 = vmatpush3.bf16.msra.mxu1 %v5215_v37  ;;  %v5275_v37 = vld [vmem:[#allocation7 + $0x390] sm:$0xff]  }
 0x1f2   : > { %4645 = vmatprep.subr.bf16.mxu1 %v5218_v38  ;;  %v5277_v38 = vld [vmem:[#allocation7 + $0x308] sm:$0xff]  }
 0x1f3   : > { %4624 = vmatpush3.bf16.msra.mxu0 %v5217_v40  ;;  %v5279_v40 = vld [vmem:[#allocation7 + $0x340] sm:$0xff]  }
 0x1f4   : > { %4653 = vmatprep.subr.bf16.mxu0 %v5220_v32  ;;  %v5278_v32 = vld [vmem:[#allocation7 + $0x388] sm:$0xff]  }
 0x1f5   : > { %4646 = vmatpush3.bf16.msra.mxu1 %v5219_v2  ;;  %v5280_v2 = vld [vmem:[#allocation7 + $0x300] sm:$0xff]  }
 0x1f6   : > { %3397 = vmatmul.mubr.bf16.vlgmr.msra.gmra.mxu0 %v5188_v29  ;;  %4675 = vmatprep.subr.bf16.mxu1 %v5225_v49  ;;  %v5281_v49 = vld [vmem:[#allocation7 + $0x380] sm:$0xff]  }
 0x1f7   : > { %4654 = vmatpush3.bf16.msra.mxu0 %v5221_v4  ;;  %3478 = vmatprep.mubr.bf16.mxu0 %v5224_v31  ;;  %v4257_v4 = vcombine.low %v5992_v17, %v5295_v20  ;;  %v5282_v29 = vld [vmem:[#allocation3 + $0x38] ss:$60 sps:$4 sm:$0xff]   ;;  %v3651_v31 = vld [vmem:[#allocation9 + $0x70] sm:$0xff] }
 0x1f8   : > { %3438 = vmatmul.mubr.bf16.vlgmr.msra.gmra.mxu1 %v5191_v51  ;;  %4655 = vmatprep.subr.bf16.mxu0 %v5230_v43  ;;  %v3652_v43 = vld [vmem:[#allocation9 + $0x78] sm:$0xff]  ;;  %v3649_v51 = vld [vmem:[#allocation9 + $0x60] sm:$0xff] }
 0x1f9   : > { %4676 = vmatpush3.bf16.msra.mxu1 %v5226_v44  ;;  %3519 = vmatprep.mubr.bf16.mxu1 %v5229_v5  ;;  %v3650_v44 = vld [vmem:[#allocation9 + $0x68] sm:$0xff]  ;;  %v3647_v5 = vld [vmem:[#allocation9 + $0x50] sm:$0xff] }
 0x1fa   : > { %4677 = vmatprep.subr.bf16.mxu1 %v5232_v41  ;;  %v3648_v41 = vld [vmem:[#allocation9 + $0x58] sm:$0xff] }
 0x1fb   : > { %4656 = vmatpush3.bf16.msra.mxu0 %v5231_v42  ;;  %v3646_v42 = vld [vmem:[#allocation9 + $0x48] sm:$0xff] }
 0x1fc   : > { %4657 = vmatprep.subr.bf16.mxu0 %v5234_v45  ;;  %v3645_v45 = vld [vmem:[#allocation9 + $0x40] sm:$0xff] }
 0x1fd   : > { %4678 = vmatpush3.bf16.msra.mxu1 %v5233_v46  ;;  %v3644_v46 = vld [vmem:[#allocation9 + $0x38] sm:$0xff] }
 0x1fe   : > { %4679 = vmatprep.subr.bf16.mxu1 %v5236_v0  ;;  %v3643_v0 = vld [vmem:[#allocation9 + $0x30] sm:$0xff] }
 0x1ff   : > { %4658 = vmatpush3.bf16.msra.mxu0 %v5235_v9  ;;  %v3642_v9 = vld [vmem:[#allocation9 + $0x28] sm:$0xff] }
 0x200   : > { %4659 = vmatprep.subr.bf16.mxu0 %v5238_v18  ;;  %v3641_v18 = vld [vmem:[#allocation9 + $0x20] sm:$0xff] }
 0x201   : > { %4680 = vmatpush3.bf16.msra.mxu1 %v5237_v60  ;;  %v3640_v60 = vld [vmem:[#allocation9 + $0x18] sm:$0xff] }
 0x202   : > { %4681 = vmatprep.subr.bf16.mxu1 %v5240_v55  ;;  %v3639_v55 = vld [vmem:[#allocation9 + $0x10] sm:$0xff] }
 0x203   : > { %4660 = vmatpush3.bf16.msra.mxu0 %v5239_v48  ;;  %v3638_v48 = vld [vmem:[#allocation9 + $0x8] sm:$0xff] }
 0x204   : > { %4661 = vmatprep.subr.bf16.mxu0 %v5242_v50  ;;  %v3637_v50 = vld [vmem:[#allocation9] sm:$0xff] }
 0x205   : > { %4682 = vmatpush3.bf16.msra.mxu1 %v5241_v52  ;;  %v3740_v52 = vld [vmem:[#allocation10 + $0x78] sm:$0xff] }
 0x206   : > { %4683 = vmatprep.subr.bf16.mxu1 %v5244_v54  ;;  %v3739_v54 = vld [vmem:[#allocation10 + $0x70] sm:$0xff] }
 0x207   : > { %4662 = vmatpush3.bf16.msra.mxu0 %v5243_v56  ;;  %v3738_v56 = vld [vmem:[#allocation10 + $0x68] sm:$0xff] }
 0x208   : > { %4663 = vmatprep.subr.bf16.mxu0 %v5246_v59  ;;  %v3737_v59 = vld [vmem:[#allocation10 + $0x60] sm:$0xff] }
 0x209   : > { %4684 = vmatpush3.bf16.msra.mxu1 %v5245_v61  ;;  %v3736_v61 = vld [vmem:[#allocation10 + $0x58] sm:$0xff] }
 0x20a   : > { %4685 = vmatprep.subr.bf16.mxu1 %v5248_v62  ;;  %v3735_v62 = vld [vmem:[#allocation10 + $0x50] sm:$0xff] }
 0x20b   : > { %4664 = vmatpush3.bf16.msra.mxu0 %v5247_v63  ;;  %v3734_v63 = vld [vmem:[#allocation10 + $0x48] sm:$0xff] }
 0x20c   : > { %4665 = vmatprep.subr.bf16.mxu0 %v5250_v1  ;;  %v3733_v1 = vld [vmem:[#allocation10 + $0x40] sm:$0xff] }
 0x20d   : > { %4686 = vmatpush3.bf16.msra.mxu1 %v5249_v33  ;;  %v3732_v33 = vld [vmem:[#allocation10 + $0x38] sm:$0xff] }
 0x20e   : > { %4687 = vmatprep.subr.bf16.mxu1 %v5252_v7  ;;  %v3731_v7 = vld [vmem:[#allocation10 + $0x30] sm:$0xff] }
 0x20f   : > { %4666 = vmatpush3.bf16.msra.mxu0 %v5251_v8  ;;  %v3730_v8 = vld [vmem:[#allocation10 + $0x28] sm:$0xff] }
 0x210   : > { %4667 = vmatprep.subr.bf16.mxu0 %v5254_v53  ;;  %v3729_v53 = vld [vmem:[#allocation10 + $0x20] sm:$0xff] }
 0x211   : > { %4688 = vmatpush3.bf16.msra.mxu1 %v5253_v3  ;;  %v3728_v3 = vld [vmem:[#allocation10 + $0x18] sm:$0xff] }
 0x212   : > { %4689 = vmatprep.subr.bf16.mxu1 %v5256_v10 }
 0x213   : > { %4668 = vmatpush3.bf16.msra.mxu0 %v5255_v14 }
 0x214   : > { %4697 = vmatprep.subr.bf16.mxu0 %v5258_v15 }
 0x215   : > { %4690 = vmatpush3.bf16.msra.mxu1 %v5257_v16 }
 0x216   : > { %3479 = vmatmul.mubr.bf16.vlgmr.msra.gmra.mxu0 %v5222_v13  ;;  %4791 = vmatprep.subr.bf16.mxu1 %v5510_v35 }
 0x217   : > { %4698 = vmatpush3.bf16.msra.mxu0 %v5259_v28  ;;  %3560 = vmatprep.mubr.bf16.mxu0 %v4258_v21 }
 0x218   : > { %3520 = vmatmul.mubr.bf16.vlgmr.msra.gmra.mxu1 %v5227_v25  ;;  %4699 = vmatprep.subr.bf16.mxu0 %v5261_v19 }
 0x219   : > { %4792 = vmatpush3.bf16.msra.mxu1 %v5260_v22  ;;  %4807 = vmatprep.mubr.msk.bf16.mxu1 %vm5511_vm7, %v5510_v35 }
 0x21a   : > { %4793 = vmatprep.subr.bf16.mxu1 %v5510_v35 }
 0x21b   : > { %4700 = vmatpush3.bf16.msra.mxu0 %v5262_v26 }
 0x21c   : > { %4701 = vmatprep.subr.bf16.mxu0 %v5264_v30 }
 0x21d   : > { %4794 = vmatpush3.bf16.msra.mxu1 %v5263_v27 }
 0x21e   : > { %4795 = vmatprep.subr.bf16.mxu1 %v5510_v35 }
 0x21f   : > { %4702 = vmatpush3.bf16.msra.mxu0 %v5265_v11 }
 0x220   : > { %4703 = vmatprep.subr.bf16.mxu0 %v5267_v23  ;;  %v4244_v23 = vld [vmem:[%s6128_s5] ss:$0 sm:$0xff] }
 0x221   : > { %4796 = vmatpush3.bf16.msra.mxu1 %v5266_v36 }
 0x222   : > { %4797 = vmatprep.subr.bf16.mxu1 %v5510_v35 }
 0x223   : > { %4704 = vmatpush3.bf16.msra.mxu0 %v5268_v24 }
 0x224   : > { %4705 = vmatprep.subr.bf16.mxu0 %v5270_v39 }
 0x225   : > { %4798 = vmatpush3.bf16.msra.mxu1 %v5269_v58 }
 0x226   : > { %4799 = vmatprep.subr.bf16.mxu1 %v5510_v35 }
 0x227   : > { %4706 = vmatpush3.bf16.msra.mxu0 %v5271_v34 }
 0x228   : > { %4707 = vmatprep.subr.bf16.mxu0 %v5273_v6 }
 0x229   : > { %4800 = vmatpush3.bf16.msra.mxu1 %v5272_v47 }
 0x22a   : > { %4801 = vmatprep.subr.bf16.mxu1 %v5510_v35 }
 0x22b   : > { %4708 = vmatpush3.bf16.msra.mxu0 %v5274_v12 }
 0x22c   : > { %4709 = vmatprep.subr.bf16.mxu0 %v5276_v57 }
 0x22d   : > { %4802 = vmatpush3.bf16.msra.mxu1 %v5275_v37 }
 0x22e   : > { %4803 = vmatprep.subr.bf16.mxu1 %v5510_v35 }
 0x22f   : > { %4710 = vmatpush3.bf16.msra.mxu0 %v5277_v38 }
 0x230   : > { %4711 = vmatprep.subr.bf16.mxu0 %v5279_v40 }
 0x231   : > { %4804 = vmatpush3.bf16.msra.mxu1 %v5278_v32 }
 0x232   : > { %4805 = vmatprep.subr.bf16.mxu1 %v5510_v35 }
 0x233   : > { %4712 = vmatpush3.bf16.msra.mxu0 %v5280_v2 }
 0x234   : > { %4811 = vmatprep.subr.mxu0 %v5510_v35 }
 0x235   : > { %4806 = vmatpush3.bf16.msra.mxu1 %v5281_v49 }
 0x236   : > { %3561 = vmatmul.mubr.bf16.vlgmr.msra.gmra.mxu0 %v4257_v4  ;;  %4846 = vmatprep.subr.mxu1 %v5510_v35 }
 0x237   : > { %4843 = vmatprep.mubr.msk.f32.mxu0 %vm5511_vm7, %v5510_v35  ;;  %4812 = vmatpush3.msra.mxu0 %v3652_v43 }
 0x238   : > { %4808 = vmatmul.mubr.bf16.vlgmr.msra.gmra.mxu1 %v5282_v29  ;;  %4813 = vmatprep.subr.mxu0 %v5510_v35 }
 0x239   : > { %4878 = vmatprep.mubr.msk.f32.mxu1 %vm5511_vm7, %v5510_v35  ;;  %4814 = vmatpush3.msra.mxu0 %v3651_v31 }
 0x23a   : > { %4815 = vmatprep.subr.mxu0 %v5510_v35  ;;  %4847 = vmatpush3.msra.mxu1 %v3740_v52 }
 0x23b   : > { %4816 = vmatpush3.msra.mxu0 %v3650_v44  ;;  %4848 = vmatprep.subr.mxu1 %v5510_v35 }
 0x23c   : > { %4817 = vmatprep.subr.mxu0 %v5510_v35  ;;  %4849 = vmatpush3.msra.mxu1 %v3739_v54 }
 0x23d   : > { %4818 = vmatpush3.msra.mxu0 %v3649_v51  ;;  %4850 = vmatprep.subr.mxu1 %v5510_v35 }
 0x23e   : > { %4819 = vmatprep.subr.mxu0 %v5510_v35  ;;  %4851 = vmatpush3.msra.mxu1 %v3738_v56 }
 0x23f   : > { %4820 = vmatpush3.msra.mxu0 %v3648_v41  ;;  %4852 = vmatprep.subr.mxu1 %v5510_v35 }
 0x240   : > { %4821 = vmatprep.subr.mxu0 %v5510_v35  ;;  %4853 = vmatpush3.msra.mxu1 %v3737_v59 }
 0x241   : > { %4822 = vmatpush3.msra.mxu0 %v3647_v5  ;;  %4854 = vmatprep.subr.mxu1 %v5510_v35 }
 0x242   : > { %4823 = vmatprep.subr.mxu0 %v5510_v35  ;;  %4855 = vmatpush3.msra.mxu1 %v3736_v61 }
 0x243   : > { %4824 = vmatpush3.msra.mxu0 %v3646_v42  ;;  %4856 = vmatprep.subr.mxu1 %v5510_v35 }
 0x244   : > { %4825 = vmatprep.subr.mxu0 %v5510_v35  ;;  %4857 = vmatpush3.msra.mxu1 %v3735_v62 }
 0x245   : > { %4826 = vmatpush3.msra.mxu0 %v3645_v45  ;;  %4858 = vmatprep.subr.mxu1 %v5510_v35 }
 0x246   : > { %4827 = vmatprep.subr.mxu0 %v5510_v35  ;;  %4859 = vmatpush3.msra.mxu1 %v3734_v63 }
 0x247   : > { %4828 = vmatpush3.msra.mxu0 %v3644_v46  ;;  %4860 = vmatprep.subr.mxu1 %v5510_v35 }
 0x248   : > { %4829 = vmatprep.subr.mxu0 %v5510_v35  ;;  %4861 = vmatpush3.msra.mxu1 %v3733_v1 }
 0x249   : > { %4830 = vmatpush3.msra.mxu0 %v3643_v0  ;;  %4862 = vmatprep.subr.mxu1 %v5510_v35 }
 0x24a   : > { %4831 = vmatprep.subr.mxu0 %v5510_v35  ;;  %4863 = vmatpush3.msra.mxu1 %v3732_v33 }
 0x24b   : > { %4832 = vmatpush3.msra.mxu0 %v3642_v9  ;;  %4864 = vmatprep.subr.mxu1 %v5510_v35 }
 0x24c   : > { %4833 = vmatprep.subr.mxu0 %v5510_v35  ;;  %4865 = vmatpush3.msra.mxu1 %v3731_v7 }
 0x24d   : > { %4834 = vmatpush3.msra.mxu0 %v3641_v18  ;;  %4866 = vmatprep.subr.mxu1 %v5510_v35 }
 0x24e   : > { %4835 = vmatprep.subr.mxu0 %v5510_v35  ;;  %4867 = vmatpush3.msra.mxu1 %v3730_v8  ;;  %v3617_v8 = vpop.permute.xlu1 %3616 }
 0x24f   : > { %4836 = vmatpush3.msra.mxu0 %v3640_v60  ;;  %4868 = vmatprep.subr.mxu1 %v5510_v35 }
 0x250   : > { %4837 = vmatprep.subr.mxu0 %v5510_v35  ;;  %4869 = vmatpush3.msra.mxu1 %v3729_v53 }
 0x251   : > { %4838 = vmatpush3.msra.mxu0 %v3639_v55  ;;  %4870 = vmatprep.subr.mxu1 %v5510_v35 }
 0x252   : > { %4839 = vmatprep.subr.mxu0 %v5510_v35  ;;  %4871 = vmatpush3.msra.mxu1 %v3728_v3 }
 0x253   : > { %4840 = vmatpush3.msra.mxu0 %v3638_v48  ;;  %4872 = vmatprep.subr.mxu1 %v5510_v35 }
 0x254   : > { %4841 = vmatprep.subr.mxu0 %v5510_v35 }
 0x255   : > { %4842 = vmatpush3.msra.mxu0 %v3637_v50 }
 0x256   : > { %4881 = vmatprep.subr.bf16.mxu0 %v5510_v35 }
 0x296   : > { %v4581_v10 = vpop.f32.mrf.mxu0 }
 0x298   : > { %v4582_v14 = vpop.f32.mrf.mxu0  ;;  %v4603_v15 = vpop.f32.mrf.mxu1 }
 0x299   : > { %v4583_v11 = vadd.f32 %v4582_v14, %v4581_v10 }
 0x29a   : > { %v4584_v16 = vpop.f32.mrf.mxu0  ;;  %v4604_v17 = vpop.f32.mrf.mxu1 }
 0x29b   : > { %v3317_v39 = vadd.f32 %v4583_v11, %v4244_v23  ;;  %v4605_v58 = vadd.f32 %v4604_v17, %v4603_v15  ;;  %v3727_v11 = vld [vmem:[#allocation10 + $0x10] sm:$0xff] }
 0x29c   : > { %v4585_v28 = vpop.f32.mrf.mxu0  ;;  %v4606_v13 = vpop.f32.mrf.mxu1  ;;  %4873 = vmatpush3.msra.mxu1 %v3727_v11 }
 0x29d   : > { %v4586_v34 = vadd.f32 %v4585_v28, %v4584_v16  ;;  %v3358_v57 = vadd.f32 %v4605_v58, %v3317_v39  ;;  %v3622_v16 = vpop.permute.xlu1 %3621  ;;  %4874 = vmatprep.subr.mxu1 %v5510_v35  ;;  %v5285_v39 = vld [vmem:[#allocation12 + $0x28] sm:$0xff]   ;;  %v5286_v58 = vld [vmem:[#allocation12 + $0x20] sm:$0xff]  }
 0x29e   : > { %v4607_v20 = vpop.f32.mrf.mxu1 }
 0x29f   : > { %v3320_v37 = vadd.f32 %v4586_v34, %v4244_v23  ;;  %v4608_v38 = vadd.f32 %v4607_v20, %v4606_v13  ;;  %v3726_v23 = vld [vmem:[#allocation10 + $0x8] sm:$0xff]  ;;  %v5287_v34 = vld [vmem:[#allocation12 + $0x18] sm:$0xff]  }
 0x2a0   : > { %4875 = vmatpush3.msra.mxu1 %v3726_v23 }
 0x2a1   : > { %v3361_v29 = vadd.f32 %v4608_v38, %v3320_v37  ;;  %4876 = vmatprep.subr.mxu1 %v5510_v35  ;;  %v3836_v37 = vld [vmem:[%s5746_s16 + $0x8] sm:$0xff] }
 0x2b6   : > { %v4625_v19 = vpop.f32.mrf.mxu0 }
 0x2b8   : > { %v4626_v21 = vpop.f32.mrf.mxu0  ;;  %v4647_v22 = vpop.f32.mrf.mxu1 }
 0x2b9   : > { %v4627_v12 = vadd.f32 %v4626_v21, %v4625_v19 }
 0x2ba   : > { %v4628_v25 = vpop.f32.mrf.mxu0  ;;  %v4648_v26 = vpop.f32.mrf.mxu1 }
 0x2bb   : > { %v3399_v2 = vadd.f32 %v4627_v12, %v3358_v57  ;;  %v4649_v49 = vadd.f32 %v4648_v26, %v4647_v22  ;;  %v5290_v12 = vld [vmem:[#allocation12] sm:$0xff]   ;;  %v3835_v57 = vld [vmem:[%s5746_s16] sm:$0xff] }
 0x2bc   : > { %v4629_v30 = vpop.f32.mrf.mxu0  ;;  %v4650_v27 = vpop.f32.mrf.mxu1  ;;  %v3837_v38 = vpack.c.bf16 %v3836_v37, %v3835_v57 }
 0x2bd   : > { %v4630_v4 = vadd.f32 %v4629_v30, %v4628_v25  ;;  %v3440_v51 = vadd.f32 %v4649_v49, %v3399_v2 }
 0x2be   : > { %v4651_v24 = vpop.f32.mrf.mxu1 }
 0x2bf   : > { %v3402_v41 = vadd.f32 %v4630_v4, %v3361_v29  ;;  %v4652_v5 = vadd.f32 %v4651_v24, %v4650_v27  ;;  %v5283_v27 = vld [vmem:[#allocation12 + $0x38] sm:$0xff]   ;;  %v3725_v24 = vld [vmem:[#allocation10] sm:$0xff] }
 0x2c0   : > { %4877 = vmatpush3.msra.mxu1 %v3725_v24 }
 0x2c1   : > { %v3443_v18 = vadd.f32 %v4652_v5, %v3402_v41 }
 0x2d6   : > { %v4669_v36 = vpop.f32.mrf.mxu0 }
 0x2d8   : > { %v4670_v6 = vpop.f32.mrf.mxu0  ;;  %v4691_v47 = vpop.f32.mrf.mxu1 }
 0x2d9   : > { %v4671_v43 = vadd.f32 %v4670_v6, %v4669_v36  ;;  %v5284_v36 = vld [vmem:[#allocation12 + $0x30] sm:$0xff]  }
 0x2da   : > { %v4672_v40 = vpop.f32.mrf.mxu0  ;;  %v4692_v32 = vpop.f32.mrf.mxu1  ;;  %v5288_v6 = vld [vmem:[#allocation12 + $0x10] sm:$0xff]  }
 0x2db   : > { %v3481_v42 = vadd.f32 %v4671_v43, %v3440_v51  ;;  %v4693_v45 = vadd.f32 %v4692_v32, %v4691_v47  ;;  %v5289_v47 = vld [vmem:[#allocation12 + $0x8] sm:$0xff]  }
 0x2dc   : > { %v4673_v31 = vpop.f32.mrf.mxu0  ;;  %v4694_v44 = vpop.f32.mrf.mxu1 }
 0x2dd   : > { %v4674_v46 = vadd.f32 %v4673_v31, %v4672_v40  ;;  %v3522_v48 = vadd.f32 %v4693_v45, %v3481_v42  ;;  %v3653_v40 = vld [vmem:[%s6130_s7] sm:$0x1] }
 0x2de   : > { %v4695_v0 = vpop.f32.mrf.mxu1 }
 0x2df   : > { %v3484_v50 = vadd.f32 %v4674_v46, %v3443_v18  ;;  %v4696_v52 = vadd.f32 %v4695_v0, %v4694_v44  ;;  %v3935_v0 = vlaneseq }
 0x2e1   : > { %v3525_v1 = vadd.f32 %v4696_v52, %v3484_v50 }
 0x2f6   : > { %v4713_v9 = vpop.f32.mrf.mxu0 }
 0x2f8   : > { %v4714_v60 = vpop.f32.mrf.mxu0  ;;  %v3603_v55 = vpop.f32.mrf.mxu1 }
 0x2f9   : > { %v4715_v54 = vadd.f32 %v4714_v60, %v4713_v9  ;;  %v3936_v9 = vshrl.u32 %v3935_v0, 7 }
 0x2fa   : > { %v4716_v56 = vpop.f32.mrf.mxu0  ;;  %v4809_v59 = vpop.f32.mrf.mxu1 }
 0x2fb   : > { %v3563_v61 = vadd.f32 %v4715_v54, %v3522_v48  ;;  %v3937_v18 = vsub.s32 0, %v3936_v9 }
 0x2fc   : > { %v4717_v62 = vpop.f32.mrf.mxu0  ;;  %v3606_v63 = vpop.f32.mrf.mxu1 }
 0x2fd   : > { %v3604_v33 = vadd.f32 %v3603_v55, %v3563_v61  ;;  %v4718_v7 = vadd.f32 %v4717_v62, %v4716_v56  ;;  %v4381_v55 = vld [vmem:[%s6134_s11] ss:$0 sm:$0xff] }
 0x2fe   : > { %v4810_v53 = vpop.f32.mrf.mxu1 }
 0x2ff   : > { %v3566_v3 = vadd.f32 %v4718_v7, %v3525_v1  ;;  %v3610_v10 = vmax.f32 %v3604_v33, 0.0 }
 0x301   : > { %v3607_v14 = vadd.f32 %v3606_v63, %v3566_v3  ;;  %v6044_v17 = vmul.f32 %v3617_v8, %v3610_v10 }
 0x303   : > { %v3611_v15 = vmax.f32 %v3607_v14, 0.0 }
 0x305   : > { %v6046_v28 = vmul.f32 %v3622_v16, %v3611_v15 }
 0x307   : > { %v3626_v13 = vadd.f32 %v6046_v28, %v6044_v17 }
 0x309   : > { %v3627_v19 = vrot.slane %v3626_v13, 4 }
 0x30b   : > { %v3628_v20 = vadd.f32 %v3627_v19, %v3626_v13 }
 0x30d   : > { %v3629_v21 = vrot.slane %v3628_v20, 2 }
 0x30f   : > { %v3630_v22 = vadd.f32 %v3629_v21, %v3628_v20 }
 0x311   : > { %v3631_v25 = vrot.slane %v3630_v22, 1 }
 0x313   : > { %v3632_v26 = vadd.f32 %v3631_v25, %v3630_v22 }
 0x315   : > { %v3636_v30 = vmul.f32 0.0625, %v3632_v26 }
 0x317   : > { %4844 = vmatmul.mubr.f32.vlgmr.msra.gmra.mxu0 %v3636_v30 }
 0x318   : > { %4897 = vmatprep.mubr.msk.bf16.mxu0 %vm5511_vm7, %v5510_v35  ;;  %4882 = vmatpush3.bf16.msra.mxu0 %v5283_v27 }
 0x319   : > { %4883 = vmatprep.subr.bf16.mxu0 %v5510_v35 }
 0x31c   : > { %4884 = vmatpush3.bf16.msra.mxu0 %v5284_v36 }
 0x31d   : > { %4885 = vmatprep.subr.bf16.mxu0 %v5510_v35 }
 0x320   : > { %4886 = vmatpush3.bf16.msra.mxu0 %v5285_v39 }
 0x321   : > { %4887 = vmatprep.subr.bf16.mxu0 %v5510_v35 }
 0x324   : > { %4888 = vmatpush3.bf16.msra.mxu0 %v5286_v58 }
 0x325   : > { %4889 = vmatprep.subr.bf16.mxu0 %v5510_v35 }
 0x328   : > { %4890 = vmatpush3.bf16.msra.mxu0 %v5287_v34 }
 0x329   : > { %4891 = vmatprep.subr.bf16.mxu0 %v5510_v35 }
 0x32c   : > { %4892 = vmatpush3.bf16.msra.mxu0 %v5288_v6 }
 0x32d   : > { %4893 = vmatprep.subr.bf16.mxu0 %v5510_v35 }
 0x330   : > { %4894 = vmatpush3.bf16.msra.mxu0 %v5289_v47 }
 0x331   : > { %4895 = vmatprep.subr.bf16.mxu0 %v5510_v35  ;;  %v3741_v35 = vld [vmem:[%s6132_s9] sm:$0x1] }
 0x334   : > { %4896 = vmatpush3.bf16.msra.mxu0 %v5290_v12 }
 0x337   : > { %4898 = vmatmul.mubr.bf16.vlgmr.msra.gmra.mxu0 %v3837_v38 }
 0x3d7   : > { %v3720_v32 = vpop.f32.mrf.mxu0 }
 0x3d8   : > { %v3721_v2 = vadd.f32 %v3720_v32, %v3653_v40 }
 0x3d9   : > { %v4845_v49 = vpop.f32.mrf.mxu0 }
 0x3da   : > { %v3724_v4 = vmax.f32 %v3721_v2, 0.0 }
 0x3dc   : > { %4879 = vmatmul.mubr.f32.vlgmr.msra.gmra.mxu1 %v3724_v4 }
 0x3f7   : > { %v3926_v29 = vpop.f32.mrf.mxu0 }
 0x3f8   : > { %v3927_v50 = vadd.f32 %v4381_v55, %v3926_v29 }
 0x3f9   : > { %v4899_v43 = vpop.f32.mrf.mxu0 }
 0x3fb   : > { %v3929_v31 = vpop.f32.mrf.mxu0 }
 0x3fc   : > { %v3930_v54 = vadd.f32 %v4381_v55, %v3929_v31 }
 0x3fd   : > { %v4900_v44 = vpop.f32.mrf.mxu0 }
 0x49c   : > { %v3808_v51 = vpop.f32.mrf.mxu1 }
 0x49d   : > { %v3809_v41 = vadd.f32 %v3808_v51, %v3741_v35 }
 0x49e   : > { %v4880_v5 = vpop.f32.mrf.mxu1 }
 0x49f   : > { %v4380_v42 = vmul.f32 -1.442695, %v3809_v41 }
 0x4a1   : > { %5291 = vpow2.f32 %v4380_v42 }
 0x4ae   : > { %v5292_v45 = vpop.eup %5291 }
 0x4af   : > { %v3815_v46 = vadd.f32 1.0, %v5292_v45 }
 0x4b1   : > { %5293 = vrcp.f32 %v3815_v46 }
 0x4be   : > { %v5294_v60 = vpop.eup %5293 }
 0x4bf   : > { %v3938_v48 = vrot.slane %v5294_v60, %v3937_v18 }
 0x4c1   : > { %v3939_v52 = vmul.f32 %v3938_v48, %v6044_v17  ;;  %v3940_v56 = vmul.f32 %v3938_v48, %v6046_v28 }
 0x4c3   : > { %v3941_v59 = vadd.f32 %v3939_v52, %v3927_v50  ;;  %v3942_v61 = vadd.f32 %v3940_v56, %v3930_v54 }
 0x4c5   : > { %v3943_v62 = vmax.f32 %v3941_v59, 0.0  ;;  %v3944_v63 = vmax.f32 %v3942_v61, 0.0 }
 0x4c7   : > { %3945 = vst [vmem:[%s494_s17] sm:$0xff] %v3943_v62  ;;  %3946 = vst [vmem:[%s494_s17 + $0x8] sm:$0xff] %v3944_v63 }
 0x4c8   : > { %5439 = shalt.err (!%p5436_p2)
}
 0x4c9   : > { %s5440_s26 = scalar_lea.hbm %s6079_s20, 256  ;;  %s5444_s28 = scalar_lea.hbm %s6135_s12, 512 }
 0x4ca   : > { %p5441_p9 = scmp.ne.s32.totalorder %s6079_s20, %s5440_s26  ;;  %p5445_p12 = scmp.lt.s32.totalorder %s6079_s20, %s6135_s12 }
 0x4cb   : > { %p5446_p10 = scmp.lt.s32.totalorder %s5444_s28, %s5440_s26 }
 0x4cc   : > { %p5442_p3 = pnand %p5441_p9, %p5618_p5 }
 0x4cd   : > { %p5447_p7 = por %p5446_p10, %p5445_p12 }
 0x4ce   : > { %p5443_p4 = pneg %p5442_p3 }
 0x4d0   : > { %p5448_p8 = pnand %p5447_p7, %p5443_p4 }
 0x4d2   : > { %5451 = shalt.err (!%p5448_p8)
}
 0x4d3   : > { %s5513_s27 = smov 128   ;;  %s5514_s19 = smov 8  }
 0x4d4   : > { %4921 = dma.vmem_to_hbm [thread:$0]  (%p5618_p5), %s6081_s14, 256, %s6079_s20, %s6083_s21, %s5513_s27, %s5513_s27, %s5514_s19  }
 0x4d5 PF: > { %s6186_s25 = sld [smem:[#allocation18_spill]]  ;;  %p4953_p0 = scmp.ge.s32.totalorder %s5498_s24, 2 }
 0x4d7   : > { %p4940_p11 = pnand %p4953_p0, %p5622_p6 }
 0x4d9   : > { %p4941_p1 = pneg %p4940_p11 }
 0x4db   : > { %s3976_s15 = sand.u32 1, %s6186_s25  }
 0x4dc   : > { %s3977_s18 = scalar_lea.sflag [#allocation6], %s3976_s15 }
 0x4dd   : > { %5481 = dma.done.wait (%p4941_p1), %s3977_s18, 256  }
 0x4de   : > { %5483 = vsyncadd (%p4941_p1), %s3977_s18, 4294967040  ;;  %s6188_s24 = sld [smem:[#allocation20_spill]]  ;;  %s6191_s21 = smov %s5490_s22 }
 0x4df   : > { %s6189_s26 = sld [smem:[#allocation19_spill]] }
 0x4e0   : > { %s6190_s23 = sld [smem:[#allocation21_spill]] }
 0x4e4   : > { %p25_p13 = scmp.ge.s32.totalorder %s6188_s24, 4  }
 0x4e5   : > { %s6192_s22 = smov %s6189_s26 }
 0x4e6   :  { %27 = sbr.rel (!%p25_p13) target bundleno = 6 (0x6), region = 127 }
 0x4eb   :  { %3982 = vsyncpa [#allocation5], 1 }
 0x4ec   :  { %3984 = vsyncpa [#allocation5 + $0x1], 1 }
 0x4ed   :  { %3985 = vsyncpa [#allocation8], 1 }
 0x4ee   :  { %3986 = vsyncpa [#allocation11], 1 }
 0x4ef   :  { %3987 = vsyncpa [#allocation6], 1 }
 0x4f0   :  { %3989 = vsyncpa [#allocation6 + $0x1], 1 }

</bundles_post_ra>
